<compile_context>
chip_gen: v7x
topology: tpu7x:2x2x1
jax: 0.10.0
libtpu: 0.0.40
codegen_flags: <defaults>
</compile_context>

<pallas_src>
import functools
import math

import jax
import jax.numpy as jnp
import numpy as np
from jax.experimental import pallas as pl
from jax.experimental.pallas import tpu as pltpu

# ---------------- synthetic, small config ----------------
B = 2
C = 32                 # feature channels == inner_dim == d_model
Z, H, W = 2, 4, 4      # N = Z*H*W = 32 == d_model (needed by the PE broadcast quirk)
N = Z * H * W
ATTN_DIM_LIST = [8, 8]
NUM_HEAD_LIST = [4, 4]
NUM_CLASS = 10
NUM_CLASS_PAD = 128    # lane-dense output width; sliced back to NUM_CLASS in the wrapper
INNER_DIM = ATTN_DIM_LIST[0] * NUM_HEAD_LIST[0]
assert INNER_DIM == C and N == INNER_DIM
EPS = 1e-6
MAX_LEN = 5000

NUM_LAYER_REFS = 9     # w_qkv, w_out, b_out, ln1_w, ln1_b, w_ff1, w_ff2, ln2_w, ln2_b
NUM_HEAD_MLP_REFS = 6  # w1, b1, w2, b2, w3(padded), b3(padded)


# ---------------- fused Pallas kernel ----------------
def _kernel_layernorm(y, w, b):
    # Single-pass statistics: sum and sum-of-squares reductions are independent
    # (no mean -> subtract -> second reduce dependency chain).
    mu = jnp.mean(y, axis=-1, keepdims=True)
    ms = jnp.mean(y * y, axis=-1, keepdims=True)
    var = ms - mu * mu
    return (y - mu) * jax.lax.rsqrt(var + EPS) * w + b


def _fused_kernel(*refs, layer_cfgs, batch, seq_len):
    """PE add + all TransformerEncoder layers + mean-pool + MLP head for the
    WHOLE batch, with row-wise work flattened to (batch*seq_len, C).

    refs = (x, pe, <layer-0 params>, <layer-1 params>, ..., <head params>, out)
    """
    x_ref, pe_ref = refs[0], refs[1]
    o_ref = refs[-1]

    # PositionalEncoding: PE was pre-broadcast on the host -> lane-dense add.
    x = x_ref[...] + pe_ref[...]                                    # (B*N, C) f32

    pos = 2
    for heads, dim_head in layer_cfgs:
        (wqkv, wo, bo, ln1w, ln1b,
         wf1, wf2, ln2w, ln2b) = refs[pos:pos + NUM_LAYER_REFS]
        pos += NUM_LAYER_REFS
        c = heads * dim_head
        scale = dim_head ** -0.5

        # --- SelfAttention ---
        # Packed QKV: ONE (B*N, C) @ (C, 3C) matmul (bf16 operands, f32 acc).
        qkv = jnp.dot(x.astype(jnp.bfloat16), wqkv[...],
                      preferred_element_type=jnp.float32)           # (B*N, 3C)
        qkv_b = qkv.astype(jnp.bfloat16)

        # Per-(batch, head) scaled-dot-product attention (small static loops);
        # head outputs are assembled lane-dense so the output projection is a
        # single (B*N, C) @ (C, C) matmul.
        batch_out = []
        for b in range(batch):
            r0 = b * seq_len
            per_head = []
            for h in range(heads):
                q = qkv_b[r0:r0 + seq_len, 0 * c + h * dim_head:0 * c + (h + 1) * dim_head]
                k = qkv_b[r0:r0 + seq_len, 1 * c + h * dim_head:1 * c + (h + 1) * dim_head]
                v = qkv_b[r0:r0 + seq_len, 2 * c + h * dim_head:2 * c + (h + 1) * dim_head]
                dots = jax.lax.dot_general(
                    q, k, (((1,), (1,)), ((), ())),
                    preferred_element_type=jnp.float32) * scale      # (N, N) f32
                dots = dots - jnp.max(dots, axis=-1, keepdims=True)
                p = jnp.exp(dots)
                p = p * pl.reciprocal(jnp.sum(p, axis=-1, keepdims=True), approx=True)
                per_head.append(jnp.dot(p.astype(jnp.bfloat16), v,
                                        preferred_element_type=jnp.float32))   # (N, d)
            batch_out.append(jnp.concatenate(per_head, axis=-1))     # (N, C)
        heads_cat = jnp.concatenate(batch_out, axis=0)               # (B*N, C)

        # Fused output projection across heads AND batch: one MXU op + bias.
        attn = jnp.dot(heads_cat.astype(jnp.bfloat16), wo[...],
                       preferred_element_type=jnp.float32) + bo[...]

        # --- residual + LayerNorm 1 ---
        y = _kernel_layernorm(x + attn, ln1w[...], ln1b[...])

        # --- FFN (two bias-free linears, no nonlinearity — as in the reference) ---
        f1 = jnp.dot(y.astype(jnp.bfloat16), wf1[...], preferred_element_type=jnp.float32)
        f = jnp.dot(f1.astype(jnp.bfloat16), wf2[...], preferred_element_type=jnp.float32)

        # --- residual + LayerNorm 2 ---
        x = _kernel_layernorm(y + f, ln2w[...], ln2b[...])

    # --- mean over seq + Linear/ReLU6/Linear/ReLU6/Linear/Sigmoid head ---
    # Head MLP runs on BOTH pooled rows at once.
    w1, b1, w2, b2, w3, b3 = refs[pos:pos + NUM_HEAD_MLP_REFS]
    pooled = jnp.concatenate(
        [jnp.mean(x[b * seq_len:(b + 1) * seq_len], axis=0, keepdims=True)
         for b in range(batch)], axis=0)                             # (B, C)
    h1 = jnp.clip(jnp.dot(pooled.astype(jnp.bfloat16), w1[...],
                          preferred_element_type=jnp.float32) + b1[...], 0.0, 6.0)
    h2 = jnp.clip(jnp.dot(h1.astype(jnp.bfloat16), w2[...],
                          preferred_element_type=jnp.float32) + b2[...], 0.0, 6.0)
    logits = jnp.dot(h2.astype(jnp.bfloat16), w3[...],
                     preferred_element_type=jnp.float32) + b3[...]   # (B, PAD)
    o_ref[...] = jax.nn.sigmoid(logits)


# ---------------- wrappers ----------------
def _to_bf16(a):
    return a.astype(jnp.bfloat16)


def _flatten_layer_params(p):
    # Matmul weight matrices go bf16 (MXU operands); biases / LN params stay f32
    # because they feed VPU elementwise math.
    return [_to_bf16(p['w_qkv']), _to_bf16(p['w_out']), p['b_out'],
            p['ln1_w'], p['ln1_b'],
            _to_bf16(p['w_ff1']), _to_bf16(p['w_ff2']), p['ln2_w'], p['ln2_b']]


def _estimate_cost(b, n, c, layer_cfgs, bytes_accessed):
    flops = 0
    trans = 0
    for heads, d in layer_cfgs:
        flops += 2 * (b * n) * c * (3 * c)                 # packed QKV projection
        flops += b * heads * 4 * n * n * d                 # scores + PV
        flops += 2 * (b * n) * c * c                       # fused out-projection
        flops += 2 * 2 * (b * n) * c * (4 * c)             # two FFN matmuls
        trans += b * heads * n * n + 4 * b * n             # exp + rsqrt / reciprocal
    flops += 2 * b * (c * 512 + 512 * 256 + 256 * NUM_CLASS_PAD)
    trans += b * NUM_CLASS_PAD                             # sigmoid
    return pl.CostEstimate(flops=int(flops), transcendentals=int(trans),
                           bytes_accessed=int(bytes_accessed))


def fused_forward(seq, pe_full, layer_params, layer_cfgs, head_params):
    """ONE pallas_call (grid=()) for PE + all transformer layers + pooled head."""
    b, n, c = seq.shape
    x2d = seq.reshape(b * n, c)
    pe2d = pe_full.reshape(b * n, c)

    flat_params = []
    for p in layer_params:
        flat_params += _flatten_layer_params(p)

    # Lane-dense head output: zero-pad the final linear to 128 output columns.
    w3p = jnp.zeros((head_params['w3'].shape[0], NUM_CLASS_PAD), jnp.float32
                    ).at[:, :NUM_CLASS].set(head_params['w3'])
    b3p = jnp.zeros((1, NUM_CLASS_PAD), jnp.float32).at[:, :NUM_CLASS].set(head_params['b3'])
    flat_params += [_to_bf16(head_params['w1']), head_params['b1'],
                    _to_bf16(head_params['w2']), head_params['b2'],
                    _to_bf16(w3p), b3p]

    kernel = functools.partial(_fused_kernel, layer_cfgs=tuple(layer_cfgs),
                               batch=b, seq_len=n)
    n_in = 2 + len(flat_params)
    bytes_accessed = (4 * x2d.size + 4 * pe2d.size + 4 * b * NUM_CLASS_PAD
                      + sum(int(a.size) * a.dtype.itemsize for a in flat_params))
    cost = _estimate_cost(b, n, c, layer_cfgs, bytes_accessed)

    # grid=() -> everything is a single whole-array VMEM block; weights are
    # DMA'd exactly once and single-buffered (no pipeline, no double-buffer).
    vmem = pl.BlockSpec(memory_space=pltpu.MemorySpace.VMEM)
    out = pl.pallas_call(
        kernel,
        out_shape=jax.ShapeDtypeStruct((b, NUM_CLASS_PAD), jnp.float32),
        in_specs=[vmem] * n_in,
        out_specs=vmem,
        cost_estimate=cost,
    )(x2d, pe2d, *flat_params)
    return out[:, :NUM_CLASS]


def make_pe(d_model, max_len=MAX_LEN):
    position = jnp.arange(max_len, dtype=jnp.float32)[:, None]
    div_term = jnp.exp(jnp.arange(0, d_model, 2, dtype=jnp.float32)
                       * (-math.log(10000.0) / d_model))
    pe = jnp.zeros((max_len, d_model), jnp.float32)
    pe = pe.at[:, 0::2].set(jnp.sin(position * div_term))
    pe = pe.at[:, 1::2].set(jnp.cos(position * div_term))
    return pe                                                        # (max_len, d_model)


def cnn_feature_transformer_forward(x5, layer_params, head_params):
    batch = x5.shape[0]
    # rearrange 'b c z h w -> (b z) c h w'
    feat = jnp.transpose(x5, (0, 2, 1, 3, 4)).reshape(batch * Z, C, H, W)
    # feature_model(x)[-1] with an identity feature model -> feat unchanged
    # rearrange '(b z) c h w -> b z h w c', then flatten dims 1..3
    seq = jnp.transpose(feat.reshape(batch, Z, C, H, W), (0, 1, 3, 4, 2)).reshape(batch, N, C)
    # PositionalEncoding (literal reference semantics: pe[:B] of shape
    # (B, d_model, 1) broadcasts over the last axis; only valid because
    # N == d_model).  Pre-broadcast on the host so the kernel does a plain
    # lane-dense add instead of loading a width-1 column.
    pe_full = jnp.broadcast_to(make_pe(INNER_DIM)[:batch][:, :, None], (batch, N, C))
    layer_cfgs = [(nh, ad) for ad, nh in zip(ATTN_DIM_LIST, NUM_HEAD_LIST)]  # (heads, dim_head)
    return fused_forward(seq, pe_full, layer_params, layer_cfgs, head_params)


# ---------------- pure-JAX reference (for a sanity check) ----------------
def _ref_layernorm(y, w, b):
    mu = jnp.mean(y, axis=-1, keepdims=True)
    var = jnp.mean(jnp.square(y - mu), axis=-1, keepdims=True)
    return (y - mu) / jnp.sqrt(var + EPS) * w + b


def _ref_layer(x, p, heads, dim_head):
    c = heads * dim_head
    qkv = x @ p['w_qkv']
    q, k, v = jnp.split(qkv, 3, axis=-1)
    sh = lambda t: t.reshape(t.shape[0], t.shape[1], heads, dim_head).transpose(0, 2, 1, 3)
    q, k, v = sh(q), sh(k), sh(v)
    dots = jnp.einsum('bhnd,bhmd->bhnm', q, k) * dim_head ** -0.5
    a = jax.nn.softmax(dots, axis=-1)
    out = jnp.einsum('bhnm,bhmd->bhnd', a, v).transpose(0, 2, 1, 3).reshape(x.shape[0], -1, c)
    out = out @ p['w_out'] + p['b_out'][0]
    y = _ref_layernorm(x + out, p['ln1_w'][0], p['ln1_b'][0])
    f = (y @ p['w_ff1']) @ p['w_ff2']
    return _ref_layernorm(y + f, p['ln2_w'][0], p['ln2_b'][0])


def _ref_forward(x5, layer_params, head_params):
    feat = jnp.transpose(x5, (0, 2, 1, 3, 4)).reshape(B * Z, C, H, W)
    seq = jnp.transpose(feat.reshape(B, Z, C, H, W), (0, 1, 3, 4, 2)).reshape(B, N, C)
    seq = seq + make_pe(INNER_DIM)[:B][:, :, None]
    x = seq
    for p, (ad, nh) in zip(layer_params, zip(ATTN_DIM_LIST, NUM_HEAD_LIST)):
        x = _ref_layer(x, p, nh, ad)
    pooled = jnp.mean(x, axis=1)
    h1 = jnp.clip(pooled @ head_params['w1'] + head_params['b1'][0], 0.0, 6.0)
    h2 = jnp.clip(h1 @ head_params['w2'] + head_params['b2'][0], 0.0, 6.0)
    return jax.nn.sigmoid(h2 @ head_params['w3'] + head_params['b3'][0])


# ---------------- deterministic parameter init ----------------
def init_layer_params(key, heads, dim_head):
    c = heads * dim_head
    ks = jax.random.split(key, 5)
    return dict(
        w_qkv=0.05 * jax.random.normal(ks[0], (c, 3 * c), jnp.float32),
        w_out=0.05 * jax.random.normal(ks[1], (c, c), jnp.float32),
        b_out=0.01 * jax.random.normal(ks[2], (1, c), jnp.float32),
        ln1_w=jnp.ones((1, c), jnp.float32),
        ln1_b=jnp.zeros((1, c), jnp.float32),
        w_ff1=0.05 * jax.random.normal(ks[3], (c, 4 * c), jnp.float32),
        w_ff2=0.05 * jax.random.normal(ks[4], (4 * c, c), jnp.float32),
        ln2_w=jnp.ones((1, c), jnp.float32),
        ln2_b=jnp.zeros((1, c), jnp.float32),
    )


def init_head_params(key):
    ks = jax.random.split(key, 6)
    return dict(
        w1=0.05 * jax.random.normal(ks[0], (INNER_DIM, 512), jnp.float32),
        b1=0.01 * jax.random.normal(ks[1], (1, 512), jnp.float32),
        w2=0.05 * jax.random.normal(ks[2], (512, 256), jnp.float32),
        b2=0.01 * jax.random.normal(ks[3], (1, 256), jnp.float32),
        w3=0.05 * jax.random.normal(ks[4], (256, NUM_CLASS), jnp.float32),
        b3=0.01 * jax.random.normal(ks[5], (1, NUM_CLASS), jnp.float32),
    )


if __name__ == "__main__":
    root = jax.random.PRNGKey(0)
    k_in, k_head, *k_layers = jax.random.split(root, 2 + len(ATTN_DIM_LIST))

    x5 = jax.random.normal(k_in, (B, C, Z, H, W), jnp.float32)   # 'b c z h w'
    layer_params = [init_layer_params(k, nh, ad)
                    for k, (ad, nh) in zip(k_layers, zip(ATTN_DIM_LIST, NUM_HEAD_LIST))]
    head_params = init_head_params(k_head)

    out = cnn_feature_transformer_forward(x5, layer_params, head_params)
    out = jax.block_until_ready(out)

    ref = _ref_forward(x5, layer_params, head_params)
    # Tolerance accounts for bf16 MXU operands + approx-reciprocal softmax
    # vs the pure-f32 reference (output is post-sigmoid, O(0.5) magnitude).
    np.testing.assert_allclose(np.asarray(out), np.asarray(ref), rtol=3e-2, atol=1.5e-2)
    assert out.shape == (B, NUM_CLASS)

    print("KERNEL_OK")
</pallas_src>

<mosaic_0001>
module attributes {stable_mosaic.version = 11 : i64} {
  func.func @_fused_kernel(%arg0: memref<64x32xf32, #tpu.memory_space<vmem>>, %arg1: memref<64x32xf32, #tpu.memory_space<vmem>>, %arg2: memref<32x96xbf16, #tpu.memory_space<vmem>>, %arg3: memref<32x32xbf16, #tpu.memory_space<vmem>>, %arg4: memref<1x32xf32, #tpu.memory_space<vmem>>, %arg5: memref<1x32xf32, #tpu.memory_space<vmem>>, %arg6: memref<1x32xf32, #tpu.memory_space<vmem>>, %arg7: memref<32x128xbf16, #tpu.memory_space<vmem>>, %arg8: memref<128x32xbf16, #tpu.memory_space<vmem>>, %arg9: memref<1x32xf32, #tpu.memory_space<vmem>>, %arg10: memref<1x32xf32, #tpu.memory_space<vmem>>, %arg11: memref<32x96xbf16, #tpu.memory_space<vmem>>, %arg12: memref<32x32xbf16, #tpu.memory_space<vmem>>, %arg13: memref<1x32xf32, #tpu.memory_space<vmem>>, %arg14: memref<1x32xf32, #tpu.memory_space<vmem>>, %arg15: memref<1x32xf32, #tpu.memory_space<vmem>>, %arg16: memref<32x128xbf16, #tpu.memory_space<vmem>>, %arg17: memref<128x32xbf16, #tpu.memory_space<vmem>>, %arg18: memref<1x32xf32, #tpu.memory_space<vmem>>, %arg19: memref<1x32xf32, #tpu.memory_space<vmem>>, %arg20: memref<32x512xbf16, #tpu.memory_space<vmem>>, %arg21: memref<1x512xf32, #tpu.memory_space<vmem>>, %arg22: memref<512x256xbf16, #tpu.memory_space<vmem>>, %arg23: memref<1x256xf32, #tpu.memory_space<vmem>>, %arg24: memref<256x128xbf16, #tpu.memory_space<vmem>>, %arg25: memref<1x128xf32, #tpu.memory_space<vmem>>, %arg26: memref<2x128xf32, #tpu.memory_space<vmem>>) attributes {dimension_semantics = [], scalar_prefetch = 0 : i64, scratch_operands = 0 : i64, tpu.core_type = #tpu.core_type<tc>} {
    %c0 = arith.constant 0 : index
    %c0_0 = arith.constant 0 : index
    %0 = vector.load %arg0[%c0, %c0_0] : memref<64x32xf32, #tpu.memory_space<vmem>>, vector<64x32xf32>
    %c0_1 = arith.constant 0 : index
    %c0_2 = arith.constant 0 : index
    %1 = vector.load %arg1[%c0_1, %c0_2] : memref<64x32xf32, #tpu.memory_space<vmem>>, vector<64x32xf32>
    %2 = arith.addf %0, %1 : vector<64x32xf32>
    %3 = arith.truncf %2 : vector<64x32xf32> to vector<64x32xbf16>
    %c0_3 = arith.constant 0 : index
    %c0_4 = arith.constant 0 : index
    %4 = vector.load %arg2[%c0_3, %c0_4] : memref<32x96xbf16, #tpu.memory_space<vmem>>, vector<32x96xbf16>
    %cst = arith.constant dense<0.000000e+00> : vector<64x96xf32>
    %5 = tpu.matmul %3, %4, %cst {dimension_numbers = #tpu.dot_dimension_numbers<[1], [0], [0], [1], [0, 0, 1, 1], [], []>} : vector<64x32xbf16>, vector<32x96xbf16>, vector<64x96xf32> -> vector<64x96xf32>
    %6 = arith.truncf %5 : vector<64x96xf32> to vector<64x96xbf16>
    %7 = vector.extract_strided_slice %6 {offsets = [0, 0], sizes = [32, 8], strides = [1, 1]} : vector<64x96xbf16> to vector<32x8xbf16>
    %8 = vector.extract_strided_slice %6 {offsets = [0, 32], sizes = [32, 8], strides = [1, 1]} : vector<64x96xbf16> to vector<32x8xbf16>
    %9 = vector.extract_strided_slice %6 {offsets = [0, 64], sizes = [32, 8], strides = [1, 1]} : vector<64x96xbf16> to vector<32x8xbf16>
    %cst_5 = arith.constant dense<0.000000e+00> : vector<32x32xf32>
    %10 = tpu.matmul %7, %8, %cst_5 {dimension_numbers = #tpu.dot_dimension_numbers<[1], [1], [0], [0], [0, 0, 1, 0], [], []>} : vector<32x8xbf16>, vector<32x8xbf16>, vector<32x32xf32> -> vector<32x32xf32>
    %cst_6 = arith.constant 0.353553385 : f32
    %11 = vector.broadcast %cst_6 : f32 to vector<32x32xf32>
    %12 = arith.mulf %10, %11 : vector<32x32xf32>
    %cst_7 = arith.constant dense<0xFF800000> : vector<32xf32>
    %13 = vector.multi_reduction <maximumf>, %12, %cst_7 [1] : vector<32x32xf32> to vector<32xf32>
    %14 = vector.shape_cast %13 : vector<32xf32> to vector<32x1xf32>
    %15 = vector.broadcast %14 : vector<32x1xf32> to vector<32x32xf32>
    %16 = arith.subf %12, %15 : vector<32x32xf32>
    %17 = math.exp %16 : vector<32x32xf32>
    %cst_8 = arith.constant dense<0.000000e+00> : vector<32xf32>
    %18 = vector.multi_reduction <add>, %17, %cst_8 [1] : vector<32x32xf32> to vector<32xf32>
    %19 = vector.shape_cast %18 : vector<32xf32> to vector<32x1xf32>
    %20 = tpu.reciprocal %19 {approx = true} : vector<32x1xf32> -> vector<32x1xf32>
    %21 = vector.broadcast %20 : vector<32x1xf32> to vector<32x32xf32>
    %22 = arith.mulf %17, %21 : vector<32x32xf32>
    %23 = arith.truncf %22 : vector<32x32xf32> to vector<32x32xbf16>
    %cst_9 = arith.constant dense<0.000000e+00> : vector<32x8xf32>
    %24 = tpu.matmul %23, %9, %cst_9 {dimension_numbers = #tpu.dot_dimension_numbers<[1], [0], [0], [1], [0, 0, 1, 1], [], []>} : vector<32x32xbf16>, vector<32x8xbf16>, vector<32x8xf32> -> vector<32x8xf32>
    %25 = vector.extract_strided_slice %6 {offsets = [0, 8], sizes = [32, 8], strides = [1, 1]} : vector<64x96xbf16> to vector<32x8xbf16>
    %26 = vector.extract_strided_slice %6 {offsets = [0, 40], sizes = [32, 8], strides = [1, 1]} : vector<64x96xbf16> to vector<32x8xbf16>
    %27 = vector.extract_strided_slice %6 {offsets = [0, 72], sizes = [32, 8], strides = [1, 1]} : vector<64x96xbf16> to vector<32x8xbf16>
    %cst_10 = arith.constant dense<0.000000e+00> : vector<32x32xf32>
    %28 = tpu.matmul %25, %26, %cst_10 {dimension_numbers = #tpu.dot_dimension_numbers<[1], [1], [0], [0], [0, 0, 1, 0], [], []>} : vector<32x8xbf16>, vector<32x8xbf16>, vector<32x32xf32> -> vector<32x32xf32>
    %cst_11 = arith.constant 0.353553385 : f32
    %29 = vector.broadcast %cst_11 : f32 to vector<32x32xf32>
    %30 = arith.mulf %28, %29 : vector<32x32xf32>
    %cst_12 = arith.constant dense<0xFF800000> : vector<32xf32>
    %31 = vector.multi_reduction <maximumf>, %30, %cst_12 [1] : vector<32x32xf32> to vector<32xf32>
    %32 = vector.shape_cast %31 : vector<32xf32> to vector<32x1xf32>
    %33 = vector.broadcast %32 : vector<32x1xf32> to vector<32x32xf32>
    %34 = arith.subf %30, %33 : vector<32x32xf32>
    %35 = math.exp %34 : vector<32x32xf32>
    %cst_13 = arith.constant dense<0.000000e+00> : vector<32xf32>
    %36 = vector.multi_reduction <add>, %35, %cst_13 [1] : vector<32x32xf32> to vector<32xf32>
    %37 = vector.shape_cast %36 : vector<32xf32> to vector<32x1xf32>
    %38 = tpu.reciprocal %37 {approx = true} : vector<32x1xf32> -> vector<32x1xf32>
    %39 = vector.broadcast %38 : vector<32x1xf32> to vector<32x32xf32>
    %40 = arith.mulf %35, %39 : vector<32x32xf32>
    %41 = arith.truncf %40 : vector<32x32xf32> to vector<32x32xbf16>
    %cst_14 = arith.constant dense<0.000000e+00> : vector<32x8xf32>
    %42 = tpu.matmul %41, %27, %cst_14 {dimension_numbers = #tpu.dot_dimension_numbers<[1], [0], [0], [1], [0, 0, 1, 1], [], []>} : vector<32x32xbf16>, vector<32x8xbf16>, vector<32x8xf32> -> vector<32x8xf32>
    %43 = vector.extract_strided_slice %6 {offsets = [0, 16], sizes = [32, 8], strides = [1, 1]} : vector<64x96xbf16> to vector<32x8xbf16>
    %44 = vector.extract_strided_slice %6 {offsets = [0, 48], sizes = [32, 8], strides = [1, 1]} : vector<64x96xbf16> to vector<32x8xbf16>
    %45 = vector.extract_strided_slice %6 {offsets = [0, 80], sizes = [32, 8], strides = [1, 1]} : vector<64x96xbf16> to vector<32x8xbf16>
    %cst_15 = arith.constant dense<0.000000e+00> : vector<32x32xf32>
    %46 = tpu.matmul %43, %44, %cst_15 {dimension_numbers = #tpu.dot_dimension_numbers<[1], [1], [0], [0], [0, 0, 1, 0], [], []>} : vector<32x8xbf16>, vector<32x8xbf16>, vector<32x32xf32> -> vector<32x32xf32>
    %cst_16 = arith.constant 0.353553385 : f32
    %47 = vector.broadcast %cst_16 : f32 to vector<32x32xf32>
    %48 = arith.mulf %46, %47 : vector<32x32xf32>
    %cst_17 = arith.constant dense<0xFF800000> : vector<32xf32>
    %49 = vector.multi_reduction <maximumf>, %48, %cst_17 [1] : vector<32x32xf32> to vector<32xf32>
    %50 = vector.shape_cast %49 : vector<32xf32> to vector<32x1xf32>
    %51 = vector.broadcast %50 : vector<32x1xf32> to vector<32x32xf32>
    %52 = arith.subf %48, %51 : vector<32x32xf32>
    %53 = math.exp %52 : vector<32x32xf32>
    %cst_18 = arith.constant dense<0.000000e+00> : vector<32xf32>
    %54 = vector.multi_reduction <add>, %53, %cst_18 [1] : vector<32x32xf32> to vector<32xf32>
    %55 = vector.shape_cast %54 : vector<32xf32> to vector<32x1xf32>
    %56 = tpu.reciprocal %55 {approx = true} : vector<32x1xf32> -> vector<32x1xf32>
    %57 = vector.broadcast %56 : vector<32x1xf32> to vector<32x32xf32>
    %58 = arith.mulf %53, %57 : vector<32x32xf32>
    %59 = arith.truncf %58 : vector<32x32xf32> to vector<32x32xbf16>
    %cst_19 = arith.constant dense<0.000000e+00> : vector<32x8xf32>
    %60 = tpu.matmul %59, %45, %cst_19 {dimension_numbers = #tpu.dot_dimension_numbers<[1], [0], [0], [1], [0, 0, 1, 1], [], []>} : vector<32x32xbf16>, vector<32x8xbf16>, vector<32x8xf32> -> vector<32x8xf32>
    %61 = vector.extract_strided_slice %6 {offsets = [0, 24], sizes = [32, 8], strides = [1, 1]} : vector<64x96xbf16> to vector<32x8xbf16>
    %62 = vector.extract_strided_slice %6 {offsets = [0, 56], sizes = [32, 8], strides = [1, 1]} : vector<64x96xbf16> to vector<32x8xbf16>
    %63 = vector.extract_strided_slice %6 {offsets = [0, 88], sizes = [32, 8], strides = [1, 1]} : vector<64x96xbf16> to vector<32x8xbf16>
    %cst_20 = arith.constant dense<0.000000e+00> : vector<32x32xf32>
    %64 = tpu.matmul %61, %62, %cst_20 {dimension_numbers = #tpu.dot_dimension_numbers<[1], [1], [0], [0], [0, 0, 1, 0], [], []>} : vector<32x8xbf16>, vector<32x8xbf16>, vector<32x32xf32> -> vector<32x32xf32>
    %cst_21 = arith.constant 0.353553385 : f32
    %65 = vector.broadcast %cst_21 : f32 to vector<32x32xf32>
    %66 = arith.mulf %64, %65 : vector<32x32xf32>
    %cst_22 = arith.constant dense<0xFF800000> : vector<32xf32>
    %67 = vector.multi_reduction <maximumf>, %66, %cst_22 [1] : vector<32x32xf32> to vector<32xf32>
    %68 = vector.shape_cast %67 : vector<32xf32> to vector<32x1xf32>
    %69 = vector.broadcast %68 : vector<32x1xf32> to vector<32x32xf32>
    %70 = arith.subf %66, %69 : vector<32x32xf32>
    %71 = math.exp %70 : vector<32x32xf32>
    %cst_23 = arith.constant dense<0.000000e+00> : vector<32xf32>
    %72 = vector.multi_reduction <add>, %71, %cst_23 [1] : vector<32x32xf32> to vector<32xf32>
    %73 = vector.shape_cast %72 : vector<32xf32> to vector<32x1xf32>
    %74 = tpu.reciprocal %73 {approx = true} : vector<32x1xf32> -> vector<32x1xf32>
    %75 = vector.broadcast %74 : vector<32x1xf32> to vector<32x32xf32>
    %76 = arith.mulf %71, %75 : vector<32x32xf32>
    %77 = arith.truncf %76 : vector<32x32xf32> to vector<32x32xbf16>
    %cst_24 = arith.constant dense<0.000000e+00> : vector<32x8xf32>
    %78 = tpu.matmul %77, %63, %cst_24 {dimension_numbers = #tpu.dot_dimension_numbers<[1], [0], [0], [1], [0, 0, 1, 1], [], []>} : vector<32x32xbf16>, vector<32x8xbf16>, vector<32x8xf32> -> vector<32x8xf32>
    %79 = tpu.concatenate %24, %42, %60, %78 in 1 : vector<32x8xf32>, vector<32x8xf32>, vector<32x8xf32>, vector<32x8xf32> -> vector<32x32xf32>
    %80 = vector.extract_strided_slice %6 {offsets = [32, 0], sizes = [32, 8], strides = [1, 1]} : vector<64x96xbf16> to vector<32x8xbf16>
    %81 = vector.extract_strided_slice %6 {offsets = [32, 32], sizes = [32, 8], strides = [1, 1]} : vector<64x96xbf16> to vector<32x8xbf16>
    %82 = vector.extract_strided_slice %6 {offsets = [32, 64], sizes = [32, 8], strides = [1, 1]} : vector<64x96xbf16> to vector<32x8xbf16>
    %cst_25 = arith.constant dense<0.000000e+00> : vector<32x32xf32>
    %83 = tpu.matmul %80, %81, %cst_25 {dimension_numbers = #tpu.dot_dimension_numbers<[1], [1], [0], [0], [0, 0, 1, 0], [], []>} : vector<32x8xbf16>, vector<32x8xbf16>, vector<32x32xf32> -> vector<32x32xf32>
    %cst_26 = arith.constant 0.353553385 : f32
    %84 = vector.broadcast %cst_26 : f32 to vector<32x32xf32>
    %85 = arith.mulf %83, %84 : vector<32x32xf32>
    %cst_27 = arith.constant dense<0xFF800000> : vector<32xf32>
    %86 = vector.multi_reduction <maximumf>, %85, %cst_27 [1] : vector<32x32xf32> to vector<32xf32>
    %87 = vector.shape_cast %86 : vector<32xf32> to vector<32x1xf32>
    %88 = vector.broadcast %87 : vector<32x1xf32> to vector<32x32xf32>
    %89 = arith.subf %85, %88 : vector<32x32xf32>
    %90 = math.exp %89 : vector<32x32xf32>
    %cst_28 = arith.constant dense<0.000000e+00> : vector<32xf32>
    %91 = vector.multi_reduction <add>, %90, %cst_28 [1] : vector<32x32xf32> to vector<32xf32>
    %92 = vector.shape_cast %91 : vector<32xf32> to vector<32x1xf32>
    %93 = tpu.reciprocal %92 {approx = true} : vector<32x1xf32> -> vector<32x1xf32>
    %94 = vector.broadcast %93 : vector<32x1xf32> to vector<32x32xf32>
    %95 = arith.mulf %90, %94 : vector<32x32xf32>
    %96 = arith.truncf %95 : vector<32x32xf32> to vector<32x32xbf16>
    %cst_29 = arith.constant dense<0.000000e+00> : vector<32x8xf32>
    %97 = tpu.matmul %96, %82, %cst_29 {dimension_numbers = #tpu.dot_dimension_numbers<[1], [0], [0], [1], [0, 0, 1, 1], [], []>} : vector<32x32xbf16>, vector<32x8xbf16>, vector<32x8xf32> -> vector<32x8xf32>
    %98 = vector.extract_strided_slice %6 {offsets = [32, 8], sizes = [32, 8], strides = [1, 1]} : vector<64x96xbf16> to vector<32x8xbf16>
    %99 = vector.extract_strided_slice %6 {offsets = [32, 40], sizes = [32, 8], strides = [1, 1]} : vector<64x96xbf16> to vector<32x8xbf16>
    %100 = vector.extract_strided_slice %6 {offsets = [32, 72], sizes = [32, 8], strides = [1, 1]} : vector<64x96xbf16> to vector<32x8xbf16>
    %cst_30 = arith.constant dense<0.000000e+00> : vector<32x32xf32>
    %101 = tpu.matmul %98, %99, %cst_30 {dimension_numbers = #tpu.dot_dimension_numbers<[1], [1], [0], [0], [0, 0, 1, 0], [], []>} : vector<32x8xbf16>, vector<32x8xbf16>, vector<32x32xf32> -> vector<32x32xf32>
    %cst_31 = arith.constant 0.353553385 : f32
    %102 = vector.broadcast %cst_31 : f32 to vector<32x32xf32>
    %103 = arith.mulf %101, %102 : vector<32x32xf32>
    %cst_32 = arith.constant dense<0xFF800000> : vector<32xf32>
    %104 = vector.multi_reduction <maximumf>, %103, %cst_32 [1] : vector<32x32xf32> to vector<32xf32>
    %105 = vector.shape_cast %104 : vector<32xf32> to vector<32x1xf32>
    %106 = vector.broadcast %105 : vector<32x1xf32> to vector<32x32xf32>
    %107 = arith.subf %103, %106 : vector<32x32xf32>
    %108 = math.exp %107 : vector<32x32xf32>
    %cst_33 = arith.constant dense<0.000000e+00> : vector<32xf32>
    %109 = vector.multi_reduction <add>, %108, %cst_33 [1] : vector<32x32xf32> to vector<32xf32>
    %110 = vector.shape_cast %109 : vector<32xf32> to vector<32x1xf32>
    %111 = tpu.reciprocal %110 {approx = true} : vector<32x1xf32> -> vector<32x1xf32>
    %112 = vector.broadcast %111 : vector<32x1xf32> to vector<32x32xf32>
    %113 = arith.mulf %108, %112 : vector<32x32xf32>
    %114 = arith.truncf %113 : vector<32x32xf32> to vector<32x32xbf16>
    %cst_34 = arith.constant dense<0.000000e+00> : vector<32x8xf32>
    %115 = tpu.matmul %114, %100, %cst_34 {dimension_numbers = #tpu.dot_dimension_numbers<[1], [0], [0], [1], [0, 0, 1, 1], [], []>} : vector<32x32xbf16>, vector<32x8xbf16>, vector<32x8xf32> -> vector<32x8xf32>
    %116 = vector.extract_strided_slice %6 {offsets = [32, 16], sizes = [32, 8], strides = [1, 1]} : vector<64x96xbf16> to vector<32x8xbf16>
    %117 = vector.extract_strided_slice %6 {offsets = [32, 48], sizes = [32, 8], strides = [1, 1]} : vector<64x96xbf16> to vector<32x8xbf16>
    %118 = vector.extract_strided_slice %6 {offsets = [32, 80], sizes = [32, 8], strides = [1, 1]} : vector<64x96xbf16> to vector<32x8xbf16>
    %cst_35 = arith.constant dense<0.000000e+00> : vector<32x32xf32>
    %119 = tpu.matmul %116, %117, %cst_35 {dimension_numbers = #tpu.dot_dimension_numbers<[1], [1], [0], [0], [0, 0, 1, 0], [], []>} : vector<32x8xbf16>, vector<32x8xbf16>, vector<32x32xf32> -> vector<32x32xf32>
    %cst_36 = arith.constant 0.353553385 : f32
    %120 = vector.broadcast %cst_36 : f32 to vector<32x32xf32>
    %121 = arith.mulf %119, %120 : vector<32x32xf32>
    %cst_37 = arith.constant dense<0xFF800000> : vector<32xf32>
    %122 = vector.multi_reduction <maximumf>, %121, %cst_37 [1] : vector<32x32xf32> to vector<32xf32>
    %123 = vector.shape_cast %122 : vector<32xf32> to vector<32x1xf32>
    %124 = vector.broadcast %123 : vector<32x1xf32> to vector<32x32xf32>
    %125 = arith.subf %121, %124 : vector<32x32xf32>
    %126 = math.exp %125 : vector<32x32xf32>
    %cst_38 = arith.constant dense<0.000000e+00> : vector<32xf32>
    %127 = vector.multi_reduction <add>, %126, %cst_38 [1] : vector<32x32xf32> to vector<32xf32>
    %128 = vector.shape_cast %127 : vector<32xf32> to vector<32x1xf32>
    %129 = tpu.reciprocal %128 {approx = true} : vector<32x1xf32> -> vector<32x1xf32>
    %130 = vector.broadcast %129 : vector<32x1xf32> to vector<32x32xf32>
    %131 = arith.mulf %126, %130 : vector<32x32xf32>
    %132 = arith.truncf %131 : vector<32x32xf32> to vector<32x32xbf16>
    %cst_39 = arith.constant dense<0.000000e+00> : vector<32x8xf32>
    %133 = tpu.matmul %132, %118, %cst_39 {dimension_numbers = #tpu.dot_dimension_numbers<[1], [0], [0], [1], [0, 0, 1, 1], [], []>} : vector<32x32xbf16>, vector<32x8xbf16>, vector<32x8xf32> -> vector<32x8xf32>
    %134 = vector.extract_strided_slice %6 {offsets = [32, 24], sizes = [32, 8], strides = [1, 1]} : vector<64x96xbf16> to vector<32x8xbf16>
    %135 = vector.extract_strided_slice %6 {offsets = [32, 56], sizes = [32, 8], strides = [1, 1]} : vector<64x96xbf16> to vector<32x8xbf16>
    %136 = vector.extract_strided_slice %6 {offsets = [32, 88], sizes = [32, 8], strides = [1, 1]} : vector<64x96xbf16> to vector<32x8xbf16>
    %cst_40 = arith.constant dense<0.000000e+00> : vector<32x32xf32>
    %137 = tpu.matmul %134, %135, %cst_40 {dimension_numbers = #tpu.dot_dimension_numbers<[1], [1], [0], [0], [0, 0, 1, 0], [], []>} : vector<32x8xbf16>, vector<32x8xbf16>, vector<32x32xf32> -> vector<32x32xf32>
    %cst_41 = arith.constant 0.353553385 : f32
    %138 = vector.broadcast %cst_41 : f32 to vector<32x32xf32>
    %139 = arith.mulf %137, %138 : vector<32x32xf32>
    %cst_42 = arith.constant dense<0xFF800000> : vector<32xf32>
    %140 = vector.multi_reduction <maximumf>, %139, %cst_42 [1] : vector<32x32xf32> to vector<32xf32>
    %141 = vector.shape_cast %140 : vector<32xf32> to vector<32x1xf32>
    %142 = vector.broadcast %141 : vector<32x1xf32> to vector<32x32xf32>
    %143 = arith.subf %139, %142 : vector<32x32xf32>
    %144 = math.exp %143 : vector<32x32xf32>
    %cst_43 = arith.constant dense<0.000000e+00> : vector<32xf32>
    %145 = vector.multi_reduction <add>, %144, %cst_43 [1] : vector<32x32xf32> to vector<32xf32>
    %146 = vector.shape_cast %145 : vector<32xf32> to vector<32x1xf32>
    %147 = tpu.reciprocal %146 {approx = true} : vector<32x1xf32> -> vector<32x1xf32>
    %148 = vector.broadcast %147 : vector<32x1xf32> to vector<32x32xf32>
    %149 = arith.mulf %144, %148 : vector<32x32xf32>
    %150 = arith.truncf %149 : vector<32x32xf32> to vector<32x32xbf16>
    %cst_44 = arith.constant dense<0.000000e+00> : vector<32x8xf32>
    %151 = tpu.matmul %150, %136, %cst_44 {dimension_numbers = #tpu.dot_dimension_numbers<[1], [0], [0], [1], [0, 0, 1, 1], [], []>} : vector<32x32xbf16>, vector<32x8xbf16>, vector<32x8xf32> -> vector<32x8xf32>
    %152 = tpu.concatenate %97, %115, %133, %151 in 1 : vector<32x8xf32>, vector<32x8xf32>, vector<32x8xf32>, vector<32x8xf32> -> vector<32x32xf32>
    %153 = tpu.concatenate %79, %152 in 0 : vector<32x32xf32>, vector<32x32xf32> -> vector<64x32xf32>
    %154 = arith.truncf %153 : vector<64x32xf32> to vector<64x32xbf16>
    %c0_45 = arith.constant 0 : index
    %c0_46 = arith.constant 0 : index
    %155 = vector.load %arg3[%c0_45, %c0_46] : memref<32x32xbf16, #tpu.memory_space<vmem>>, vector<32x32xbf16>
    %cst_47 = arith.constant dense<0.000000e+00> : vector<64x32xf32>
    %156 = tpu.matmul %154, %155, %cst_47 {dimension_numbers = #tpu.dot_dimension_numbers<[1], [0], [0], [1], [0, 0, 1, 1], [], []>} : vector<64x32xbf16>, vector<32x32xbf16>, vector<64x32xf32> -> vector<64x32xf32>
    %c0_48 = arith.constant 0 : index
    %c0_49 = arith.constant 0 : index
    %157 = vector.load %arg4[%c0_48, %c0_49] : memref<1x32xf32, #tpu.memory_space<vmem>>, vector<1x32xf32>
    %158 = vector.broadcast %157 : vector<1x32xf32> to vector<64x32xf32>
    %159 = arith.addf %156, %158 : vector<64x32xf32>
    %160 = arith.addf %2, %159 : vector<64x32xf32>
    %c0_50 = arith.constant 0 : index
    %c0_51 = arith.constant 0 : index
    %161 = vector.load %arg5[%c0_50, %c0_51] : memref<1x32xf32, #tpu.memory_space<vmem>>, vector<1x32xf32>
    %c0_52 = arith.constant 0 : index
    %c0_53 = arith.constant 0 : index
    %162 = vector.load %arg6[%c0_52, %c0_53] : memref<1x32xf32, #tpu.memory_space<vmem>>, vector<1x32xf32>
    %cst_54 = arith.constant dense<0.000000e+00> : vector<64xf32>
    %163 = vector.multi_reduction <add>, %160, %cst_54 [1] : vector<64x32xf32> to vector<64xf32>
    %164 = vector.shape_cast %163 : vector<64xf32> to vector<64x1xf32>
    %cst_55 = arith.constant 3.200000e+01 : f32
    %165 = vector.broadcast %cst_55 : f32 to vector<64x1xf32>
    %166 = arith.divf %164, %165 : vector<64x1xf32>
    %167 = arith.mulf %160, %160 : vector<64x32xf32>
    %cst_56 = arith.constant dense<0.000000e+00> : vector<64xf32>
    %168 = vector.multi_reduction <add>, %167, %cst_56 [1] : vector<64x32xf32> to vector<64xf32>
    %169 = vector.shape_cast %168 : vector<64xf32> to vector<64x1xf32>
    %cst_57 = arith.constant 3.200000e+01 : f32
    %170 = vector.broadcast %cst_57 : f32 to vector<64x1xf32>
    %171 = arith.divf %169, %170 : vector<64x1xf32>
    %172 = arith.mulf %166, %166 : vector<64x1xf32>
    %173 = arith.subf %171, %172 : vector<64x1xf32>
    %174 = vector.broadcast %166 : vector<64x1xf32> to vector<64x32xf32>
    %175 = arith.subf %160, %174 : vector<64x32xf32>
    %cst_58 = arith.constant 9.99999997E-7 : f32
    %176 = vector.broadcast %cst_58 : f32 to vector<64x1xf32>
    %177 = arith.addf %173, %176 : vector<64x1xf32>
    %178 = math.rsqrt %177 : vector<64x1xf32>
    %179 = vector.broadcast %178 : vector<64x1xf32> to vector<64x32xf32>
    %180 = arith.mulf %175, %179 : vector<64x32xf32>
    %181 = vector.broadcast %161 : vector<1x32xf32> to vector<64x32xf32>
    %182 = arith.mulf %180, %181 : vector<64x32xf32>
    %183 = vector.broadcast %162 : vector<1x32xf32> to vector<64x32xf32>
    %184 = arith.addf %182, %183 : vector<64x32xf32>
    %185 = arith.truncf %184 : vector<64x32xf32> to vector<64x32xbf16>
    %c0_59 = arith.constant 0 : index
    %c0_60 = arith.constant 0 : index
    %186 = vector.load %arg7[%c0_59, %c0_60] : memref<32x128xbf16, #tpu.memory_space<vmem>>, vector<32x128xbf16>
    %cst_61 = arith.constant dense<0.000000e+00> : vector<64x128xf32>
    %187 = tpu.matmul %185, %186, %cst_61 {dimension_numbers = #tpu.dot_dimension_numbers<[1], [0], [0], [1], [0, 0, 1, 1], [], []>} : vector<64x32xbf16>, vector<32x128xbf16>, vector<64x128xf32> -> vector<64x128xf32>
    %188 = arith.truncf %187 : vector<64x128xf32> to vector<64x128xbf16>
    %c0_62 = arith.constant 0 : index
    %c0_63 = arith.constant 0 : index
    %189 = vector.load %arg8[%c0_62, %c0_63] : memref<128x32xbf16, #tpu.memory_space<vmem>>, vector<128x32xbf16>
    %cst_64 = arith.constant dense<0.000000e+00> : vector<64x32xf32>
    %190 = tpu.matmul %188, %189, %cst_64 {dimension_numbers = #tpu.dot_dimension_numbers<[1], [0], [0], [1], [0, 0, 1, 1], [], []>} : vector<64x128xbf16>, vector<128x32xbf16>, vector<64x32xf32> -> vector<64x32xf32>
    %191 = arith.addf %184, %190 : vector<64x32xf32>
    %c0_65 = arith.constant 0 : index
    %c0_66 = arith.constant 0 : index
    %192 = vector.load %arg9[%c0_65, %c0_66] : memref<1x32xf32, #tpu.memory_space<vmem>>, vector<1x32xf32>
    %c0_67 = arith.constant 0 : index
    %c0_68 = arith.constant 0 : index
    %193 = vector.load %arg10[%c0_67, %c0_68] : memref<1x32xf32, #tpu.memory_space<vmem>>, vector<1x32xf32>
    %cst_69 = arith.constant dense<0.000000e+00> : vector<64xf32>
    %194 = vector.multi_reduction <add>, %191, %cst_69 [1] : vector<64x32xf32> to vector<64xf32>
    %195 = vector.shape_cast %194 : vector<64xf32> to vector<64x1xf32>
    %cst_70 = arith.constant 3.200000e+01 : f32
    %196 = vector.broadcast %cst_70 : f32 to vector<64x1xf32>
    %197 = arith.divf %195, %196 : vector<64x1xf32>
    %198 = arith.mulf %191, %191 : vector<64x32xf32>
    %cst_71 = arith.constant dense<0.000000e+00> : vector<64xf32>
    %199 = vector.multi_reduction <add>, %198, %cst_71 [1] : vector<64x32xf32> to vector<64xf32>
    %200 = vector.shape_cast %199 : vector<64xf32> to vector<64x1xf32>
    %cst_72 = arith.constant 3.200000e+01 : f32
    %201 = vector.broadcast %cst_72 : f32 to vector<64x1xf32>
    %202 = arith.divf %200, %201 : vector<64x1xf32>
    %203 = arith.mulf %197, %197 : vector<64x1xf32>
    %204 = arith.subf %202, %203 : vector<64x1xf32>
    %205 = vector.broadcast %197 : vector<64x1xf32> to vector<64x32xf32>
    %206 = arith.subf %191, %205 : vector<64x32xf32>
    %cst_73 = arith.constant 9.99999997E-7 : f32
    %207 = vector.broadcast %cst_73 : f32 to vector<64x1xf32>
    %208 = arith.addf %204, %207 : vector<64x1xf32>
    %209 = math.rsqrt %208 : vector<64x1xf32>
    %210 = vector.broadcast %209 : vector<64x1xf32> to vector<64x32xf32>
    %211 = arith.mulf %206, %210 : vector<64x32xf32>
    %212 = vector.broadcast %192 : vector<1x32xf32> to vector<64x32xf32>
    %213 = arith.mulf %211, %212 : vector<64x32xf32>
    %214 = vector.broadcast %193 : vector<1x32xf32> to vector<64x32xf32>
    %215 = arith.addf %213, %214 : vector<64x32xf32>
    %216 = arith.truncf %215 : vector<64x32xf32> to vector<64x32xbf16>
    %c0_74 = arith.constant 0 : index
    %c0_75 = arith.constant 0 : index
    %217 = vector.load %arg11[%c0_74, %c0_75] : memref<32x96xbf16, #tpu.memory_space<vmem>>, vector<32x96xbf16>
    %cst_76 = arith.constant dense<0.000000e+00> : vector<64x96xf32>
    %218 = tpu.matmul %216, %217, %cst_76 {dimension_numbers = #tpu.dot_dimension_numbers<[1], [0], [0], [1], [0, 0, 1, 1], [], []>} : vector<64x32xbf16>, vector<32x96xbf16>, vector<64x96xf32> -> vector<64x96xf32>
    %219 = arith.truncf %218 : vector<64x96xf32> to vector<64x96xbf16>
    %220 = vector.extract_strided_slice %219 {offsets = [0, 0], sizes = [32, 8], strides = [1, 1]} : vector<64x96xbf16> to vector<32x8xbf16>
    %221 = vector.extract_strided_slice %219 {offsets = [0, 32], sizes = [32, 8], strides = [1, 1]} : vector<64x96xbf16> to vector<32x8xbf16>
    %222 = vector.extract_strided_slice %219 {offsets = [0, 64], sizes = [32, 8], strides = [1, 1]} : vector<64x96xbf16> to vector<32x8xbf16>
    %cst_77 = arith.constant dense<0.000000e+00> : vector<32x32xf32>
    %223 = tpu.matmul %220, %221, %cst_77 {dimension_numbers = #tpu.dot_dimension_numbers<[1], [1], [0], [0], [0, 0, 1, 0], [], []>} : vector<32x8xbf16>, vector<32x8xbf16>, vector<32x32xf32> -> vector<32x32xf32>
    %cst_78 = arith.constant 0.353553385 : f32
    %224 = vector.broadcast %cst_78 : f32 to vector<32x32xf32>
    %225 = arith.mulf %223, %224 : vector<32x32xf32>
    %cst_79 = arith.constant dense<0xFF800000> : vector<32xf32>
    %226 = vector.multi_reduction <maximumf>, %225, %cst_79 [1] : vector<32x32xf32> to vector<32xf32>
    %227 = vector.shape_cast %226 : vector<32xf32> to vector<32x1xf32>
    %228 = vector.broadcast %227 : vector<32x1xf32> to vector<32x32xf32>
    %229 = arith.subf %225, %228 : vector<32x32xf32>
    %230 = math.exp %229 : vector<32x32xf32>
    %cst_80 = arith.constant dense<0.000000e+00> : vector<32xf32>
    %231 = vector.multi_reduction <add>, %230, %cst_80 [1] : vector<32x32xf32> to vector<32xf32>
    %232 = vector.shape_cast %231 : vector<32xf32> to vector<32x1xf32>
    %233 = tpu.reciprocal %232 {approx = true} : vector<32x1xf32> -> vector<32x1xf32>
    %234 = vector.broadcast %233 : vector<32x1xf32> to vector<32x32xf32>
    %235 = arith.mulf %230, %234 : vector<32x32xf32>
    %236 = arith.truncf %235 : vector<32x32xf32> to vector<32x32xbf16>
    %cst_81 = arith.constant dense<0.000000e+00> : vector<32x8xf32>
    %237 = tpu.matmul %236, %222, %cst_81 {dimension_numbers = #tpu.dot_dimension_numbers<[1], [0], [0], [1], [0, 0, 1, 1], [], []>} : vector<32x32xbf16>, vector<32x8xbf16>, vector<32x8xf32> -> vector<32x8xf32>
    %238 = vector.extract_strided_slice %219 {offsets = [0, 8], sizes = [32, 8], strides = [1, 1]} : vector<64x96xbf16> to vector<32x8xbf16>
    %239 = vector.extract_strided_slice %219 {offsets = [0, 40], sizes = [32, 8], strides = [1, 1]} : vector<64x96xbf16> to vector<32x8xbf16>
    %240 = vector.extract_strided_slice %219 {offsets = [0, 72], sizes = [32, 8], strides = [1, 1]} : vector<64x96xbf16> to vector<32x8xbf16>
    %cst_82 = arith.constant dense<0.000000e+00> : vector<32x32xf32>
    %241 = tpu.matmul %238, %239, %cst_82 {dimension_numbers = #tpu.dot_dimension_numbers<[1], [1], [0], [0], [0, 0, 1, 0], [], []>} : vector<32x8xbf16>, vector<32x8xbf16>, vector<32x32xf32> -> vector<32x32xf32>
    %cst_83 = arith.constant 0.353553385 : f32
    %242 = vector.broadcast %cst_83 : f32 to vector<32x32xf32>
    %243 = arith.mulf %241, %242 : vector<32x32xf32>
    %cst_84 = arith.constant dense<0xFF800000> : vector<32xf32>
    %244 = vector.multi_reduction <maximumf>, %243, %cst_84 [1] : vector<32x32xf32> to vector<32xf32>
    %245 = vector.shape_cast %244 : vector<32xf32> to vector<32x1xf32>
    %246 = vector.broadcast %245 : vector<32x1xf32> to vector<32x32xf32>
    %247 = arith.subf %243, %246 : vector<32x32xf32>
    %248 = math.exp %247 : vector<32x32xf32>
    %cst_85 = arith.constant dense<0.000000e+00> : vector<32xf32>
    %249 = vector.multi_reduction <add>, %248, %cst_85 [1] : vector<32x32xf32> to vector<32xf32>
    %250 = vector.shape_cast %249 : vector<32xf32> to vector<32x1xf32>
    %251 = tpu.reciprocal %250 {approx = true} : vector<32x1xf32> -> vector<32x1xf32>
    %252 = vector.broadcast %251 : vector<32x1xf32> to vector<32x32xf32>
    %253 = arith.mulf %248, %252 : vector<32x32xf32>
    %254 = arith.truncf %253 : vector<32x32xf32> to vector<32x32xbf16>
    %cst_86 = arith.constant dense<0.000000e+00> : vector<32x8xf32>
    %255 = tpu.matmul %254, %240, %cst_86 {dimension_numbers = #tpu.dot_dimension_numbers<[1], [0], [0], [1], [0, 0, 1, 1], [], []>} : vector<32x32xbf16>, vector<32x8xbf16>, vector<32x8xf32> -> vector<32x8xf32>
    %256 = vector.extract_strided_slice %219 {offsets = [0, 16], sizes = [32, 8], strides = [1, 1]} : vector<64x96xbf16> to vector<32x8xbf16>
    %257 = vector.extract_strided_slice %219 {offsets = [0, 48], sizes = [32, 8], strides = [1, 1]} : vector<64x96xbf16> to vector<32x8xbf16>
    %258 = vector.extract_strided_slice %219 {offsets = [0, 80], sizes = [32, 8], strides = [1, 1]} : vector<64x96xbf16> to vector<32x8xbf16>
    %cst_87 = arith.constant dense<0.000000e+00> : vector<32x32xf32>
    %259 = tpu.matmul %256, %257, %cst_87 {dimension_numbers = #tpu.dot_dimension_numbers<[1], [1], [0], [0], [0, 0, 1, 0], [], []>} : vector<32x8xbf16>, vector<32x8xbf16>, vector<32x32xf32> -> vector<32x32xf32>
    %cst_88 = arith.constant 0.353553385 : f32
    %260 = vector.broadcast %cst_88 : f32 to vector<32x32xf32>
    %261 = arith.mulf %259, %260 : vector<32x32xf32>
    %cst_89 = arith.constant dense<0xFF800000> : vector<32xf32>
    %262 = vector.multi_reduction <maximumf>, %261, %cst_89 [1] : vector<32x32xf32> to vector<32xf32>
    %263 = vector.shape_cast %262 : vector<32xf32> to vector<32x1xf32>
    %264 = vector.broadcast %263 : vector<32x1xf32> to vector<32x32xf32>
    %265 = arith.subf %261, %264 : vector<32x32xf32>
    %266 = math.exp %265 : vector<32x32xf32>
    %cst_90 = arith.constant dense<0.000000e+00> : vector<32xf32>
    %267 = vector.multi_reduction <add>, %266, %cst_90 [1] : vector<32x32xf32> to vector<32xf32>
    %268 = vector.shape_cast %267 : vector<32xf32> to vector<32x1xf32>
    %269 = tpu.reciprocal %268 {approx = true} : vector<32x1xf32> -> vector<32x1xf32>
    %270 = vector.broadcast %269 : vector<32x1xf32> to vector<32x32xf32>
    %271 = arith.mulf %266, %270 : vector<32x32xf32>
    %272 = arith.truncf %271 : vector<32x32xf32> to vector<32x32xbf16>
    %cst_91 = arith.constant dense<0.000000e+00> : vector<32x8xf32>
    %273 = tpu.matmul %272, %258, %cst_91 {dimension_numbers = #tpu.dot_dimension_numbers<[1], [0], [0], [1], [0, 0, 1, 1], [], []>} : vector<32x32xbf16>, vector<32x8xbf16>, vector<32x8xf32> -> vector<32x8xf32>
    %274 = vector.extract_strided_slice %219 {offsets = [0, 24], sizes = [32, 8], strides = [1, 1]} : vector<64x96xbf16> to vector<32x8xbf16>
    %275 = vector.extract_strided_slice %219 {offsets = [0, 56], sizes = [32, 8], strides = [1, 1]} : vector<64x96xbf16> to vector<32x8xbf16>
    %276 = vector.extract_strided_slice %219 {offsets = [0, 88], sizes = [32, 8], strides = [1, 1]} : vector<64x96xbf16> to vector<32x8xbf16>
    %cst_92 = arith.constant dense<0.000000e+00> : vector<32x32xf32>
    %277 = tpu.matmul %274, %275, %cst_92 {dimension_numbers = #tpu.dot_dimension_numbers<[1], [1], [0], [0], [0, 0, 1, 0], [], []>} : vector<32x8xbf16>, vector<32x8xbf16>, vector<32x32xf32> -> vector<32x32xf32>
    %cst_93 = arith.constant 0.353553385 : f32
    %278 = vector.broadcast %cst_93 : f32 to vector<32x32xf32>
    %279 = arith.mulf %277, %278 : vector<32x32xf32>
    %cst_94 = arith.constant dense<0xFF800000> : vector<32xf32>
    %280 = vector.multi_reduction <maximumf>, %279, %cst_94 [1] : vector<32x32xf32> to vector<32xf32>
    %281 = vector.shape_cast %280 : vector<32xf32> to vector<32x1xf32>
    %282 = vector.broadcast %281 : vector<32x1xf32> to vector<32x32xf32>
    %283 = arith.subf %279, %282 : vector<32x32xf32>
    %284 = math.exp %283 : vector<32x32xf32>
    %cst_95 = arith.constant dense<0.000000e+00> : vector<32xf32>
    %285 = vector.multi_reduction <add>, %284, %cst_95 [1] : vector<32x32xf32> to vector<32xf32>
    %286 = vector.shape_cast %285 : vector<32xf32> to vector<32x1xf32>
    %287 = tpu.reciprocal %286 {approx = true} : vector<32x1xf32> -> vector<32x1xf32>
    %288 = vector.broadcast %287 : vector<32x1xf32> to vector<32x32xf32>
    %289 = arith.mulf %284, %288 : vector<32x32xf32>
    %290 = arith.truncf %289 : vector<32x32xf32> to vector<32x32xbf16>
    %cst_96 = arith.constant dense<0.000000e+00> : vector<32x8xf32>
    %291 = tpu.matmul %290, %276, %cst_96 {dimension_numbers = #tpu.dot_dimension_numbers<[1], [0], [0], [1], [0, 0, 1, 1], [], []>} : vector<32x32xbf16>, vector<32x8xbf16>, vector<32x8xf32> -> vector<32x8xf32>
    %292 = tpu.concatenate %237, %255, %273, %291 in 1 : vector<32x8xf32>, vector<32x8xf32>, vector<32x8xf32>, vector<32x8xf32> -> vector<32x32xf32>
    %293 = vector.extract_strided_slice %219 {offsets = [32, 0], sizes = [32, 8], strides = [1, 1]} : vector<64x96xbf16> to vector<32x8xbf16>
    %294 = vector.extract_strided_slice %219 {offsets = [32, 32], sizes = [32, 8], strides = [1, 1]} : vector<64x96xbf16> to vector<32x8xbf16>
    %295 = vector.extract_strided_slice %219 {offsets = [32, 64], sizes = [32, 8], strides = [1, 1]} : vector<64x96xbf16> to vector<32x8xbf16>
    %cst_97 = arith.constant dense<0.000000e+00> : vector<32x32xf32>
    %296 = tpu.matmul %293, %294, %cst_97 {dimension_numbers = #tpu.dot_dimension_numbers<[1], [1], [0], [0], [0, 0, 1, 0], [], []>} : vector<32x8xbf16>, vector<32x8xbf16>, vector<32x32xf32> -> vector<32x32xf32>
    %cst_98 = arith.constant 0.353553385 : f32
    %297 = vector.broadcast %cst_98 : f32 to vector<32x32xf32>
    %298 = arith.mulf %296, %297 : vector<32x32xf32>
    %cst_99 = arith.constant dense<0xFF800000> : vector<32xf32>
    %299 = vector.multi_reduction <maximumf>, %298, %cst_99 [1] : vector<32x32xf32> to vector<32xf32>
    %300 = vector.shape_cast %299 : vector<32xf32> to vector<32x1xf32>
    %301 = vector.broadcast %300 : vector<32x1xf32> to vector<32x32xf32>
    %302 = arith.subf %298, %301 : vector<32x32xf32>
    %303 = math.exp %302 : vector<32x32xf32>
    %cst_100 = arith.constant dense<0.000000e+00> : vector<32xf32>
    %304 = vector.multi_reduction <add>, %303, %cst_100 [1] : vector<32x32xf32> to vector<32xf32>
    %305 = vector.shape_cast %304 : vector<32xf32> to vector<32x1xf32>
    %306 = tpu.reciprocal %305 {approx = true} : vector<32x1xf32> -> vector<32x1xf32>
    %307 = vector.broadcast %306 : vector<32x1xf32> to vector<32x32xf32>
    %308 = arith.mulf %303, %307 : vector<32x32xf32>
    %309 = arith.truncf %308 : vector<32x32xf32> to vector<32x32xbf16>
    %cst_101 = arith.constant dense<0.000000e+00> : vector<32x8xf32>
    %310 = tpu.matmul %309, %295, %cst_101 {dimension_numbers = #tpu.dot_dimension_numbers<[1], [0], [0], [1], [0, 0, 1, 1], [], []>} : vector<32x32xbf16>, vector<32x8xbf16>, vector<32x8xf32> -> vector<32x8xf32>
    %311 = vector.extract_strided_slice %219 {offsets = [32, 8], sizes = [32, 8], strides = [1, 1]} : vector<64x96xbf16> to vector<32x8xbf16>
    %312 = vector.extract_strided_slice %219 {offsets = [32, 40], sizes = [32, 8], strides = [1, 1]} : vector<64x96xbf16> to vector<32x8xbf16>
    %313 = vector.extract_strided_slice %219 {offsets = [32, 72], sizes = [32, 8], strides = [1, 1]} : vector<64x96xbf16> to vector<32x8xbf16>
    %cst_102 = arith.constant dense<0.000000e+00> : vector<32x32xf32>
    %314 = tpu.matmul %311, %312, %cst_102 {dimension_numbers = #tpu.dot_dimension_numbers<[1], [1], [0], [0], [0, 0, 1, 0], [], []>} : vector<32x8xbf16>, vector<32x8xbf16>, vector<32x32xf32> -> vector<32x32xf32>
    %cst_103 = arith.constant 0.353553385 : f32
    %315 = vector.broadcast %cst_103 : f32 to vector<32x32xf32>
    %316 = arith.mulf %314, %315 : vector<32x32xf32>
    %cst_104 = arith.constant dense<0xFF800000> : vector<32xf32>
    %317 = vector.multi_reduction <maximumf>, %316, %cst_104 [1] : vector<32x32xf32> to vector<32xf32>
    %318 = vector.shape_cast %317 : vector<32xf32> to vector<32x1xf32>
    %319 = vector.broadcast %318 : vector<32x1xf32> to vector<32x32xf32>
    %320 = arith.subf %316, %319 : vector<32x32xf32>
    %321 = math.exp %320 : vector<32x32xf32>
    %cst_105 = arith.constant dense<0.000000e+00> : vector<32xf32>
    %322 = vector.multi_reduction <add>, %321, %cst_105 [1] : vector<32x32xf32> to vector<32xf32>
    %323 = vector.shape_cast %322 : vector<32xf32> to vector<32x1xf32>
    %324 = tpu.reciprocal %323 {approx = true} : vector<32x1xf32> -> vector<32x1xf32>
    %325 = vector.broadcast %324 : vector<32x1xf32> to vector<32x32xf32>
    %326 = arith.mulf %321, %325 : vector<32x32xf32>
    %327 = arith.truncf %326 : vector<32x32xf32> to vector<32x32xbf16>
    %cst_106 = arith.constant dense<0.000000e+00> : vector<32x8xf32>
    %328 = tpu.matmul %327, %313, %cst_106 {dimension_numbers = #tpu.dot_dimension_numbers<[1], [0], [0], [1], [0, 0, 1, 1], [], []>} : vector<32x32xbf16>, vector<32x8xbf16>, vector<32x8xf32> -> vector<32x8xf32>
    %329 = vector.extract_strided_slice %219 {offsets = [32, 16], sizes = [32, 8], strides = [1, 1]} : vector<64x96xbf16> to vector<32x8xbf16>
    %330 = vector.extract_strided_slice %219 {offsets = [32, 48], sizes = [32, 8], strides = [1, 1]} : vector<64x96xbf16> to vector<32x8xbf16>
    %331 = vector.extract_strided_slice %219 {offsets = [32, 80], sizes = [32, 8], strides = [1, 1]} : vector<64x96xbf16> to vector<32x8xbf16>
    %cst_107 = arith.constant dense<0.000000e+00> : vector<32x32xf32>
    %332 = tpu.matmul %329, %330, %cst_107 {dimension_numbers = #tpu.dot_dimension_numbers<[1], [1], [0], [0], [0, 0, 1, 0], [], []>} : vector<32x8xbf16>, vector<32x8xbf16>, vector<32x32xf32> -> vector<32x32xf32>
    %cst_108 = arith.constant 0.353553385 : f32
    %333 = vector.broadcast %cst_108 : f32 to vector<32x32xf32>
    %334 = arith.mulf %332, %333 : vector<32x32xf32>
    %cst_109 = arith.constant dense<0xFF800000> : vector<32xf32>
    %335 = vector.multi_reduction <maximumf>, %334, %cst_109 [1] : vector<32x32xf32> to vector<32xf32>
    %336 = vector.shape_cast %335 : vector<32xf32> to vector<32x1xf32>
    %337 = vector.broadcast %336 : vector<32x1xf32> to vector<32x32xf32>
    %338 = arith.subf %334, %337 : vector<32x32xf32>
    %339 = math.exp %338 : vector<32x32xf32>
    %cst_110 = arith.constant dense<0.000000e+00> : vector<32xf32>
    %340 = vector.multi_reduction <add>, %339, %cst_110 [1] : vector<32x32xf32> to vector<32xf32>
    %341 = vector.shape_cast %340 : vector<32xf32> to vector<32x1xf32>
    %342 = tpu.reciprocal %341 {approx = true} : vector<32x1xf32> -> vector<32x1xf32>
    %343 = vector.broadcast %342 : vector<32x1xf32> to vector<32x32xf32>
    %344 = arith.mulf %339, %343 : vector<32x32xf32>
    %345 = arith.truncf %344 : vector<32x32xf32> to vector<32x32xbf16>
    %cst_111 = arith.constant dense<0.000000e+00> : vector<32x8xf32>
    %346 = tpu.matmul %345, %331, %cst_111 {dimension_numbers = #tpu.dot_dimension_numbers<[1], [0], [0], [1], [0, 0, 1, 1], [], []>} : vector<32x32xbf16>, vector<32x8xbf16>, vector<32x8xf32> -> vector<32x8xf32>
    %347 = vector.extract_strided_slice %219 {offsets = [32, 24], sizes = [32, 8], strides = [1, 1]} : vector<64x96xbf16> to vector<32x8xbf16>
    %348 = vector.extract_strided_slice %219 {offsets = [32, 56], sizes = [32, 8], strides = [1, 1]} : vector<64x96xbf16> to vector<32x8xbf16>
    %349 = vector.extract_strided_slice %219 {offsets = [32, 88], sizes = [32, 8], strides = [1, 1]} : vector<64x96xbf16> to vector<32x8xbf16>
    %cst_112 = arith.constant dense<0.000000e+00> : vector<32x32xf32>
    %350 = tpu.matmul %347, %348, %cst_112 {dimension_numbers = #tpu.dot_dimension_numbers<[1], [1], [0], [0], [0, 0, 1, 0], [], []>} : vector<32x8xbf16>, vector<32x8xbf16>, vector<32x32xf32> -> vector<32x32xf32>
    %cst_113 = arith.constant 0.353553385 : f32
    %351 = vector.broadcast %cst_113 : f32 to vector<32x32xf32>
    %352 = arith.mulf %350, %351 : vector<32x32xf32>
    %cst_114 = arith.constant dense<0xFF800000> : vector<32xf32>
    %353 = vector.multi_reduction <maximumf>, %352, %cst_114 [1] : vector<32x32xf32> to vector<32xf32>
    %354 = vector.shape_cast %353 : vector<32xf32> to vector<32x1xf32>
    %355 = vector.broadcast %354 : vector<32x1xf32> to vector<32x32xf32>
    %356 = arith.subf %352, %355 : vector<32x32xf32>
    %357 = math.exp %356 : vector<32x32xf32>
    %cst_115 = arith.constant dense<0.000000e+00> : vector<32xf32>
    %358 = vector.multi_reduction <add>, %357, %cst_115 [1] : vector<32x32xf32> to vector<32xf32>
    %359 = vector.shape_cast %358 : vector<32xf32> to vector<32x1xf32>
    %360 = tpu.reciprocal %359 {approx = true} : vector<32x1xf32> -> vector<32x1xf32>
    %361 = vector.broadcast %360 : vector<32x1xf32> to vector<32x32xf32>
    %362 = arith.mulf %357, %361 : vector<32x32xf32>
    %363 = arith.truncf %362 : vector<32x32xf32> to vector<32x32xbf16>
    %cst_116 = arith.constant dense<0.000000e+00> : vector<32x8xf32>
    %364 = tpu.matmul %363, %349, %cst_116 {dimension_numbers = #tpu.dot_dimension_numbers<[1], [0], [0], [1], [0, 0, 1, 1], [], []>} : vector<32x32xbf16>, vector<32x8xbf16>, vector<32x8xf32> -> vector<32x8xf32>
    %365 = tpu.concatenate %310, %328, %346, %364 in 1 : vector<32x8xf32>, vector<32x8xf32>, vector<32x8xf32>, vector<32x8xf32> -> vector<32x32xf32>
    %366 = tpu.concatenate %292, %365 in 0 : vector<32x32xf32>, vector<32x32xf32> -> vector<64x32xf32>
    %367 = arith.truncf %366 : vector<64x32xf32> to vector<64x32xbf16>
    %c0_117 = arith.constant 0 : index
    %c0_118 = arith.constant 0 : index
    %368 = vector.load %arg12[%c0_117, %c0_118] : memref<32x32xbf16, #tpu.memory_space<vmem>>, vector<32x32xbf16>
    %cst_119 = arith.constant dense<0.000000e+00> : vector<64x32xf32>
    %369 = tpu.matmul %367, %368, %cst_119 {dimension_numbers = #tpu.dot_dimension_numbers<[1], [0], [0], [1], [0, 0, 1, 1], [], []>} : vector<64x32xbf16>, vector<32x32xbf16>, vector<64x32xf32> -> vector<64x32xf32>
    %c0_120 = arith.constant 0 : index
    %c0_121 = arith.constant 0 : index
    %370 = vector.load %arg13[%c0_120, %c0_121] : memref<1x32xf32, #tpu.memory_space<vmem>>, vector<1x32xf32>
    %371 = vector.broadcast %370 : vector<1x32xf32> to vector<64x32xf32>
    %372 = arith.addf %369, %371 : vector<64x32xf32>
    %373 = arith.addf %215, %372 : vector<64x32xf32>
    %c0_122 = arith.constant 0 : index
    %c0_123 = arith.constant 0 : index
    %374 = vector.load %arg14[%c0_122, %c0_123] : memref<1x32xf32, #tpu.memory_space<vmem>>, vector<1x32xf32>
    %c0_124 = arith.constant 0 : index
    %c0_125 = arith.constant 0 : index
    %375 = vector.load %arg15[%c0_124, %c0_125] : memref<1x32xf32, #tpu.memory_space<vmem>>, vector<1x32xf32>
    %cst_126 = arith.constant dense<0.000000e+00> : vector<64xf32>
    %376 = vector.multi_reduction <add>, %373, %cst_126 [1] : vector<64x32xf32> to vector<64xf32>
    %377 = vector.shape_cast %376 : vector<64xf32> to vector<64x1xf32>
    %cst_127 = arith.constant 3.200000e+01 : f32
    %378 = vector.broadcast %cst_127 : f32 to vector<64x1xf32>
    %379 = arith.divf %377, %378 : vector<64x1xf32>
    %380 = arith.mulf %373, %373 : vector<64x32xf32>
    %cst_128 = arith.constant dense<0.000000e+00> : vector<64xf32>
    %381 = vector.multi_reduction <add>, %380, %cst_128 [1] : vector<64x32xf32> to vector<64xf32>
    %382 = vector.shape_cast %381 : vector<64xf32> to vector<64x1xf32>
    %cst_129 = arith.constant 3.200000e+01 : f32
    %383 = vector.broadcast %cst_129 : f32 to vector<64x1xf32>
    %384 = arith.divf %382, %383 : vector<64x1xf32>
    %385 = arith.mulf %379, %379 : vector<64x1xf32>
    %386 = arith.subf %384, %385 : vector<64x1xf32>
    %387 = vector.broadcast %379 : vector<64x1xf32> to vector<64x32xf32>
    %388 = arith.subf %373, %387 : vector<64x32xf32>
    %cst_130 = arith.constant 9.99999997E-7 : f32
    %389 = vector.broadcast %cst_130 : f32 to vector<64x1xf32>
    %390 = arith.addf %386, %389 : vector<64x1xf32>
    %391 = math.rsqrt %390 : vector<64x1xf32>
    %392 = vector.broadcast %391 : vector<64x1xf32> to vector<64x32xf32>
    %393 = arith.mulf %388, %392 : vector<64x32xf32>
    %394 = vector.broadcast %374 : vector<1x32xf32> to vector<64x32xf32>
    %395 = arith.mulf %393, %394 : vector<64x32xf32>
    %396 = vector.broadcast %375 : vector<1x32xf32> to vector<64x32xf32>
    %397 = arith.addf %395, %396 : vector<64x32xf32>
    %398 = arith.truncf %397 : vector<64x32xf32> to vector<64x32xbf16>
    %c0_131 = arith.constant 0 : index
    %c0_132 = arith.constant 0 : index
    %399 = vector.load %arg16[%c0_131, %c0_132] : memref<32x128xbf16, #tpu.memory_space<vmem>>, vector<32x128xbf16>
    %cst_133 = arith.constant dense<0.000000e+00> : vector<64x128xf32>
    %400 = tpu.matmul %398, %399, %cst_133 {dimension_numbers = #tpu.dot_dimension_numbers<[1], [0], [0], [1], [0, 0, 1, 1], [], []>} : vector<64x32xbf16>, vector<32x128xbf16>, vector<64x128xf32> -> vector<64x128xf32>
    %401 = arith.truncf %400 : vector<64x128xf32> to vector<64x128xbf16>
    %c0_134 = arith.constant 0 : index
    %c0_135 = arith.constant 0 : index
    %402 = vector.load %arg17[%c0_134, %c0_135] : memref<128x32xbf16, #tpu.memory_space<vmem>>, vector<128x32xbf16>
    %cst_136 = arith.constant dense<0.000000e+00> : vector<64x32xf32>
    %403 = tpu.matmul %401, %402, %cst_136 {dimension_numbers = #tpu.dot_dimension_numbers<[1], [0], [0], [1], [0, 0, 1, 1], [], []>} : vector<64x128xbf16>, vector<128x32xbf16>, vector<64x32xf32> -> vector<64x32xf32>
    %404 = arith.addf %397, %403 : vector<64x32xf32>
    %c0_137 = arith.constant 0 : index
    %c0_138 = arith.constant 0 : index
    %405 = vector.load %arg18[%c0_137, %c0_138] : memref<1x32xf32, #tpu.memory_space<vmem>>, vector<1x32xf32>
    %c0_139 = arith.constant 0 : index
    %c0_140 = arith.constant 0 : index
    %406 = vector.load %arg19[%c0_139, %c0_140] : memref<1x32xf32, #tpu.memory_space<vmem>>, vector<1x32xf32>
    %cst_141 = arith.constant dense<0.000000e+00> : vector<64xf32>
    %407 = vector.multi_reduction <add>, %404, %cst_141 [1] : vector<64x32xf32> to vector<64xf32>
    %408 = vector.shape_cast %407 : vector<64xf32> to vector<64x1xf32>
    %cst_142 = arith.constant 3.200000e+01 : f32
    %409 = vector.broadcast %cst_142 : f32 to vector<64x1xf32>
    %410 = arith.divf %408, %409 : vector<64x1xf32>
    %411 = arith.mulf %404, %404 : vector<64x32xf32>
    %cst_143 = arith.constant dense<0.000000e+00> : vector<64xf32>
    %412 = vector.multi_reduction <add>, %411, %cst_143 [1] : vector<64x32xf32> to vector<64xf32>
    %413 = vector.shape_cast %412 : vector<64xf32> to vector<64x1xf32>
    %cst_144 = arith.constant 3.200000e+01 : f32
    %414 = vector.broadcast %cst_144 : f32 to vector<64x1xf32>
    %415 = arith.divf %413, %414 : vector<64x1xf32>
    %416 = arith.mulf %410, %410 : vector<64x1xf32>
    %417 = arith.subf %415, %416 : vector<64x1xf32>
    %418 = vector.broadcast %410 : vector<64x1xf32> to vector<64x32xf32>
    %419 = arith.subf %404, %418 : vector<64x32xf32>
    %cst_145 = arith.constant 9.99999997E-7 : f32
    %420 = vector.broadcast %cst_145 : f32 to vector<64x1xf32>
    %421 = arith.addf %417, %420 : vector<64x1xf32>
    %422 = math.rsqrt %421 : vector<64x1xf32>
    %423 = vector.broadcast %422 : vector<64x1xf32> to vector<64x32xf32>
    %424 = arith.mulf %419, %423 : vector<64x32xf32>
    %425 = vector.broadcast %405 : vector<1x32xf32> to vector<64x32xf32>
    %426 = arith.mulf %424, %425 : vector<64x32xf32>
    %427 = vector.broadcast %406 : vector<1x32xf32> to vector<64x32xf32>
    %428 = arith.addf %426, %427 : vector<64x32xf32>
    %429 = vector.extract_strided_slice %428 {offsets = [0, 0], sizes = [32, 32], strides = [1, 1]} : vector<64x32xf32> to vector<32x32xf32>
    %cst_146 = arith.constant dense<0.000000e+00> : vector<32xf32>
    %430 = vector.multi_reduction <add>, %429, %cst_146 [0] : vector<32x32xf32> to vector<32xf32>
    %431 = vector.shape_cast %430 : vector<32xf32> to vector<1x32xf32>
    %cst_147 = arith.constant 3.200000e+01 : f32
    %432 = vector.broadcast %cst_147 : f32 to vector<1x32xf32>
    %433 = arith.divf %431, %432 : vector<1x32xf32>
    %434 = vector.extract_strided_slice %428 {offsets = [32, 0], sizes = [32, 32], strides = [1, 1]} : vector<64x32xf32> to vector<32x32xf32>
    %cst_148 = arith.constant dense<0.000000e+00> : vector<32xf32>
    %435 = vector.multi_reduction <add>, %434, %cst_148 [0] : vector<32x32xf32> to vector<32xf32>
    %436 = vector.shape_cast %435 : vector<32xf32> to vector<1x32xf32>
    %cst_149 = arith.constant 3.200000e+01 : f32
    %437 = vector.broadcast %cst_149 : f32 to vector<1x32xf32>
    %438 = arith.divf %436, %437 : vector<1x32xf32>
    %439 = tpu.concatenate %433, %438 in 0 : vector<1x32xf32>, vector<1x32xf32> -> vector<2x32xf32>
    %440 = arith.truncf %439 : vector<2x32xf32> to vector<2x32xbf16>
    %c0_150 = arith.constant 0 : index
    %c0_151 = arith.constant 0 : index
    %441 = vector.load %arg20[%c0_150, %c0_151] : memref<32x512xbf16, #tpu.memory_space<vmem>>, vector<32x512xbf16>
    %cst_152 = arith.constant dense<0.000000e+00> : vector<2x512xf32>
    %442 = tpu.matmul %440, %441, %cst_152 {dimension_numbers = #tpu.dot_dimension_numbers<[1], [0], [0], [1], [0, 0, 1, 1], [], []>} : vector<2x32xbf16>, vector<32x512xbf16>, vector<2x512xf32> -> vector<2x512xf32>
    %c0_153 = arith.constant 0 : index
    %c0_154 = arith.constant 0 : index
    %443 = vector.load %arg21[%c0_153, %c0_154] : memref<1x512xf32, #tpu.memory_space<vmem>>, vector<1x512xf32>
    %444 = vector.broadcast %443 : vector<1x512xf32> to vector<2x512xf32>
    %445 = arith.addf %442, %444 : vector<2x512xf32>
    %cst_155 = arith.constant 0.000000e+00 : f32
    %cst_156 = arith.constant 6.000000e+00 : f32
    %446 = vector.broadcast %cst_155 : f32 to vector<2x512xf32>
    %447 = arith.maximumf %446, %445 : vector<2x512xf32>
    %448 = vector.broadcast %cst_156 : f32 to vector<2x512xf32>
    %449 = arith.minimumf %448, %447 : vector<2x512xf32>
    %450 = arith.truncf %449 : vector<2x512xf32> to vector<2x512xbf16>
    %c0_157 = arith.constant 0 : index
    %c0_158 = arith.constant 0 : index
    %451 = vector.load %arg22[%c0_157, %c0_158] : memref<512x256xbf16, #tpu.memory_space<vmem>>, vector<512x256xbf16>
    %cst_159 = arith.constant dense<0.000000e+00> : vector<2x256xf32>
    %452 = tpu.matmul %450, %451, %cst_159 {dimension_numbers = #tpu.dot_dimension_numbers<[1], [0], [0], [1], [0, 0, 1, 1], [], []>} : vector<2x512xbf16>, vector<512x256xbf16>, vector<2x256xf32> -> vector<2x256xf32>
    %c0_160 = arith.constant 0 : index
    %c0_161 = arith.constant 0 : index
    %453 = vector.load %arg23[%c0_160, %c0_161] : memref<1x256xf32, #tpu.memory_space<vmem>>, vector<1x256xf32>
    %454 = vector.broadcast %453 : vector<1x256xf32> to vector<2x256xf32>
    %455 = arith.addf %452, %454 : vector<2x256xf32>
    %cst_162 = arith.constant 0.000000e+00 : f32
    %cst_163 = arith.constant 6.000000e+00 : f32
    %456 = vector.broadcast %cst_162 : f32 to vector<2x256xf32>
    %457 = arith.maximumf %456, %455 : vector<2x256xf32>
    %458 = vector.broadcast %cst_163 : f32 to vector<2x256xf32>
    %459 = arith.minimumf %458, %457 : vector<2x256xf32>
    %460 = arith.truncf %459 : vector<2x256xf32> to vector<2x256xbf16>
    %c0_164 = arith.constant 0 : index
    %c0_165 = arith.constant 0 : index
    %461 = vector.load %arg24[%c0_164, %c0_165] : memref<256x128xbf16, #tpu.memory_space<vmem>>, vector<256x128xbf16>
    %cst_166 = arith.constant dense<0.000000e+00> : vector<2x128xf32>
    %462 = tpu.matmul %460, %461, %cst_166 {dimension_numbers = #tpu.dot_dimension_numbers<[1], [0], [0], [1], [0, 0, 1, 1], [], []>} : vector<2x256xbf16>, vector<256x128xbf16>, vector<2x128xf32> -> vector<2x128xf32>
    %c0_167 = arith.constant 0 : index
    %c0_168 = arith.constant 0 : index
    %463 = vector.load %arg25[%c0_167, %c0_168] : memref<1x128xf32, #tpu.memory_space<vmem>>, vector<1x128xf32>
    %464 = vector.broadcast %463 : vector<1x128xf32> to vector<2x128xf32>
    %465 = arith.addf %462, %464 : vector<2x128xf32>
    %466 = arith.negf %465 : vector<2x128xf32>
    %467 = math.exp %466 : vector<2x128xf32>
    %cst_169 = arith.constant 1.000000e+00 : f32
    %468 = vector.broadcast %cst_169 : f32 to vector<2x128xf32>
    %469 = arith.addf %468, %467 : vector<2x128xf32>
    %470 = arith.divf %468, %469 : vector<2x128xf32>
    %c0_170 = arith.constant 0 : index
    %c0_171 = arith.constant 0 : index
    %471 = vector.load %arg26[%c0_170, %c0_171] : memref<2x128xf32, #tpu.memory_space<vmem>>, vector<2x128xf32>
    tpu.vector_store %arg26[%c0_170, %c0_171], %470 {strides = array<i32>} : memref<2x128xf32, #tpu.memory_space<vmem>>, vector<2x128xf32>,
    return
  }
}

</mosaic_0001>

<bundles_post_ra>
// kernel: tpu_custom_call.1
= control target key start
LH: loop header
LB: loop body
LE: loop exit
PB: predicated region body
PF: predicated region fallthrough
CT: control target
= control target key end

     0   :  { %s8875_s0 = inlined_call_operand.vmem [shape: f32[64,32], index: 0, kind: input, shape index: {}]   ;;  %s8876_s1 = inlined_call_operand.vmem [shape: f32[64,32], index: 1, kind: input, shape index: {}]   ;;  %s8877_s2 = inlined_call_operand.vmem [shape: bf16[32,96], index: 2, kind: input, shape index: {}]   ;;  %s8878_s3 = inlined_call_operand.vmem [shape: bf16[32,32], index: 3, kind: input, shape index: {}]   ;;  %s8879_s4 = inlined_call_operand.vmem [shape: f32[1,32], index: 4, kind: input, shape index: {}]   ;;  %s8880_s5 = inlined_call_operand.vmem [shape: f32[1,32], index: 5, kind: input, shape index: {}]   ;;  %s8881_s6 = inlined_call_operand.vmem [shape: f32[1,32], index: 6, kind: input, shape index: {}]   ;;  %s8882_s7 = inlined_call_operand.vmem [shape: bf16[32,128], index: 7, kind: input, shape index: {}]   ;;  %s8883_s8 = inlined_call_operand.vmem [shape: bf16[128,32], index: 8, kind: input, shape index: {}]   ;;  %s8884_s9 = inlined_call_operand.vmem [shape: f32[1,32], index: 9, kind: input, shape index: {}]   ;;  %s8885_s10 = inlined_call_operand.vmem [shape: f32[1,32], index: 10, kind: input, shape index: {}]   ;;  %s8886_s11 = inlined_call_operand.vmem [shape: bf16[32,96], index: 11, kind: input, shape index: {}]   ;;  %s8887_s12 = inlined_call_operand.vmem [shape: bf16[32,32], index: 12, kind: input, shape index: {}]   ;;  %s8888_s13 = inlined_call_operand.vmem [shape: f32[1,32], index: 13, kind: input, shape index: {}]   ;;  %s8889_s14 = inlined_call_operand.vmem [shape: f32[1,32], index: 14, kind: input, shape index: {}]   ;;  %s8890_s15 = inlined_call_operand.vmem [shape: f32[1,32], index: 15, kind: input, shape index: {}]   ;;  %s8891_s16 = inlined_call_operand.vmem [shape: bf16[32,128], index: 16, kind: input, shape index: {}]   ;;  %s8892_s17 = inlined_call_operand.vmem [shape: bf16[128,32], index: 17, kind: input, shape index: {}]   ;;  %s8893_s18 = inlined_call_operand.vmem [shape: f32[1,32], index: 18, kind: input, shape index: {}]   ;;  %s8894_s19 = inlined_call_operand.vmem [shape: f32[1,32], index: 19, kind: input, shape index: {}]   ;;  %s8895_s20 = inlined_call_operand.vmem [shape: bf16[32,512], index: 20, kind: input, shape index: {}]   ;;  %s8896_s21 = inlined_call_operand.vmem [shape: f32[1,512], index: 21, kind: input, shape index: {}]   ;;  %s8897_s22 = inlined_call_operand.hbm [shape: bf16[512,256], index: 22, kind: input, shape index: {}]   ;;  %s8898_s23 = inlined_call_operand.vmem [shape: f32[1,256], index: 23, kind: input, shape index: {}]   ;;  %s8899_s24 = inlined_call_operand.vmem [shape: bf16[256,128], index: 24, kind: input, shape index: {}]   ;;  %s8900_s25 = inlined_call_operand.vmem [shape: f32[1,128], index: 25, kind: input, shape index: {}]   ;;  %s8901_s26 = inlined_call_operand.hbm [shape: f32[2,128], index: 26, kind: output, shape index: {}]  }
   0x1   :  { %8922 = sst [smem:[#allocation8_spill]] %s8875_s0 }
   0x2   :  { %8923 = sst [smem:[#allocation9_spill]] %s8876_s1 }
   0x3   :  { %8924 = sst [smem:[#allocation10_spill]] %s8877_s2 }
   0x4   :  { %8925 = sst [smem:[#allocation11_spill]] %s8878_s3 }
   0x5   :  { %8926 = sst [smem:[#allocation12_spill]] %s8879_s4 }
   0x6   :  { %8927 = sst [smem:[#allocation13_spill]] %s8880_s5 }
   0x7   :  { %8928 = sst [smem:[#allocation14_spill]] %s8881_s6 }
   0x8   :  { %8929 = sst [smem:[#allocation15_spill]] %s8882_s7 }
   0x9   :  { %8930 = sst [smem:[#allocation16_spill]] %s8883_s8 }
   0xa   :  { %8931 = sst [smem:[#allocation17_spill]] %s8884_s9 }
   0xb   :  { %8932 = sst [smem:[#allocation18_spill]] %s8885_s10 }
   0xc   :  { %31 = vsyncpa [#allocation3], 0 }
   0xd   :  { %32 = vsyncpa [#allocation4], 0  ;;  %s7123_s27 = smov [#allocation2]   ;;  %s7075_s8 = scalar_lea.hbm %s8897_s22, 8192 }
   0xe   :  { %s82_s3 = sshll.u32 %s7123_s27, 4  ;;  %p7076_p0 = scmp.ne.s32.totalorder %s8897_s22, %s7075_s8  ;;  %s83_s3 = int_to_ptr.vmem [resolvable:$true] %s82_s3 }
   0xf   :  { %p7079_p1 = scmp.lt.u32.totalorder %s7075_s8, %s8897_s22 }
  0x11   :  { %p7081_p2 = pnand %p7079_p1, %p7076_p0 }
  0x13   :  { %7084 = shalt.err (!%p7081_p2)
}
  0x14   :  { %s7085_s30 = scalar_lea.vmem %s83_s3, 8192  ;;  %p7090_p4 = scmp.lt.s32.totalorder %s83_s3, %s83_s3 }
  0x15   :  { %p7086_p3 = scmp.ne.s32.totalorder %s83_s3, %s7085_s30  ;;  %p7091_p5 = scmp.lt.s32.totalorder %s7085_s30, %s7085_s30 }
  0x17   :  { %p7092_p6 = por %p7091_p5, %p7090_p4 }
  0x19   :  { %p7093_p7 = pnand %p7092_p6, %p7086_p3 }
  0x1b   :  { %7096 = shalt.err (!%p7093_p7)
}
  0x1c   :  { %s7124_s2 = smov 128   ;;  %s8914_s5 = smov 8  }
  0x1d   :  { %88 = dma.hbm_to_vmem [thread:$0]  %s8897_s22, 8192, %s83_s3, [#allocation3], %s7124_s2, %s7124_s2, %s8914_s5  }
  0x1e   :  { %7119 = dma.done.wait [#allocation3], 8192  }
  0x1f   :  { %7120 = vsyncadd [#allocation3], 4294959104  ;;  %s8933_s7 = sld [smem:[#allocation10_spill]]  ;;  %s8934_s0 = sld [smem:[#allocation8_spill]]  ;;  %vm143_vm0 = vcmask 261120   ;;  %vm231_vm1 = vcmask 64512  }
  0x20   :  { %s8935_s2 = sld [smem:[#allocation9_spill]]  ;;  %s7128_s10 = smov 88   ;;  %vm996_vm2 = vcmask 130048   ;;  %vm1001_vm3 = vcmask 195584   ;;  %vm4770_vm4 = vcmask 1040384  }
  0x21   :  { %s7129_s6 = smov 120   ;;  %s7130_s1 = smov 56  }
  0x22   :  { %s7131_s27 = smov 80   ;;  %s8920_s28 = smov 48  }
  0x23   :  { %s8918_s8 = smov 72   ;;  %s8916_s4 = smov 104  }
  0x24   :  { %s8908_s29 = smov 40   ;;  %s8912_s9 = smov 16  }
  0x25   :  { %v6599_v0 = vld [vmem:[%s8933_s7] sm:$0xff]   ;;  %v6600_v1 = vld [vmem:[%s8933_s7 + $0x8] sm:$0xff]   ;;  %v101_v7 = vld [vmem:[%s8934_s0 + $0x10] sm:$0xff]  ;;  %s7132_s7 = smov 112   ;;  %s8910_s30 = smov 24  }
  0x26   :  { %6049 = vmatprep.subr.bf16.mxu1 %v6599_v0  ;;  %v99_v2 = vld [vmem:[%s8934_s0] sm:$0xff]  ;;  %v100_v3 = vld [vmem:[%s8934_s0 + $0x8] sm:$0xff]  ;;  %v102_v8 = vld [vmem:[%s8934_s0 + $0x18] sm:$0xff]  ;;  %s8937_s3 = sld [smem:[#allocation12_spill]] }
  0x27   :  { %v107_v4 = vld [vmem:[%s8935_s2] sm:$0xff]  ;;  %6050 = vmatpush3.bf16.msra.mxu1 %v6599_v0  ;;  %v108_v5 = vld [vmem:[%s8935_s2 + $0x8] sm:$0xff]  ;;  %v109_v10 = vld [vmem:[%s8935_s2 + $0x10] sm:$0xff] }
  0x28   :  { %v7307_v6 = vadd.f32 %v107_v4, %v99_v2  ;;  %6051 = vmatprep.subr.bf16.mxu1 %v6600_v1  ;;  %v7315_v9 = vadd.f32 %v108_v5, %v100_v3  ;;  %v110_v11 = vld [vmem:[%s8935_s2 + $0x18] sm:$0xff]  ;;  %v7323_v12 = vadd.f32 %v109_v10, %v101_v7  ;;  %v103_v16 = vld [vmem:[%s8934_s0 + $0x20] sm:$0xff]  ;;  %v104_v17 = vld [vmem:[%s8934_s0 + $0x28] sm:$0xff] }
  0x29   :  { %v7325_v13 = vadd.f32 %v110_v11, %v102_v8  ;;  %v111_v18 = vld [vmem:[%s8935_s2 + $0x20] sm:$0xff]  ;;  %v112_v19 = vld [vmem:[%s8935_s2 + $0x28] sm:$0xff]  ;;  %v105_v21 = vld [vmem:[%s8934_s0 + $0x30] sm:$0xff] }
  0x2a   :  { %v123_v14 = vpack.c.bf16 %v7315_v9, %v7307_v6  ;;  %v7345_v20 = vadd.f32 %v111_v18, %v103_v16  ;;  %v106_v22 = vld [vmem:[%s8934_s0 + $0x38] sm:$0xff]  ;;  %v7353_v23 = vadd.f32 %v112_v19, %v104_v17  ;;  %v113_v24 = vld [vmem:[%s8935_s2 + $0x30] sm:$0xff]  ;;  %s7126_s0 = smov 96  }
  0x2b   :  { %6052 = vmatpush3.bf16.msra.mxu1 %v6600_v1  ;;  %v124_v15 = vpack.c.bf16 %v7325_v13, %v7323_v12  ;;  %v114_v25 = vld [vmem:[%s8935_s2 + $0x38] sm:$0xff]  ;;  %v7361_v26 = vadd.f32 %v113_v24, %v105_v21  ;;  %s7127_s2 = smov 64  }
  0x2c   :  { %6053 = vmatprep.mubr.msk.bf16.mxu1 %vm143_vm0, %v123_v14  ;;  %v7363_v27 = vadd.f32 %v114_v25, %v106_v22  ;;  %v125_v28 = vpack.c.bf16 %v7353_v23, %v7345_v20 }
  0x2e   :  { %6054 = vmatmul.mubr.msk.bf16.vlgmr.msra.gmra.mrb[0].mxu1 %vm143_vm0, %v124_v15  ;;  %v126_v29 = vpack.c.bf16 %v7363_v27, %v7361_v26 }
  0x2f   :  { %6057 = vmatprep.mubr.msk.bf16.mxu1 %vm143_vm0, %v125_v28 }
  0x36   :  { %6058 = vmatmul.mubr.msk.bf16.gmra.mrb[4].mxu1 %vm143_vm0, %v126_v29 }
 0x101   :  { %v6055_v30 = vpop.f32.mrb[0].mxu1 }
 0x102   :  { %v190_v31 = vpop.f32.mrb[1].mxu1 }
 0x103   :  { %v6056_v32 = vpop.f32.mrb[2].mxu1 }
 0x104   :  { %v7371_v33 = vpack.c.bf16 %v6056_v32, %v6055_v30  ;;  %v193_v34 = vpop.f32.mrb[3].mxu1 }
 0x105   :  { %v7373_v35 = vpack.c.bf16 %v193_v34, %v190_v31 }
 0x107   :  { %227 = vrot.lane.b32.xlu0 %v7373_v35, %s7126_s0  ;;  %6065 = vmatprep.mubr.msk.bf16.mxu1 %vm231_vm1, %v7373_v35 }
 0x109   :  { %v6059_v36 = vpop.f32.mrb[4].mxu1 }
 0x10a   :  { %v206_v37 = vpop.f32.mrb[5].mxu1 }
 0x10b   :  { %229 = vrot.lane.b32.xlu0 %v7371_v33, %s7126_s0  ;;  %v6060_v38 = vpop.f32.mrb[6].mxu1 }
 0x10c   :  { %v7381_v39 = vpack.c.bf16 %v6060_v38, %v6059_v36  ;;  %v209_v40 = vpop.f32.mrb[7].mxu1 }
 0x10d   :  { %v7383_v41 = vpack.c.bf16 %v209_v40, %v206_v37 }
 0x179   :  { %v228_v42 = vpop.permute.xlu0 %227 }
 0x17a   :  { %6429 = vmatprep.subr.msk.bf16.mxu1 %vm231_vm1, %v228_v42  ;;  %v239_v43 = vsel %vm231_vm1, %v228_v42, 0 }
 0x17b   :  { %6062 = vmatpush3.bf16.xpose.msra.mxu1 %v239_v43 }
 0x17d   :  { %v230_v44 = vpop.permute.xlu0 %229 }
 0x17e   :  { %6430 = vmatprep.subr.msk.bf16.mxu1 %vm231_vm1, %v230_v44  ;;  %v242_v45 = vsel %vm231_vm1, %v230_v44, 0 }
 0x183   :  { %6064 = vmatpush3.bf16.xpose.msra.mxu1 %v242_v45 }
 0x18a   :  { %6066 = vmatmul.mubr.msk.bf16.vlgmr.msra.gmra.mrb[8].mxu1 %vm231_vm1, %v7371_v33 }
 0x25d   :  { %v6067_v46 = vpop.f32.mrb[8].mxu1 }
 0x25e   :  { %v295_v47 = vmul.f32 0.35355338, %v6067_v46  ;;  %v278_v48 = vpop.f32.mrb[9].mxu1 }
 0x25f   :  { %v293_v49 = vmul.f32 0.35355338, %v278_v48  ;;  %v6068_v50 = vpop.f32.mrb[10].mxu1 }
 0x260   :  { %v281_v51 = vpop.f32.mrb[11].mxu1  ;;  %v303_v52 = vsel %vm143_vm0, %v295_v47, -inf  ;;  %v296_v55 = vmul.f32 0.35355338, %v6068_v50 }
 0x261   :  { %v294_v53 = vmul.f32 0.35355338, %v281_v51  ;;  %304 = vmax.xlane.f32.xlu0 %v303_v52  ;;  %v297_v54 = vsel %vm143_vm0, %v293_v49, -inf }
 0x262   :  { %298 = vmax.xlane.f32.xlu1 %v297_v54  ;;  %v306_v57 = vsel %vm143_vm0, %v296_v55, -inf }
 0x263   :  { %v300_v56 = vsel %vm143_vm0, %v294_v53, -inf }
 0x266   :  { %301 = vmax.xlane.f32.xlu1 %v300_v56 }
 0x26a   :  { %307 = vmax.xlane.f32.xlu1 %v306_v57 }
 0x277   :  { %345 = vrot.lane.b32.xlu0 %v7371_v33, %s7127_s2 }
 0x27b   :  { %343 = vrot.lane.b32.xlu1 %v7373_v35, %s7127_s2 }
 0x2ee   :  { %v305_v58 = vpop.xlane.xlu0 %304 }
 0x2ef   :  { %v311_v59 = vsub.f32 %v295_v47, %v305_v58  ;;  %v299_v60 = vpop.xlane.xlu1 %298 }
 0x2f0   :  { %v309_v61 = vsub.f32 %v293_v49, %v299_v60 }
 0x2f1   :  { %v317_v62 = vmul.f32 1.442695, %v311_v59 }
 0x2f2   :  { %v313_v63 = vmul.f32 1.442695, %v309_v61  ;;  %v346_v10 = vpop.permute.xlu0 %345 }
 0x2f3   :  { %6751 = vpow2.f32 %v317_v62  ;;  %v302_v0 = vpop.xlane.xlu1 %301 }
 0x2f4   :  { %6753 = vpow2.f32 %v313_v63  ;;  %v310_v1 = vsub.f32 %v294_v53, %v302_v0 }
 0x2f6   :  { %v315_v4 = vmul.f32 1.442695, %v310_v1 }
 0x2f7   :  { %v308_v2 = vpop.xlane.xlu1 %307 }
 0x2f8   :  { %v312_v3 = vsub.f32 %v296_v55, %v308_v2 }
 0x2fa   :  { %v319_v5 = vmul.f32 1.442695, %v312_v3 }
 0x2fb   :  { %v344_v7 = vpop.permute.xlu1 %343 }
 0x2fc   :  { %6755 = vpow2.f32 %v319_v5  ;;  %6069 = vmatprep.subr.bf16.mxu1 %v344_v7 }
 0x2fd   :  { %v6752_v8 = vpop.eup %6751  ;;  %6070 = vmatpush3.bf16.msra.mxu1 %v344_v7  ;;  %6757 = vpow2.f32 %v315_v4 }
 0x2fe   :  { %6071 = vmatprep.subr.bf16.mxu1 %v346_v10  ;;  %v327_v11 = vsel %vm143_vm0, %v6752_v8, 0.0  ;;  %v6754_v14 = vpop.eup %6753 }
 0x2ff   :  { %328 = vadd.xlane.f32.xlu1 %v327_v11  ;;  %v321_v15 = vsel %vm143_vm0, %v6754_v14, 0.0 }
 0x301   :  { %6072 = vmatpush3.bf16.msra.mxu1 %v346_v10 }
 0x303   :  { %322 = vadd.xlane.f32.xlu1 %v321_v15 }
 0x306   :  { %v6756_v16 = vpop.eup %6755 }
 0x307   :  { %v330_v17 = vsel %vm143_vm0, %v6756_v16, 0.0  ;;  %v6758_v18 = vpop.eup %6757 }
 0x308   :  { %331 = vadd.xlane.f32.xlu1 %v330_v17  ;;  %v324_v19 = vsel %vm143_vm0, %v6758_v18, 0.0 }
 0x30c   :  { %325 = vadd.xlane.f32.xlu1 %v324_v19 }
 0x31d   :  { %408 = vrot.lane.b32.xlu1 %v7373_v35, %s7128_s10 }
 0x321   :  { %410 = vrot.lane.b32.xlu1 %v7371_v33, %s7128_s10 }
 0x325   :  { %404 = vrot.lane.b32.xlu1 %v7373_v35, %s7129_s6 }
 0x329   :  { %406 = vrot.lane.b32.xlu1 %v7371_v33, %s7129_s6 }
 0x38c   :  { %v329_v21 = vpop.xlane.xlu1 %328 }
 0x390   :  { %v323_v22 = vpop.xlane.xlu1 %322 }
 0x395   :  { %v332_v24 = vpop.xlane.xlu1 %331 }
 0x396   :  { %6759 = vrcp.f32 %v332_v24 }
 0x397   :  { %6761 = vrcp.f32 %v323_v22 }
 0x398   :  { %6763 = vrcp.f32 %v329_v21 }
 0x399   :  { %v326_v25 = vpop.xlane.xlu1 %325 }
 0x39a   :  { %6765 = vrcp.f32 %v326_v25 }
 0x39d   :  { %v409_v28 = vpop.permute.xlu1 %408 }
 0x39e   :  { %6431 = vmatprep.subr.msk.bf16.mxu1 %vm231_vm1, %v409_v28  ;;  %v419_v45 = vsel %vm231_vm1, %v409_v28, 0 }
 0x3a0   :  { %v6760_v29 = vpop.eup %6759 }
 0x3a1   :  { %v6762_v30 = vpop.eup %6761  ;;  %v340_v34 = vmul.f32 %v6760_v29, %v6756_v16  ;;  %v411_v36 = vpop.permute.xlu1 %410 }
 0x3a2   :  { %v6764_v31 = vpop.eup %6763  ;;  %v337_v37 = vmul.f32 %v6762_v30, %v6754_v14  ;;  %v422_v46 = vsel %vm231_vm1, %v411_v36, 0 }
 0x3a3   :  { %v339_v40 = vmul.f32 %v6764_v31, %v6752_v8 }
 0x3a4   :  { %v6766_v32 = vpop.eup %6765 }
 0x3a5   :  { %v338_v38 = vmul.f32 %v6766_v32, %v6758_v18  ;;  %v342_v43 = vpack.c.bf16 %v340_v34, %v339_v40  ;;  %v405_v44 = vpop.permute.xlu1 %404 }
 0x3a7   :  { %v341_v42 = vpack.c.bf16 %v338_v38, %v337_v37 }
 0x3a9   :  { %6073 = vmatprep.mubr.msk.bf16.mxu1 %vm143_vm0, %v341_v42  ;;  %v407_v47 = vpop.permute.xlu1 %406 }
 0x3aa   :  { %6074 = vmatmul.mubr.msk.bf16.vlgmr.msra.gmra.mrb[12].mxu1 %vm143_vm0, %v342_v43 }
 0x3ab   :  { %6078 = vmatpush3.bf16.xpose.msra.mxu1 %v419_v45  ;;  %6081 = vmatprep.mubr.msk.bf16.mxu1 %vm231_vm1, %v405_v44 }
 0x3ac   :  { %6432 = vmatprep.subr.msk.bf16.mxu1 %vm231_vm1, %v411_v36 }
 0x3b3   :  { %6080 = vmatpush3.bf16.xpose.msra.mxu1 %v422_v46 }
 0x3ba   :  { %6082 = vmatmul.mubr.msk.bf16.vlgmr.msra.gmra.mrb[16].mxu1 %vm231_vm1, %v407_v47 }
 0x47d   :  { %v7419_v48 = vpop.f32.mrb[12].mxu1 }
 0x47e   :  { %v7421_v49 = vpop.f32.mrb[13].mxu1 }
 0x47f   :  { %v7423_v50 = vpop.f32.mrb[14].mxu1 }
 0x480   :  { %v7425_v51 = vpop.f32.mrb[15].mxu1 }
 0x48d   :  { %v6083_v52 = vpop.f32.mrb[16].mxu1 }
 0x48e   :  { %v458_v53 = vpop.f32.mrb[17].mxu1  ;;  %v475_v57 = vmul.f32 0.35355338, %v6083_v52 }
 0x48f   :  { %v473_v54 = vmul.f32 0.35355338, %v458_v53  ;;  %v6084_v55 = vpop.f32.mrb[18].mxu1 }
 0x490   :  { %v461_v56 = vpop.f32.mrb[19].mxu1  ;;  %v476_v61 = vmul.f32 0.35355338, %v6084_v55  ;;  %v483_v62 = vsel %vm143_vm0, %v475_v57, -inf }
 0x491   :  { %v474_v58 = vmul.f32 0.35355338, %v461_v56  ;;  %v477_v59 = vsel %vm143_vm0, %v473_v54, -inf }
 0x492   :  { %478 = vmax.xlane.f32.xlu0 %v477_v59  ;;  %v486_v63 = vsel %vm143_vm0, %v476_v61, -inf }
 0x493   :  { %v480_v60 = vsel %vm143_vm0, %v474_v58, -inf }
 0x494   :  { %481 = vmax.xlane.f32.xlu1 %v480_v60 }
 0x496   :  { %484 = vmax.xlane.f32.xlu0 %v483_v62 }
 0x49a   :  { %487 = vmax.xlane.f32.xlu0 %v486_v63 }
 0x4a5   :  { %523 = vrot.lane.b32.xlu1 %v7373_v35, %s7130_s1 }
 0x51f   :  { %v479_v0 = vpop.xlane.xlu0 %478 }
 0x520   :  { %v489_v2 = vsub.f32 %v473_v54, %v479_v0 }
 0x521   :  { %v482_v1 = vpop.xlane.xlu1 %481 }
 0x522   :  { %v493_v7 = vmul.f32 1.442695, %v489_v2  ;;  %v490_v8 = vsub.f32 %v474_v58, %v482_v1 }
 0x523   :  { %v485_v3 = vpop.xlane.xlu0 %484 }
 0x524   :  { %v491_v4 = vsub.f32 %v475_v57, %v485_v3  ;;  %v495_v15 = vmul.f32 1.442695, %v490_v8 }
 0x525   :  { %v524_v5 = vpop.permute.xlu1 %523 }
 0x526   :  { %v497_v10 = vmul.f32 1.442695, %v491_v4  ;;  %6085 = vmatprep.subr.bf16.mxu0 %v524_v5 }
 0x527   :  { %v488_v11 = vpop.xlane.xlu0 %487  ;;  %6086 = vmatpush3.bf16.msra.mxu0 %v524_v5 }
 0x528   :  { %6767 = vpow2.f32 %v497_v10  ;;  %v492_v14 = vsub.f32 %v476_v61, %v488_v11 }
 0x529   :  { %6769 = vpow2.f32 %v493_v7 }
 0x52a   :  { %v499_v16 = vmul.f32 1.442695, %v492_v14 }
 0x52c   :  { %6771 = vpow2.f32 %v499_v16 }
 0x52d   :  { %6773 = vpow2.f32 %v495_v15 }
 0x532   :  { %v6768_v17 = vpop.eup %6767 }
 0x533   :  { %v507_v18 = vsel %vm143_vm0, %v6768_v17, 0.0  ;;  %v6770_v19 = vpop.eup %6769 }
 0x534   :  { %508 = vadd.xlane.f32.xlu1 %v507_v18  ;;  %v501_v24 = vsel %vm143_vm0, %v6770_v19, 0.0 }
 0x536   :  { %v6772_v21 = vpop.eup %6771 }
 0x537   :  { %v510_v22 = vsel %vm143_vm0, %v6772_v21, 0.0  ;;  %v6774_v25 = vpop.eup %6773 }
 0x538   :  { %511 = vadd.xlane.f32.xlu0 %v510_v22  ;;  %502 = vadd.xlane.f32.xlu1 %v501_v24  ;;  %v504_v28 = vsel %vm143_vm0, %v6774_v25, 0.0 }
 0x53c   :  { %505 = vadd.xlane.f32.xlu0 %v504_v28 }
 0x549   :  { %588 = vrot.lane.b32.xlu1 %v7373_v35, %s7131_s27 }
 0x54d   :  { %590 = vrot.lane.b32.xlu1 %v7371_v33, %s7131_s27 }
 0x551   :  { %586 = vrot.lane.b32.xlu1 %v7371_v33, %s7132_s7 }
 0x552   :  { %525 = vrot.lane.b32.xlu0 %v7371_v33, %s7130_s1 }
 0x556   :  { %584 = vrot.lane.b32.xlu0 %v7373_v35, %s7132_s7 }
 0x5c1   :  { %v509_v29 = vpop.xlane.xlu1 %508 }
 0x5c5   :  { %v512_v30 = vpop.xlane.xlu0 %511  ;;  %v503_v31 = vpop.xlane.xlu1 %502 }
 0x5c6   :  { %6775 = vrcp.f32 %v512_v30 }
 0x5c7   :  { %6777 = vrcp.f32 %v503_v31 }
 0x5c8   :  { %6779 = vrcp.f32 %v509_v29 }
 0x5c9   :  { %v506_v32 = vpop.xlane.xlu0 %505  ;;  %v589_v36 = vpop.permute.xlu1 %588 }
 0x5ca   :  { %6781 = vrcp.f32 %v506_v32  ;;  %v599_v54 = vsel %vm231_vm1, %v589_v36, 0 }
 0x5cd   :  { %v526_v34 = vpop.permute.xlu0 %525  ;;  %v591_v55 = vpop.permute.xlu1 %590 }
 0x5ce   :  { %6087 = vmatprep.subr.bf16.mxu0 %v526_v34  ;;  %v602_v56 = vsel %vm231_vm1, %v591_v55, 0 }
 0x5cf   :  { %6088 = vmatpush3.bf16.msra.mxu0 %v526_v34 }
 0x5d0   :  { %6433 = vmatprep.subr.msk.bf16.mxu0 %vm231_vm1, %v589_v36  ;;  %v6776_v37 = vpop.eup %6775 }
 0x5d1   :  { %v6778_v38 = vpop.eup %6777  ;;  %v520_v43 = vmul.f32 %v6776_v37, %v6772_v21  ;;  %v585_v53 = vpop.permute.xlu0 %584 }
 0x5d2   :  { %v6780_v40 = vpop.eup %6779  ;;  %v517_v44 = vmul.f32 %v6778_v38, %v6770_v19  ;;  %v587_v57 = vpop.permute.xlu1 %586 }
 0x5d3   :  { %v519_v46 = vmul.f32 %v6780_v40, %v6768_v17 }
 0x5d4   :  { %v6782_v42 = vpop.eup %6781 }
 0x5d5   :  { %v518_v45 = vmul.f32 %v6782_v42, %v6774_v25  ;;  %v522_v52 = vpack.c.bf16 %v520_v43, %v519_v46 }
 0x5d7   :  { %v521_v47 = vpack.c.bf16 %v518_v45, %v517_v44 }
 0x5d9   :  { %6089 = vmatprep.mubr.msk.bf16.mxu0 %vm143_vm0, %v521_v47 }
 0x5da   :  { %6090 = vmatmul.mubr.msk.bf16.vlgmr.msra.gmra.mrb[0].mxu0 %vm143_vm0, %v522_v52 }
 0x5db   :  { %6094 = vmatpush3.bf16.xpose.msra.mxu0 %v599_v54  ;;  %6097 = vmatprep.mubr.msk.bf16.mxu0 %vm231_vm1, %v585_v53 }
 0x5dc   :  { %6434 = vmatprep.subr.msk.bf16.mxu0 %vm231_vm1, %v591_v55 }
 0x5e3   :  { %6096 = vmatpush3.bf16.xpose.msra.mxu0 %v602_v56 }
 0x5ea   :  { %6098 = vmatmul.mubr.msk.bf16.vlgmr.msra.gmra.mrb[4].mxu0 %vm231_vm1, %v587_v57 }
 0x6ad   :  { %v7455_v58 = vpop.f32.mrb[0].mxu0 }
 0x6ae   :  { %v7457_v59 = vpop.f32.mrb[1].mxu0 }
 0x6af   :  { %v7459_v60 = vpop.f32.mrb[2].mxu0 }
 0x6b0   :  { %v6484_v61 = vpack.i.bf16 %v7459_v60, %v7455_v58  ;;  %v7463_v62 = vpop.f32.mrb[3].mxu0 }
 0x6b1   :  { %v6479_v63 = vpack.i.bf16 %v7463_v62, %v7457_v59 }
 0x6bd   :  { %v6099_v0 = vpop.f32.mrb[4].mxu0 }
 0x6be   :  { %v638_v1 = vpop.f32.mrb[5].mxu0  ;;  %v655_v5 = vmul.f32 0.35355338, %v6099_v0 }
 0x6bf   :  { %v653_v2 = vmul.f32 0.35355338, %v638_v1  ;;  %v6100_v3 = vpop.f32.mrb[6].mxu0 }
 0x6c0   :  { %v641_v4 = vpop.f32.mrb[7].mxu0  ;;  %v656_v11 = vmul.f32 0.35355338, %v6100_v3  ;;  %v663_v14 = vsel %vm143_vm0, %v655_v5, -inf }
 0x6c1   :  { %v654_v7 = vmul.f32 0.35355338, %v641_v4  ;;  %v657_v8 = vsel %vm143_vm0, %v653_v2, -inf }
 0x6c2   :  { %658 = vmax.xlane.f32.xlu0 %v657_v8  ;;  %v666_v15 = vsel %vm143_vm0, %v656_v11, -inf }
 0x6c3   :  { %v660_v10 = vsel %vm143_vm0, %v654_v7, -inf }
 0x6c4   :  { %661 = vmax.xlane.f32.xlu1 %v660_v10 }
 0x6c6   :  { %664 = vmax.xlane.f32.xlu0 %v663_v14 }
 0x6ca   :  { %667 = vmax.xlane.f32.xlu0 %v666_v15 }
 0x6d5   :  { %703 = vrot.lane.b32.xlu1 %v7373_v35, %s8920_s28 }
 0x74f   :  { %v659_v16 = vpop.xlane.xlu0 %658 }
 0x750   :  { %v669_v18 = vsub.f32 %v653_v2, %v659_v16 }
 0x751   :  { %v662_v17 = vpop.xlane.xlu1 %661 }
 0x752   :  { %v673_v24 = vmul.f32 1.442695, %v669_v18  ;;  %v670_v25 = vsub.f32 %v654_v7, %v662_v17 }
 0x753   :  { %v665_v19 = vpop.xlane.xlu0 %664 }
 0x754   :  { %v671_v21 = vsub.f32 %v655_v5, %v665_v19  ;;  %v675_v31 = vmul.f32 1.442695, %v670_v25 }
 0x755   :  { %v704_v22 = vpop.permute.xlu1 %703 }
 0x756   :  { %v677_v28 = vmul.f32 1.442695, %v671_v21  ;;  %6101 = vmatprep.subr.bf16.mxu1 %v704_v22 }
 0x757   :  { %v668_v29 = vpop.xlane.xlu0 %667  ;;  %6102 = vmatpush3.bf16.msra.mxu1 %v704_v22 }
 0x758   :  { %6783 = vpow2.f32 %v677_v28  ;;  %v672_v30 = vsub.f32 %v656_v11, %v668_v29 }
 0x759   :  { %6785 = vpow2.f32 %v673_v24 }
 0x75a   :  { %v679_v32 = vmul.f32 1.442695, %v672_v30 }
 0x75c   :  { %6787 = vpow2.f32 %v679_v32 }
 0x75d   :  { %6789 = vpow2.f32 %v675_v31 }
 0x762   :  { %v6784_v34 = vpop.eup %6783 }
 0x763   :  { %v687_v36 = vsel %vm143_vm0, %v6784_v34, 0.0  ;;  %v6786_v37 = vpop.eup %6785 }
 0x764   :  { %688 = vadd.xlane.f32.xlu1 %v687_v36  ;;  %v681_v42 = vsel %vm143_vm0, %v6786_v37, 0.0 }
 0x766   :  { %v6788_v38 = vpop.eup %6787 }
 0x767   :  { %v690_v40 = vsel %vm143_vm0, %v6788_v38, 0.0  ;;  %v6790_v43 = vpop.eup %6789 }
 0x768   :  { %691 = vadd.xlane.f32.xlu0 %v690_v40  ;;  %682 = vadd.xlane.f32.xlu1 %v681_v42  ;;  %v684_v44 = vsel %vm143_vm0, %v6790_v43, 0.0 }
 0x76c   :  { %685 = vadd.xlane.f32.xlu0 %v684_v44 }
 0x779   :  { %768 = vrot.lane.b32.xlu1 %v7373_v35, %s8918_s8 }
 0x77d   :  { %770 = vrot.lane.b32.xlu1 %v7371_v33, %s8918_s8 }
 0x781   :  { %766 = vrot.lane.b32.xlu1 %v7371_v33, %s8916_s4 }
 0x782   :  { %705 = vrot.lane.b32.xlu0 %v7371_v33, %s8920_s28 }
 0x786   :  { %764 = vrot.lane.b32.xlu0 %v7373_v35, %s8916_s4 }
 0x7f1   :  { %v689_v45 = vpop.xlane.xlu1 %688 }
 0x7f5   :  { %v692_v46 = vpop.xlane.xlu0 %691  ;;  %v683_v47 = vpop.xlane.xlu1 %682 }
 0x7f6   :  { %6791 = vrcp.f32 %v692_v46 }
 0x7f7   :  { %6793 = vrcp.f32 %v683_v47 }
 0x7f8   :  { %6795 = vrcp.f32 %v689_v45 }
 0x7f9   :  { %v686_v52 = vpop.xlane.xlu0 %685  ;;  %v769_v54 = vpop.permute.xlu1 %768 }
 0x7fa   :  { %6797 = vrcp.f32 %v686_v52  ;;  %v779_v10 = vsel %vm231_vm1, %v769_v54, 0 }
 0x7fd   :  { %v706_v53 = vpop.permute.xlu0 %705  ;;  %v771_v11 = vpop.permute.xlu1 %770 }
 0x7fe   :  { %6103 = vmatprep.subr.bf16.mxu1 %v706_v53  ;;  %v782_v14 = vsel %vm231_vm1, %v771_v11, 0 }
 0x7ff   :  { %6104 = vmatpush3.bf16.msra.mxu1 %v706_v53 }
 0x800   :  { %6435 = vmatprep.subr.msk.bf16.mxu1 %vm231_vm1, %v769_v54  ;;  %v6792_v55 = vpop.eup %6791 }
 0x801   :  { %v6794_v56 = vpop.eup %6793  ;;  %v700_v1 = vmul.f32 %v6792_v55, %v6788_v38  ;;  %v765_v8 = vpop.permute.xlu0 %764 }
 0x802   :  { %v6796_v57 = vpop.eup %6795  ;;  %v697_v2 = vmul.f32 %v6794_v56, %v6786_v37  ;;  %v767_v15 = vpop.permute.xlu1 %766 }
 0x803   :  { %v699_v4 = vmul.f32 %v6796_v57, %v6784_v34 }
 0x804   :  { %v6798_v0 = vpop.eup %6797 }
 0x805   :  { %v698_v3 = vmul.f32 %v6798_v0, %v6790_v43  ;;  %v702_v7 = vpack.c.bf16 %v700_v1, %v699_v4 }
 0x807   :  { %v701_v5 = vpack.c.bf16 %v698_v3, %v697_v2 }
 0x809   :  { %6105 = vmatprep.mubr.msk.bf16.mxu1 %vm143_vm0, %v701_v5 }
 0x80a   :  { %6106 = vmatmul.mubr.msk.bf16.vlgmr.msra.gmra.mrb[20].mxu1 %vm143_vm0, %v702_v7 }
 0x80b   :  { %6110 = vmatpush3.bf16.xpose.msra.mxu1 %v779_v10  ;;  %6113 = vmatprep.mubr.msk.bf16.mxu1 %vm231_vm1, %v765_v8 }
 0x80c   :  { %6436 = vmatprep.subr.msk.bf16.mxu1 %vm231_vm1, %v771_v11 }
 0x813   :  { %6112 = vmatpush3.bf16.xpose.msra.mxu1 %v782_v14 }
 0x81a   :  { %6114 = vmatmul.mubr.msk.bf16.vlgmr.msra.gmra.mrb[24].mxu1 %vm231_vm1, %v767_v15 }
 0x8dd   :  { %v7495_v16 = vpop.f32.mrb[20].mxu1 }
 0x8de   :  { %v7497_v17 = vpop.f32.mrb[21].mxu1 }
 0x8df   :  { %v7499_v18 = vpop.f32.mrb[22].mxu1 }
 0x8e0   :  { %v6494_v19 = vpack.i.bf16 %v7499_v18, %v7495_v16  ;;  %v7503_v21 = vpop.f32.mrb[23].mxu1 }
 0x8e1   :  { %v6489_v22 = vpack.i.bf16 %v7503_v21, %v7497_v17 }
 0x8ed   :  { %v6115_v24 = vpop.f32.mrb[24].mxu1 }
 0x8ee   :  { %v818_v25 = vpop.f32.mrb[25].mxu1  ;;  %v835_v31 = vmul.f32 0.35355338, %v6115_v24 }
 0x8ef   :  { %v833_v28 = vmul.f32 0.35355338, %v818_v25  ;;  %v6116_v29 = vpop.f32.mrb[26].mxu1 }
 0x8f0   :  { %v821_v30 = vpop.f32.mrb[27].mxu1  ;;  %v836_v37 = vmul.f32 0.35355338, %v6116_v29  ;;  %v843_v38 = vsel %vm143_vm0, %v835_v31, -inf }
 0x8f1   :  { %v834_v32 = vmul.f32 0.35355338, %v821_v30  ;;  %v837_v34 = vsel %vm143_vm0, %v833_v28, -inf }
 0x8f2   :  { %838 = vmax.xlane.f32.xlu0 %v837_v34  ;;  %v846_v40 = vsel %vm143_vm0, %v836_v37, -inf }
 0x8f3   :  { %v840_v36 = vsel %vm143_vm0, %v834_v32, -inf }
 0x8f4   :  { %841 = vmax.xlane.f32.xlu1 %v840_v36 }
 0x8f6   :  { %844 = vmax.xlane.f32.xlu0 %v843_v38 }
 0x8fa   :  { %847 = vmax.xlane.f32.xlu0 %v846_v40 }
 0x905   :  { %883 = vrot.lane.b32.xlu1 %v7373_v35, %s8908_s29 }
 0x97f   :  { %v839_v42 = vpop.xlane.xlu0 %838 }
 0x980   :  { %v849_v44 = vsub.f32 %v833_v28, %v839_v42 }
 0x981   :  { %v842_v43 = vpop.xlane.xlu1 %841 }
 0x982   :  { %v853_v52 = vmul.f32 1.442695, %v849_v44  ;;  %v850_v53 = vsub.f32 %v834_v32, %v842_v43 }
 0x983   :  { %v845_v45 = vpop.xlane.xlu0 %844 }
 0x984   :  { %v851_v46 = vsub.f32 %v835_v31, %v845_v45  ;;  %v855_v57 = vmul.f32 1.442695, %v850_v53 }
 0x985   :  { %v884_v47 = vpop.permute.xlu1 %883 }
 0x986   :  { %v857_v54 = vmul.f32 1.442695, %v851_v46  ;;  %6117 = vmatprep.subr.bf16.mxu0 %v884_v47 }
 0x987   :  { %v848_v55 = vpop.xlane.xlu0 %847  ;;  %6118 = vmatpush3.bf16.msra.mxu0 %v884_v47 }
 0x988   :  { %6799 = vpow2.f32 %v857_v54  ;;  %v852_v56 = vsub.f32 %v836_v37, %v848_v55 }
 0x989   :  { %6801 = vpow2.f32 %v853_v52 }
 0x98a   :  { %v859_v0 = vmul.f32 1.442695, %v852_v56 }
 0x98c   :  { %6803 = vpow2.f32 %v859_v0 }
 0x98d   :  { %6805 = vpow2.f32 %v855_v57 }
 0x992   :  { %v6800_v35 = vpop.eup %6799 }
 0x993   :  { %v867_v1 = vsel %vm143_vm0, %v6800_v35, 0.0  ;;  %v6802_v2 = vpop.eup %6801 }
 0x994   :  { %868 = vadd.xlane.f32.xlu1 %v867_v1  ;;  %v861_v5 = vsel %vm143_vm0, %v6802_v2, 0.0 }
 0x996   :  { %v6804_v3 = vpop.eup %6803 }
 0x997   :  { %v870_v4 = vsel %vm143_vm0, %v6804_v3, 0.0  ;;  %v6806_v7 = vpop.eup %6805 }
 0x998   :  { %871 = vadd.xlane.f32.xlu0 %v870_v4  ;;  %862 = vadd.xlane.f32.xlu1 %v861_v5  ;;  %v864_v8 = vsel %vm143_vm0, %v6806_v7, 0.0 }
 0x99c   :  { %865 = vadd.xlane.f32.xlu0 %v864_v8 }
 0x9a9   :  { %1008 = vrot.lane.b32.xlu1 %v7383_v41, %s7126_s0 }
 0x9ad   :  { %1010 = vrot.lane.b32.xlu1 %v7381_v39, %s7126_s0 }
 0x9b2   :  { %885 = vrot.lane.b32.xlu0 %v7371_v33, %s8908_s29 }
 0xa21   :  { %v869_v10 = vpop.xlane.xlu1 %868 }
 0xa25   :  { %v872_v11 = vpop.xlane.xlu0 %871  ;;  %v863_v14 = vpop.xlane.xlu1 %862 }
 0xa26   :  { %6807 = vrcp.f32 %v872_v11 }
 0xa27   :  { %6809 = vrcp.f32 %v863_v14 }
 0xa28   :  { %6811 = vrcp.f32 %v869_v10 }
 0xa29   :  { %v866_v15 = vpop.xlane.xlu0 %865  ;;  %v1009_v25 = vpop.permute.xlu1 %1008 }
 0xa2a   :  { %6813 = vrcp.f32 %v866_v15  ;;  %v1019_v40 = vsel %vm231_vm1, %v1009_v25, 0 }
 0xa2d   :  { %v886_v24 = vpop.permute.xlu0 %885  ;;  %v1011_v42 = vpop.permute.xlu1 %1010 }
 0xa2e   :  { %6119 = vmatprep.subr.bf16.mxu0 %v886_v24  ;;  %v1022_v43 = vsel %vm231_vm1, %v1011_v42, 0 }
 0xa2f   :  { %6120 = vmatpush3.bf16.msra.mxu0 %v886_v24 }
 0xa30   :  { %6437 = vmatprep.subr.msk.bf16.mxu0 %vm231_vm1, %v1009_v25  ;;  %v6808_v28 = vpop.eup %6807 }
 0xa31   :  { %v6810_v29 = vpop.eup %6809  ;;  %v880_v32 = vmul.f32 %v6808_v28, %v6804_v3 }
 0xa32   :  { %v6812_v30 = vpop.eup %6811  ;;  %v877_v33 = vmul.f32 %v6810_v29, %v6802_v2 }
 0xa33   :  { %v879_v36 = vmul.f32 %v6812_v30, %v6800_v35 }
 0xa34   :  { %v6814_v31 = vpop.eup %6813 }
 0xa35   :  { %v878_v34 = vmul.f32 %v6814_v31, %v6806_v7  ;;  %v882_v38 = vpack.c.bf16 %v880_v32, %v879_v36 }
 0xa37   :  { %v881_v37 = vpack.c.bf16 %v878_v34, %v877_v33 }
 0xa39   :  { %6121 = vmatprep.mubr.msk.bf16.mxu0 %vm143_vm0, %v881_v37 }
 0xa3a   :  { %6122 = vmatmul.mubr.msk.bf16.vlgmr.msra.gmra.mrb[8].mxu0 %vm143_vm0, %v882_v38 }
 0xa3b   :  { %6126 = vmatpush3.bf16.xpose.msra.mxu0 %v1019_v40  ;;  %6129 = vmatprep.mubr.msk.bf16.mxu0 %vm231_vm1, %v7383_v41 }
 0xa3c   :  { %6438 = vmatprep.subr.msk.bf16.mxu0 %vm231_vm1, %v1011_v42 }
 0xa43   :  { %6128 = vmatpush3.bf16.xpose.msra.mxu0 %v1022_v43 }
 0xa4a   :  { %6130 = vmatmul.mubr.msk.bf16.vlgmr.msra.gmra.mrb[12].mxu0 %vm231_vm1, %v7381_v39 }
 0xb0d   :  { %v7533_v44 = vpop.f32.mrb[8].mxu0 }
 0xb0e   :  { %v7535_v45 = vpop.f32.mrb[9].mxu0 }
 0xb0f   :  { %v7537_v46 = vpop.f32.mrb[10].mxu0 }
 0xb10   :  { %v6504_v47 = vpack.i.bf16 %v7537_v46, %v7533_v44  ;;  %v7541_v52 = vpop.f32.mrb[11].mxu0 }
 0xb11   :  { %v6499_v53 = vpack.i.bf16 %v7541_v52, %v7535_v45 }
 0xb1d   :  { %v6131_v54 = vpop.f32.mrb[12].mxu0 }
 0xb1e   :  { %v1058_v55 = vpop.f32.mrb[13].mxu0  ;;  %v1075_v35 = vmul.f32 0.35355338, %v6131_v54 }
 0xb1f   :  { %v1073_v56 = vmul.f32 0.35355338, %v1058_v55  ;;  %v6132_v57 = vpop.f32.mrb[14].mxu0 }
 0xb20   :  { %v1061_v0 = vpop.f32.mrb[15].mxu0  ;;  %v1076_v4 = vmul.f32 0.35355338, %v6132_v57  ;;  %v1083_v5 = vsel %vm143_vm0, %v1075_v35, -inf }
 0xb21   :  { %v1074_v1 = vmul.f32 0.35355338, %v1061_v0  ;;  %v1077_v2 = vsel %vm143_vm0, %v1073_v56, -inf }
 0xb22   :  { %1078 = vmax.xlane.f32.xlu0 %v1077_v2  ;;  %v1086_v7 = vsel %vm143_vm0, %v1076_v4, -inf }
 0xb23   :  { %v1080_v3 = vsel %vm143_vm0, %v1074_v1, -inf }
 0xb24   :  { %1081 = vmax.xlane.f32.xlu1 %v1080_v3 }
 0xb26   :  { %1084 = vmax.xlane.f32.xlu0 %v1083_v5 }
 0xb2a   :  { %1087 = vmax.xlane.f32.xlu0 %v1086_v7 }
 0xb35   :  { %1123 = vrot.lane.b32.xlu1 %v7383_v41, %s7127_s2 }
 0xbaf   :  { %v1079_v8 = vpop.xlane.xlu0 %1078 }
 0xbb0   :  { %v1089_v11 = vsub.f32 %v1073_v56, %v1079_v8 }
 0xbb1   :  { %v1082_v10 = vpop.xlane.xlu1 %1081 }
 0xbb2   :  { %v1093_v25 = vmul.f32 1.442695, %v1089_v11  ;;  %v1090_v28 = vsub.f32 %v1074_v1, %v1082_v10 }
 0xbb3   :  { %v1085_v14 = vpop.xlane.xlu0 %1084 }
 0xbb4   :  { %v1091_v15 = vsub.f32 %v1075_v35, %v1085_v14  ;;  %v1095_v32 = vmul.f32 1.442695, %v1090_v28 }
 0xbb5   :  { %v1124_v24 = vpop.permute.xlu1 %1123 }
 0xbb6   :  { %v1097_v29 = vmul.f32 1.442695, %v1091_v15  ;;  %6133 = vmatprep.subr.bf16.mxu1 %v1124_v24 }
 0xbb7   :  { %v1088_v30 = vpop.xlane.xlu0 %1087  ;;  %6134 = vmatpush3.bf16.msra.mxu1 %v1124_v24 }
 0xbb8   :  { %6815 = vpow2.f32 %v1097_v29  ;;  %v1092_v31 = vsub.f32 %v1076_v4, %v1088_v30 }
 0xbb9   :  { %6817 = vpow2.f32 %v1093_v25 }
 0xbba   :  { %v1099_v33 = vmul.f32 1.442695, %v1092_v31 }
 0xbbc   :  { %6819 = vpow2.f32 %v1099_v33 }
 0xbbd   :  { %6821 = vpow2.f32 %v1095_v32 }
 0xbc2   :  { %v6816_v34 = vpop.eup %6815 }
 0xbc3   :  { %v1107_v36 = vsel %vm143_vm0, %v6816_v34, 0.0  ;;  %v6818_v37 = vpop.eup %6817 }
 0xbc4   :  { %1108 = vadd.xlane.f32.xlu1 %v1107_v36  ;;  %v1101_v42 = vsel %vm143_vm0, %v6818_v37, 0.0 }
 0xbc6   :  { %v6820_v38 = vpop.eup %6819 }
 0xbc7   :  { %v1110_v40 = vsel %vm143_vm0, %v6820_v38, 0.0  ;;  %v6822_v43 = vpop.eup %6821 }
 0xbc8   :  { %1111 = vadd.xlane.f32.xlu0 %v1110_v40  ;;  %1102 = vadd.xlane.f32.xlu1 %v1101_v42  ;;  %v1104_v54 = vsel %vm143_vm0, %v6822_v43, 0.0 }
 0xbcc   :  { %1105 = vadd.xlane.f32.xlu0 %v1104_v54 }
 0xbd9   :  { %1188 = vrot.lane.b32.xlu1 %v7383_v41, %s7128_s10 }
 0xbdd   :  { %1190 = vrot.lane.b32.xlu1 %v7381_v39, %s7128_s10 }
 0xbe1   :  { %1186 = vrot.lane.b32.xlu1 %v7381_v39, %s7129_s6 }
 0xbe2   :  { %1125 = vrot.lane.b32.xlu0 %v7381_v39, %s7127_s2 }
 0xbe6   :  { %1184 = vrot.lane.b32.xlu0 %v7383_v41, %s7129_s6 }
 0xc51   :  { %v1109_v55 = vpop.xlane.xlu1 %1108 }
 0xc55   :  { %v1112_v56 = vpop.xlane.xlu0 %1111  ;;  %v1103_v57 = vpop.xlane.xlu1 %1102 }
 0xc56   :  { %6823 = vrcp.f32 %v1112_v56 }
 0xc57   :  { %6825 = vrcp.f32 %v1103_v57 }
 0xc58   :  { %6827 = vrcp.f32 %v1109_v55 }
 0xc59   :  { %v1106_v0 = vpop.xlane.xlu0 %1105  ;;  %v1189_v1 = vpop.permute.xlu1 %1188 }
 0xc5a   :  { %6829 = vrcp.f32 %v1106_v0  ;;  %v1199_v25 = vsel %vm231_vm1, %v1189_v1, 0 }
 0xc5d   :  { %v1126_v35 = vpop.permute.xlu0 %1125  ;;  %v1191_v28 = vpop.permute.xlu1 %1190 }
 0xc5e   :  { %6135 = vmatprep.subr.bf16.mxu1 %v1126_v35  ;;  %v1202_v29 = vsel %vm231_vm1, %v1191_v28, 0 }
 0xc5f   :  { %6136 = vmatpush3.bf16.msra.mxu1 %v1126_v35 }
 0xc60   :  { %6439 = vmatprep.subr.msk.bf16.mxu1 %vm231_vm1, %v1189_v1  ;;  %v6824_v2 = vpop.eup %6823 }
 0xc61   :  { %v6826_v3 = vpop.eup %6825  ;;  %v1120_v7 = vmul.f32 %v6824_v2, %v6820_v38  ;;  %v1185_v24 = vpop.permute.xlu0 %1184 }
 0xc62   :  { %v6828_v4 = vpop.eup %6827  ;;  %v1117_v8 = vmul.f32 %v6826_v3, %v6818_v37  ;;  %v1187_v30 = vpop.permute.xlu1 %1186 }
 0xc63   :  { %v1119_v11 = vmul.f32 %v6828_v4, %v6816_v34 }
 0xc64   :  { %v6830_v5 = vpop.eup %6829 }
 0xc65   :  { %v1118_v10 = vmul.f32 %v6830_v5, %v6822_v43  ;;  %v1122_v15 = vpack.c.bf16 %v1120_v7, %v1119_v11 }
 0xc67   :  { %v1121_v14 = vpack.c.bf16 %v1118_v10, %v1117_v8 }
 0xc69   :  { %6137 = vmatprep.mubr.msk.bf16.mxu1 %vm143_vm0, %v1121_v14 }
 0xc6a   :  { %6138 = vmatmul.mubr.msk.bf16.vlgmr.msra.gmra.mrb[28].mxu1 %vm143_vm0, %v1122_v15 }
 0xc6b   :  { %6142 = vmatpush3.bf16.xpose.msra.mxu1 %v1199_v25  ;;  %6145 = vmatprep.mubr.msk.bf16.mxu1 %vm231_vm1, %v1185_v24 }
 0xc6c   :  { %6440 = vmatprep.subr.msk.bf16.mxu1 %vm231_vm1, %v1191_v28 }
 0xc73   :  { %6144 = vmatpush3.bf16.xpose.msra.mxu1 %v1202_v29 }
 0xc7a   :  { %6146 = vmatmul.mubr.msk.bf16.vlgmr.msra.gmra.mrb[32].mxu1 %vm231_vm1, %v1187_v30 }
 0xd3d   :  { %v7573_v31 = vpop.f32.mrb[28].mxu1 }
 0xd3e   :  { %v7575_v32 = vpop.f32.mrb[29].mxu1 }
 0xd3f   :  { %v7577_v33 = vpop.f32.mrb[30].mxu1 }
 0xd40   :  { %v7579_v34 = vpop.f32.mrb[31].mxu1 }
 0xd4d   :  { %v6147_v36 = vpop.f32.mrb[32].mxu1 }
 0xd4e   :  { %v1238_v37 = vpop.f32.mrb[33].mxu1  ;;  %v1255_v43 = vmul.f32 0.35355338, %v6147_v36 }
 0xd4f   :  { %v1253_v38 = vmul.f32 0.35355338, %v1238_v37  ;;  %v6148_v40 = vpop.f32.mrb[34].mxu1 }
 0xd50   :  { %v1241_v42 = vpop.f32.mrb[35].mxu1  ;;  %v1256_v57 = vmul.f32 0.35355338, %v6148_v40  ;;  %v1263_v0 = vsel %vm143_vm0, %v1255_v43, -inf }
 0xd51   :  { %v1254_v54 = vmul.f32 0.35355338, %v1241_v42  ;;  %v1257_v55 = vsel %vm143_vm0, %v1253_v38, -inf }
 0xd52   :  { %1258 = vmax.xlane.f32.xlu0 %v1257_v55  ;;  %v1266_v35 = vsel %vm143_vm0, %v1256_v57, -inf }
 0xd53   :  { %v1260_v56 = vsel %vm143_vm0, %v1254_v54, -inf }
 0xd54   :  { %1261 = vmax.xlane.f32.xlu1 %v1260_v56 }
 0xd56   :  { %1264 = vmax.xlane.f32.xlu0 %v1263_v0 }
 0xd5a   :  { %1267 = vmax.xlane.f32.xlu0 %v1266_v35 }
 0xd65   :  { %1303 = vrot.lane.b32.xlu1 %v7383_v41, %s7130_s1 }
 0xddf   :  { %v1259_v1 = vpop.xlane.xlu0 %1258 }
 0xde0   :  { %v1269_v3 = vsub.f32 %v1253_v38, %v1259_v1 }
 0xde1   :  { %v1262_v2 = vpop.xlane.xlu1 %1261 }
 0xde2   :  { %v1273_v8 = vmul.f32 1.442695, %v1269_v3  ;;  %v1270_v10 = vsub.f32 %v1254_v54, %v1262_v2 }
 0xde3   :  { %v1265_v4 = vpop.xlane.xlu0 %1264 }
 0xde4   :  { %v1271_v5 = vsub.f32 %v1255_v43, %v1265_v4  ;;  %v1275_v24 = vmul.f32 1.442695, %v1270_v10 }
 0xde5   :  { %v1304_v7 = vpop.permute.xlu1 %1303 }
 0xde6   :  { %v1277_v11 = vmul.f32 1.442695, %v1271_v5  ;;  %6149 = vmatprep.subr.bf16.mxu0 %v1304_v7 }
 0xde7   :  { %v1268_v14 = vpop.xlane.xlu0 %1267  ;;  %6150 = vmatpush3.bf16.msra.mxu0 %v1304_v7 }
 0xde8   :  { %6831 = vpow2.f32 %v1277_v11  ;;  %v1272_v15 = vsub.f32 %v1256_v57, %v1268_v14 }
 0xde9   :  { %6833 = vpow2.f32 %v1273_v8 }
 0xdea   :  { %v1279_v25 = vmul.f32 1.442695, %v1272_v15 }
 0xdec   :  { %6835 = vpow2.f32 %v1279_v25 }
 0xded   :  { %6837 = vpow2.f32 %v1275_v24 }
 0xdf2   :  { %v6832_v28 = vpop.eup %6831 }
 0xdf3   :  { %v1287_v29 = vsel %vm143_vm0, %v6832_v28, 0.0  ;;  %v6834_v30 = vpop.eup %6833 }
 0xdf4   :  { %1288 = vadd.xlane.f32.xlu1 %v1287_v29  ;;  %v1281_v38 = vsel %vm143_vm0, %v6834_v30, 0.0 }
 0xdf6   :  { %v6836_v36 = vpop.eup %6835 }
 0xdf7   :  { %v1290_v37 = vsel %vm143_vm0, %v6836_v36, 0.0  ;;  %v6838_v40 = vpop.eup %6837 }
 0xdf8   :  { %1291 = vadd.xlane.f32.xlu0 %v1290_v37  ;;  %1282 = vadd.xlane.f32.xlu1 %v1281_v38  ;;  %v1284_v42 = vsel %vm143_vm0, %v6838_v40, 0.0 }
 0xdfc   :  { %1285 = vadd.xlane.f32.xlu0 %v1284_v42 }
 0xe09   :  { %1368 = vrot.lane.b32.xlu1 %v7383_v41, %s7131_s27 }
 0xe0d   :  { %1370 = vrot.lane.b32.xlu1 %v7381_v39, %s7131_s27 }
 0xe11   :  { %1366 = vrot.lane.b32.xlu1 %v7381_v39, %s7132_s7 }
 0xe12   :  { %1305 = vrot.lane.b32.xlu0 %v7381_v39, %s7130_s1 }
 0xe16   :  { %1364 = vrot.lane.b32.xlu0 %v7383_v41, %s7132_s7 }
 0xe81   :  { %v1289_v43 = vpop.xlane.xlu1 %1288 }
 0xe85   :  { %v1292_v54 = vpop.xlane.xlu0 %1291  ;;  %v1283_v55 = vpop.xlane.xlu1 %1282 }
 0xe86   :  { %6839 = vrcp.f32 %v1292_v54 }
 0xe87   :  { %6841 = vrcp.f32 %v1283_v55 }
 0xe88   :  { %6843 = vrcp.f32 %v1289_v43 }
 0xe89   :  { %v1286_v56 = vpop.xlane.xlu0 %1285  ;;  %v1369_v0 = vpop.permute.xlu1 %1368 }
 0xe8a   :  { %6845 = vrcp.f32 %v1286_v56  ;;  %v1379_v15 = vsel %vm231_vm1, %v1369_v0, 0 }
 0xe8d   :  { %v1306_v57 = vpop.permute.xlu0 %1305  ;;  %v1371_v24 = vpop.permute.xlu1 %1370 }
 0xe8e   :  { %6151 = vmatprep.subr.bf16.mxu0 %v1306_v57  ;;  %v1382_v25 = vsel %vm231_vm1, %v1371_v24, 0 }
 0xe8f   :  { %6152 = vmatpush3.bf16.msra.mxu0 %v1306_v57 }
 0xe90   :  { %6441 = vmatprep.subr.msk.bf16.mxu0 %vm231_vm1, %v1369_v0  ;;  %v6840_v35 = vpop.eup %6839 }
 0xe91   :  { %v6842_v1 = vpop.eup %6841  ;;  %v1300_v4 = vmul.f32 %v6840_v35, %v6836_v36  ;;  %v1365_v14 = vpop.permute.xlu0 %1364 }
 0xe92   :  { %v6844_v2 = vpop.eup %6843  ;;  %v1297_v5 = vmul.f32 %v6842_v1, %v6834_v30  ;;  %v1367_v29 = vpop.permute.xlu1 %1366 }
 0xe93   :  { %v1299_v8 = vmul.f32 %v6844_v2, %v6832_v28 }
 0xe94   :  { %v6846_v3 = vpop.eup %6845 }
 0xe95   :  { %v1298_v7 = vmul.f32 %v6846_v3, %v6838_v40  ;;  %v1302_v11 = vpack.c.bf16 %v1300_v4, %v1299_v8 }
 0xe97   :  { %v1301_v10 = vpack.c.bf16 %v1298_v7, %v1297_v5 }
 0xe99   :  { %6153 = vmatprep.mubr.msk.bf16.mxu0 %vm143_vm0, %v1301_v10 }
 0xe9a   :  { %6154 = vmatmul.mubr.msk.bf16.vlgmr.msra.gmra.mrb[16].mxu0 %vm143_vm0, %v1302_v11 }
 0xe9b   :  { %6158 = vmatpush3.bf16.xpose.msra.mxu0 %v1379_v15  ;;  %6161 = vmatprep.mubr.msk.bf16.mxu0 %vm231_vm1, %v1365_v14 }
 0xe9c   :  { %6442 = vmatprep.subr.msk.bf16.mxu0 %vm231_vm1, %v1371_v24 }
 0xea3   :  { %6160 = vmatpush3.bf16.xpose.msra.mxu0 %v1382_v25 }
 0xeaa   :  { %6162 = vmatmul.mubr.msk.bf16.vlgmr.msra.gmra.mrb[20].mxu0 %vm231_vm1, %v1367_v29 }
 0xf6d   :  { %v7609_v28 = vpop.f32.mrb[16].mxu0 }
 0xf6e   :  { %v7611_v30 = vpop.f32.mrb[17].mxu0 }
 0xf6f   :  { %v7613_v36 = vpop.f32.mrb[18].mxu0 }
 0xf70   :  { %v6514_v37 = vpack.i.bf16 %v7613_v36, %v7609_v28  ;;  %v7617_v38 = vpop.f32.mrb[19].mxu0 }
 0xf71   :  { %v6509_v40 = vpack.i.bf16 %v7617_v38, %v7611_v30 }
 0xf7d   :  { %v6163_v42 = vpop.f32.mrb[20].mxu0 }
 0xf7e   :  { %v1418_v43 = vpop.f32.mrb[21].mxu0  ;;  %v1435_v57 = vmul.f32 0.35355338, %v6163_v42 }
 0xf7f   :  { %v1433_v54 = vmul.f32 0.35355338, %v1418_v43  ;;  %v6164_v55 = vpop.f32.mrb[22].mxu0 }
 0xf80   :  { %v1421_v56 = vpop.f32.mrb[23].mxu0  ;;  %v1436_v2 = vmul.f32 0.35355338, %v6164_v55  ;;  %v1443_v3 = vsel %vm143_vm0, %v1435_v57, -inf }
 0xf81   :  { %v1434_v0 = vmul.f32 0.35355338, %v1421_v56  ;;  %v1437_v35 = vsel %vm143_vm0, %v1433_v54, -inf }
 0xf82   :  { %1438 = vmax.xlane.f32.xlu0 %v1437_v35  ;;  %v1446_v4 = vsel %vm143_vm0, %v1436_v2, -inf }
 0xf83   :  { %v1440_v1 = vsel %vm143_vm0, %v1434_v0, -inf }
 0xf84   :  { %1441 = vmax.xlane.f32.xlu1 %v1440_v1 }
 0xf86   :  { %1444 = vmax.xlane.f32.xlu0 %v1443_v3 }
 0xf8a   :  { %1447 = vmax.xlane.f32.xlu0 %v1446_v4 }
 0xf95   :  { %1483 = vrot.lane.b32.xlu1 %v7383_v41, %s8920_s28 }
0x100f   :  { %v1439_v5 = vpop.xlane.xlu0 %1438 }
0x1010   :  { %v1449_v8 = vsub.f32 %v1433_v54, %v1439_v5 }
0x1011   :  { %v1442_v7 = vpop.xlane.xlu1 %1441 }
0x1012   :  { %v1453_v15 = vmul.f32 1.442695, %v1449_v8  ;;  %v1450_v24 = vsub.f32 %v1434_v0, %v1442_v7 }
0x1013   :  { %v1445_v10 = vpop.xlane.xlu0 %1444 }
0x1014   :  { %v1451_v11 = vsub.f32 %v1435_v57, %v1445_v10  ;;  %v1455_v43 = vmul.f32 1.442695, %v1450_v24 }
0x1015   :  { %v1484_v14 = vpop.permute.xlu1 %1483 }
0x1016   :  { %v1457_v25 = vmul.f32 1.442695, %v1451_v11  ;;  %6165 = vmatprep.subr.bf16.mxu1 %v1484_v14 }
0x1017   :  { %v1448_v29 = vpop.xlane.xlu0 %1447  ;;  %6166 = vmatpush3.bf16.msra.mxu1 %v1484_v14 }
0x1018   :  { %6847 = vpow2.f32 %v1457_v25  ;;  %v1452_v42 = vsub.f32 %v1436_v2, %v1448_v29 }
0x1019   :  { %6849 = vpow2.f32 %v1453_v15 }
0x101a   :  { %v1459_v55 = vmul.f32 1.442695, %v1452_v42 }
0x101c   :  { %6851 = vpow2.f32 %v1459_v55 }
0x101d   :  { %6853 = vpow2.f32 %v1455_v43 }
0x1022   :  { %v6848_v56 = vpop.eup %6847 }
0x1023   :  { %v1467_v35 = vsel %vm143_vm0, %v6848_v56, 0.0  ;;  %v6850_v54 = vpop.eup %6849 }
0x1024   :  { %1468 = vadd.xlane.f32.xlu1 %v1467_v35  ;;  %v1461_v0 = vsel %vm143_vm0, %v6850_v54, 0.0 }
0x1026   :  { %v6852_v57 = vpop.eup %6851 }
0x1027   :  { %v1470_v1 = vsel %vm143_vm0, %v6852_v57, 0.0  ;;  %v6854_v3 = vpop.eup %6853 }
0x1028   :  { %1471 = vadd.xlane.f32.xlu0 %v1470_v1  ;;  %1462 = vadd.xlane.f32.xlu1 %v1461_v0  ;;  %v1464_v2 = vsel %vm143_vm0, %v6854_v3, 0.0 }
0x102c   :  { %1465 = vadd.xlane.f32.xlu0 %v1464_v2 }
0x1039   :  { %1548 = vrot.lane.b32.xlu1 %v7383_v41, %s8918_s8 }
0x103d   :  { %1550 = vrot.lane.b32.xlu1 %v7381_v39, %s8918_s8  ;;  %s8943_s8 = sld [smem:[#allocation18_spill]] }
0x1041   :  { %1546 = vrot.lane.b32.xlu1 %v7381_v39, %s8916_s4 }
0x1042   :  { %1485 = vrot.lane.b32.xlu0 %v7381_v39, %s8920_s28 }
0x1046   :  { %1544 = vrot.lane.b32.xlu0 %v7383_v41, %s8916_s4  ;;  %s8942_s4 = sld [smem:[#allocation17_spill]] }
0x10b1   :  { %v1469_v4 = vpop.xlane.xlu1 %1468 }
0x10b5   :  { %v1472_v5 = vpop.xlane.xlu0 %1471  ;;  %v1463_v7 = vpop.xlane.xlu1 %1462 }
0x10b6   :  { %6855 = vrcp.f32 %v1472_v5 }
0x10b7   :  { %6857 = vrcp.f32 %v1463_v7 }
0x10b8   :  { %6859 = vrcp.f32 %v1469_v4 }
0x10b9   :  { %v1466_v8 = vpop.xlane.xlu0 %1465  ;;  %v1549_v11 = vpop.permute.xlu1 %1548 }
0x10ba   :  { %6861 = vrcp.f32 %v1466_v8  ;;  %v1559_v2 = vsel %vm231_vm1, %v1549_v11, 0 }
0x10bd   :  { %v1486_v10 = vpop.permute.xlu0 %1485  ;;  %v1551_v4 = vpop.permute.xlu1 %1550 }
0x10be   :  { %6167 = vmatprep.subr.bf16.mxu1 %v1486_v10 }
0x10bf   :  { %6168 = vmatpush3.bf16.msra.mxu1 %v1486_v10 }
0x10c0   :  { %6443 = vmatprep.subr.msk.bf16.mxu1 %vm231_vm1, %v1549_v11  ;;  %v6856_v14 = vpop.eup %6855 }
0x10c1   :  { %v6858_v15 = vpop.eup %6857  ;;  %v1480_v29 = vmul.f32 %v6856_v14, %v6852_v57  ;;  %v1545_v0 = vpop.permute.xlu0 %1544  ;;  %v1562_v57 = vsel %vm231_vm1, %v1551_v4, 0 }
0x10c2   :  { %v6860_v24 = vpop.eup %6859  ;;  %v1477_v42 = vmul.f32 %v6858_v15, %v6850_v54  ;;  %v1547_v54 = vpop.permute.xlu1 %1546 }
0x10c3   :  { %v1479_v55 = vmul.f32 %v6860_v24, %v6848_v56 }
0x10c4   :  { %v6862_v25 = vpop.eup %6861 }
0x10c5   :  { %v1478_v43 = vmul.f32 %v6862_v25, %v6854_v3  ;;  %v1482_v1 = vpack.c.bf16 %v1480_v29, %v1479_v55 }
0x10c7   :  { %v1481_v35 = vpack.c.bf16 %v1478_v43, %v1477_v42 }
0x10c9   :  { %6169 = vmatprep.mubr.msk.bf16.mxu1 %vm143_vm0, %v1481_v35 }
0x10ca   :  { %6170 = vmatmul.mubr.msk.bf16.vlgmr.msra.gmra.mrb[36].mxu1 %vm143_vm0, %v1482_v1 }
0x10cb   :  { %6174 = vmatpush3.bf16.xpose.msra.mxu1 %v1559_v2  ;;  %6177 = vmatprep.mubr.msk.bf16.mxu1 %vm231_vm1, %v1545_v0 }
0x10cc   :  { %6444 = vmatprep.subr.msk.bf16.mxu1 %vm231_vm1, %v1551_v4 }
0x10d3   :  { %6176 = vmatpush3.bf16.xpose.msra.mxu1 %v1562_v57 }
0x10da   :  { %6178 = vmatmul.mubr.msk.bf16.vlgmr.msra.gmra.mrb[40].mxu1 %vm231_vm1, %v1547_v54 }
0x119d   :  { %v7649_v56 = vpop.f32.mrb[36].mxu1 }
0x119e   :  { %v7651_v3 = vpop.f32.mrb[37].mxu1 }
0x119f   :  { %v7653_v5 = vpop.f32.mrb[38].mxu1 }
0x11a0   :  { %v6524_v7 = vpack.i.bf16 %v7653_v5, %v7649_v56  ;;  %v7657_v8 = vpop.f32.mrb[39].mxu1 }
0x11a1   :  { %v6519_v10 = vpack.i.bf16 %v7657_v8, %v7651_v3 }
0x11ad   :  { %v6179_v11 = vpop.f32.mrb[40].mxu1 }
0x11ae   :  { %v1598_v14 = vpop.f32.mrb[41].mxu1  ;;  %v1615_v29 = vmul.f32 0.35355338, %v6179_v11 }
0x11af   :  { %v1613_v15 = vmul.f32 0.35355338, %v1598_v14  ;;  %v6180_v24 = vpop.f32.mrb[42].mxu1 }
0x11b0   :  { %v1601_v25 = vpop.f32.mrb[43].mxu1  ;;  %v1616_v35 = vmul.f32 0.35355338, %v6180_v24  ;;  %v1623_v1 = vsel %vm143_vm0, %v1615_v29, -inf }
0x11b1   :  { %v1614_v42 = vmul.f32 0.35355338, %v1601_v25  ;;  %v1617_v43 = vsel %vm143_vm0, %v1613_v15, -inf }
0x11b2   :  { %1618 = vmax.xlane.f32.xlu0 %v1617_v43  ;;  %v1626_v0 = vsel %vm143_vm0, %v1616_v35, -inf }
0x11b3   :  { %v1620_v55 = vsel %vm143_vm0, %v1614_v42, -inf }
0x11b4   :  { %1621 = vmax.xlane.f32.xlu1 %v1620_v55 }
0x11b6   :  { %1624 = vmax.xlane.f32.xlu0 %v1623_v1 }
0x11ba   :  { %1627 = vmax.xlane.f32.xlu0 %v1626_v0 }
0x11c5   :  { %1663 = vrot.lane.b32.xlu1 %v7383_v41, %s8908_s29 }
0x11c9   :  { %6480 = vrot.lane.b32.xlu1 %v6479_v63, %s8914_s5 }
0x11cd   :  { %6485 = vrot.lane.b32.xlu1 %v6484_v61, %s8914_s5 }
0x11d0   :  { %1665 = vrot.lane.b32.xlu0 %v7381_v39, %s8908_s29  ;;  %s8936_s29 = sld [smem:[#allocation11_spill]] }
0x11d6   :  { %v6601_v16 = vld [vmem:[%s8936_s29] sm:$0xff]  }
0x123f   :  { %v1619_v2 = vpop.xlane.xlu0 %1618 }
0x1240   :  { %v1629_v57 = vsub.f32 %v1613_v15, %v1619_v2 }
0x1241   :  { %v1622_v4 = vpop.xlane.xlu1 %1621 }
0x1242   :  { %v1633_v41 = vmul.f32 1.442695, %v1629_v57  ;;  %v1630_v24 = vsub.f32 %v1614_v42, %v1622_v4 }
0x1243   :  { %v1625_v54 = vpop.xlane.xlu0 %1624 }
0x1244   :  { %v1631_v11 = vsub.f32 %v1615_v29, %v1625_v54  ;;  %v1635_v58 = vmul.f32 1.442695, %v1630_v24 }
0x1245   :  { %v1664_v14 = vpop.permute.xlu1 %1663 }
0x1246   :  { %v1637_v25 = vmul.f32 1.442695, %v1631_v11  ;;  %6181 = vmatprep.subr.bf16.mxu0 %v1664_v14 }
0x1247   :  { %v1628_v59 = vpop.xlane.xlu0 %1627  ;;  %6182 = vmatpush3.bf16.msra.mxu0 %v1664_v14 }
0x1248   :  { %6863 = vpow2.f32 %v1637_v25  ;;  %v1632_v62 = vsub.f32 %v1616_v35, %v1628_v59 }
0x1249   :  { %6865 = vpow2.f32 %v1633_v41  ;;  %v6481_v17 = vpop.permute.xlu1 %6480 }
0x124a   :  { %v1639_v60 = vmul.f32 1.442695, %v1632_v62  ;;  %v6483_v28 = vunpack.i.h.bf16 %v6481_v17  ;;  %v6482_v30 = vunpack.i.l.bf16 %v6481_v17 }
0x124b   :  { %v1666_v61 = vpop.permute.xlu0 %1665 }
0x124c   :  { %6867 = vpow2.f32 %v1639_v60  ;;  %6183 = vmatprep.subr.bf16.mxu0 %v1666_v61 }
0x124d   :  { %6184 = vmatpush3.bf16.msra.mxu0 %v1666_v61  ;;  %6869 = vpow2.f32 %v1635_v58  ;;  %v6486_v18 = vpop.permute.xlu1 %6485 }
0x124e   :  { %6189 = vmatprep.subr.bf16.mxu0 %v6601_v16  ;;  %v6488_v46 = vunpack.i.h.bf16 %v6486_v18 }
0x1250   :  { %v995_v38 = vsel %vm231_vm1, %v7423_v50, %v6488_v46  ;;  %v993_v50 = vsel %vm231_vm1, %v7425_v51, %v6483_v28 }
0x1252   :  { %v7677_v39 = vpop.eup %6863 }
0x1253   :  { %v1647_v63 = vsel %vm143_vm0, %v7677_v39, 0.0  ;;  %v7681_v15 = vpop.eup %6865 }
0x1254   :  { %1648 = vadd.xlane.f32.xlu1 %v1647_v63  ;;  %v1641_v43 = vsel %vm143_vm0, %v7681_v15, 0.0 }
0x1256   :  { %v7683_v29 = vpop.eup %6867 }
0x1257   :  { %v1650_v42 = vsel %vm143_vm0, %v7683_v29, 0.0  ;;  %v7689_v55 = vpop.eup %6869 }
0x1258   :  { %1651 = vadd.xlane.f32.xlu0 %v1650_v42  ;;  %1642 = vadd.xlane.f32.xlu1 %v1641_v43  ;;  %v1644_v35 = vsel %vm143_vm0, %v7689_v55, 0.0 }
0x125c   :  { %1645 = vadd.xlane.f32.xlu0 %v1644_v35  ;;  %v6602_v35 = vld [vmem:[%s8936_s29 + $0x8] sm:$0xff]   ;;  %s8939_s29 = sld [smem:[#allocation13_spill]] }
0x1269   :  { %6495 = vrot.lane.b32.xlu1 %v6494_v19, %s8912_s9 }
0x126d   :  { %6505 = vrot.lane.b32.xlu1 %v6504_v47, %s8910_s30  ;;  %v6487_v47 = vunpack.i.l.bf16 %v6486_v18 }
0x1271   :  { %6515 = vrot.lane.b32.xlu1 %v6514_v37, %s8914_s5 }
0x1272   :  { %6490 = vrot.lane.b32.xlu0 %v6489_v22, %s8912_s9 }
0x1276   :  { %6500 = vrot.lane.b32.xlu0 %v6499_v53, %s8910_s30 }
0x127a   :  { %6510 = vrot.lane.b32.xlu0 %v6509_v40, %s8914_s5  ;;  %v994_v40 = vsel %vm231_vm1, %v7419_v48, %v6487_v47  ;;  %v992_v48 = vsel %vm231_vm1, %v7421_v49, %v6482_v30  ;;  %s8940_s5 = sld [smem:[#allocation14_spill]] }
0x127e   :  { %6520 = vrot.lane.b32.xlu0 %v6519_v10, %s8912_s9 }
0x1282   :  { %6525 = vrot.lane.b32.xlu0 %v6524_v7, %s8912_s9  ;;  %s8946_s9 = smov 104  }
0x12e1   :  { %v1649_v19 = vpop.xlane.xlu1 %1648 }
0x12e5   :  { %v1652_v21 = vpop.xlane.xlu0 %1651  ;;  %v1643_v22 = vpop.xlane.xlu1 %1642 }
0x12e6   :  { %6871 = vrcp.f32 %v1652_v21 }
0x12e7   :  { %6873 = vrcp.f32 %v1643_v22 }
0x12e8   :  { %6875 = vrcp.f32 %v1649_v19 }
0x12e9   :  { %v1646_v44 = vpop.xlane.xlu0 %1645  ;;  %v6496_v45 = vpop.permute.xlu1 %6495 }
0x12ea   :  { %6877 = vrcp.f32 %v1646_v44  ;;  %v6498_v52 = vunpack.i.h.bf16 %v6496_v45  ;;  %v6497_v53 = vunpack.i.l.bf16 %v6496_v45 }
0x12ec   :  { %v999_v5 = vsel %vm996_vm2, %v994_v40, %v6497_v53  ;;  %v1000_v7 = vsel %vm996_vm2, %v995_v38, %v6498_v52 }
0x12ed   :  { %v6491_v36 = vpop.permute.xlu0 %6490  ;;  %v6506_v37 = vpop.permute.xlu1 %6505 }
0x12ee   :  { %v6508_v56 = vunpack.i.h.bf16 %v6506_v37  ;;  %v6507_v3 = vunpack.i.l.bf16 %v6506_v37  ;;  %v6493_v8 = vunpack.i.h.bf16 %v6491_v36  ;;  %v6492_v10 = vunpack.i.l.bf16 %v6491_v36 }
0x12f0   :  { %v1004_v1 = vsel %vm1001_vm3, %v999_v5, %v6507_v3  ;;  %v1005_v0 = vsel %vm1001_vm3, %v1000_v7, %v6508_v56  ;;  %v6872_v2 = vpop.eup %6871  ;;  %v997_v24 = vsel %vm996_vm2, %v992_v48, %v6492_v10  ;;  %v998_v25 = vsel %vm996_vm2, %v993_v50, %v6493_v8 }
0x12f1   :  { %v1785_v4 = vpack.c.bf16 %v1005_v0, %v1004_v1  ;;  %v6501_v57 = vpop.permute.xlu0 %6500  ;;  %v6874_v54 = vpop.eup %6873  ;;  %v1660_v62 = vmul.f32 %v6872_v2, %v7683_v29 }
0x12f2   :  { %v6503_v11 = vunpack.i.h.bf16 %v6501_v57  ;;  %v6502_v14 = vunpack.i.l.bf16 %v6501_v57  ;;  %v6876_v41 = vpop.eup %6875  ;;  %v1657_v61 = vmul.f32 %v6874_v54, %v7681_v15 }
0x12f3   :  { %v1659_v49 = vmul.f32 %v6876_v41, %v7677_v39 }
0x12f4   :  { %v6878_v59 = vpop.eup %6877  ;;  %v1002_v58 = vsel %vm1001_vm3, %v997_v24, %v6502_v14  ;;  %v1003_v60 = vsel %vm1001_vm3, %v998_v25, %v6503_v11 }
0x12f5   :  { %v1658_v51 = vmul.f32 %v6878_v59, %v7689_v55  ;;  %v1784_v63 = vpack.c.bf16 %v1003_v60, %v1002_v58  ;;  %v1662_v43 = vpack.c.bf16 %v1660_v62, %v1659_v49  ;;  %v6511_v0 = vpop.permute.xlu0 %6510 }
0x12f6   :  { %v6513_v57 = vunpack.i.h.bf16 %v6511_v0  ;;  %v6512_v54 = vunpack.i.l.bf16 %v6511_v0 }
0x12f7   :  { %v1661_v42 = vpack.c.bf16 %v1658_v51, %v1657_v61 }
0x12f8   :  { %v1773_v14 = vsel %vm231_vm1, %v7579_v34, %v6513_v57  ;;  %v1772_v41 = vsel %vm231_vm1, %v7575_v32, %v6512_v54 }
0x12f9   :  { %6185 = vmatprep.mubr.msk.bf16.mxu0 %vm143_vm0, %v1661_v42  ;;  %v6521_v2 = vpop.permute.xlu0 %6520 }
0x12fa   :  { %6186 = vmatmul.mubr.msk.bf16.vlgmr.msra.gmra.mrb[24].mxu0 %vm143_vm0, %v1662_v43  ;;  %v6523_v50 = vunpack.i.h.bf16 %v6521_v2  ;;  %v6522_v48 = vunpack.i.l.bf16 %v6521_v2 }
0x12fb   :  { %6190 = vmatpush3.bf16.msra.mxu0 %v6601_v16  ;;  %6193 = vmatprep.mubr.msk.bf16.mxu0 %vm143_vm0, %v1784_v63  ;;  %v7759_v16 = vld [vmem:[%s8937_s3] ss:$0 sm:$0xff]  ;;  %s8938_s3 = sld [smem:[#allocation15_spill]] }
0x12fc   :  { %6191 = vmatprep.subr.bf16.mxu0 %v6602_v35  ;;  %v1776_v59 = vsel %vm996_vm2, %v1772_v41, %v6522_v48  ;;  %v1777_v62 = vsel %vm996_vm2, %v1773_v14, %v6523_v50 }
0x12fd   :  { %v6526_v51 = vpop.permute.xlu0 %6525 }
0x12fe   :  { %v6528_v43 = vunpack.i.h.bf16 %v6526_v51  ;;  %v6527_v32 = vunpack.i.l.bf16 %v6526_v51 }
0x12ff   :  { %6192 = vmatpush3.bf16.msra.mxu0 %v6602_v35 }
0x1301   :  { %v6603_v10 = vld [vmem:[%s8938_s3] sm:$0xff]   ;;  %v6604_v1 = vld [vmem:[%s8938_s3 + $0x8] sm:$0xff]   ;;  %s7140_s3 = smov [#allocation5]  }
0x1302   :  { %6194 = vmatmul.mubr.msk.bf16.vlgmr.msra.gmra.mrb[28].mxu0 %vm143_vm0, %v1785_v4  ;;  %6201 = vmatprep.subr.bf16.mxu1 %v6603_v10  ;;  %v6516_v4 = vpop.permute.xlu1 %6515 }
0x1303   :  { %6202 = vmatpush3.bf16.msra.mxu1 %v6603_v10  ;;  %v6518_v34 = vunpack.i.h.bf16 %v6516_v4  ;;  %v6517_v42 = vunpack.i.l.bf16 %v6516_v4 }
0x1304   :  { %6203 = vmatprep.subr.bf16.mxu1 %v6604_v1 }
0x1307   :  { %6204 = vmatpush3.bf16.msra.mxu1 %v6604_v1 }
0x13cd   :  { %v6187_v15 = vpop.f32.mrb[24].mxu0 }
0x13ce   :  { %v1709_v29 = vpop.f32.mrb[25].mxu0 }
0x13cf   :  { %v6188_v39 = vpop.f32.mrb[26].mxu0 }
0x13d0   :  { %v6534_v55 = vpack.i.bf16 %v6188_v39, %v6187_v15  ;;  %v1712_v17 = vpop.f32.mrb[27].mxu0  ;;  %v1775_v15 = vsel %vm231_vm1, %v7577_v33, %v6518_v34 }
0x13d1   :  { %v6529_v18 = vpack.i.bf16 %v1712_v17, %v1709_v29  ;;  %v1774_v29 = vsel %vm231_vm1, %v7573_v31, %v6517_v42 }
0x13d2   :  { %v1778_v17 = vsel %vm996_vm2, %v1774_v29, %v6527_v32 }
0x13d3   :  { %6530 = vrot.lane.b32.xlu1 %v6529_v18, %s8910_s30  ;;  %v1779_v18 = vsel %vm996_vm2, %v1775_v15, %v6528_v43 }
0x13d5   :  { %v6195_v19 = vpop.f32.mrb[28].mxu0 }
0x13d6   :  { %v1857_v21 = vpop.f32.mrb[29].mxu0  ;;  %v1866_v30 = vadd.f32 %v6195_v19, %v7759_v16 }
0x13d7   :  { %v6196_v22 = vpop.f32.mrb[30].mxu0  ;;  %v1858_v37 = vadd.f32 %v7759_v16, %v1857_v21 }
0x13d8   :  { %v1869_v44 = vadd.f32 %v6196_v22, %v7759_v16  ;;  %v1860_v45 = vpop.f32.mrb[31].mxu0  ;;  %v7775_v36 = vadd.f32 %v1866_v30, %v7323_v12 }
0x13d9   :  { %v1861_v46 = vadd.f32 %v7759_v16, %v1860_v45 }
0x13da   :  { %v7764_v47 = vadd.f32 %v1869_v44, %v7325_v13  ;;  %v7779_v13 = vadd.f32 %v1858_v37, %v7307_v6  ;;  %v1933_v40 = vmul.f32 %v7775_v36, %v7775_v36 }
0x13db   :  { %v7767_v52 = vadd.f32 %v1861_v46, %v7315_v9  ;;  %v1904_v9 = vsel %vm143_vm0, %v7775_v36, 0.0 }
0x13dc   :  { %v1907_v53 = vsel %vm143_vm0, %v7764_v47, 0.0  ;;  %v1898_v38 = vsel %vm143_vm0, %v7779_v13, 0.0  ;;  %v1945_v12 = vsel %vm143_vm0, %v1933_v40, 0.0  ;;  %v1931_v56 = vmul.f32 %v7779_v13, %v7779_v13 }
0x13dd   :  { %1908 = vadd.xlane.f32.xlu0 %v1907_v53  ;;  %v1901_v28 = vsel %vm143_vm0, %v7767_v52, 0.0  ;;  %v1932_v3 = vmul.f32 %v7767_v52, %v7767_v52  ;;  %v1934_v7 = vmul.f32 %v7764_v47, %v7764_v47 }
0x13de   :  { %v1939_v6 = vsel %vm143_vm0, %v1931_v56, 0.0 }
0x13df   :  { %v1942_v5 = vsel %vm143_vm0, %v1932_v3, 0.0  ;;  %v1948_v8 = vsel %vm143_vm0, %v1934_v7, 0.0 }
0x13e1   :  { %1902 = vadd.xlane.f32.xlu0 %v1901_v28 }
0x13f7   :  { %1905 = vadd.xlane.f32.xlu1 %v1904_v9  ;;  %6535 = vrot.lane.b32.xlu0 %v6534_v55, %s8910_s30  ;;  %s8941_s30 = sld [smem:[#allocation16_spill]] }
0x13fb   :  { %1899 = vadd.xlane.f32.xlu1 %v1898_v38 }
0x13fd   :  { %v6605_v15 = vld [vmem:[%s8941_s30] sm:$0xff]   ;;  %v6606_v29 = vld [vmem:[%s8941_s30 + $0x8] sm:$0xff]  }
0x13fe   :  { %6213 = vmatprep.subr.bf16.mxu0 %v6605_v15 }
0x13ff   :  { %1946 = vadd.xlane.f32.xlu1 %v1945_v12  ;;  %6214 = vmatpush3.bf16.msra.mxu0 %v6605_v15 }
0x1400   :  { %6215 = vmatprep.subr.bf16.mxu0 %v6606_v29 }
0x1403   :  { %1940 = vadd.xlane.f32.xlu1 %v1939_v6  ;;  %6216 = vmatpush3.bf16.msra.mxu0 %v6606_v29 }
0x1407   :  { %1943 = vadd.xlane.f32.xlu1 %v1942_v5 }
0x140b   :  { %1949 = vadd.xlane.f32.xlu1 %v1948_v8 }
0x1445   :  { %v6531_v11 = vpop.permute.xlu1 %6530 }
0x1446   :  { %v6533_v24 = vunpack.i.h.bf16 %v6531_v11  ;;  %v6532_v25 = vunpack.i.l.bf16 %v6531_v11 }
0x1448   :  { %v1781_v58 = vsel %vm1001_vm3, %v1777_v62, %v6533_v24  ;;  %v1780_v60 = vsel %vm1001_vm3, %v1776_v59, %v6532_v25  ;;  %v7828_v59 = vld [vmem:[%s8939_s29] ss:$0 sm:$0xff]  ;;  %s8947_s29 = smov 40  }
0x1449   :  { %v1786_v61 = vpack.c.bf16 %v1781_v58, %v1780_v60 }
0x144b   :  { %6197 = vmatprep.mubr.msk.bf16.mxu0 %vm143_vm0, %v1786_v61 }
0x146a   :  { %v1909_v63 = vpop.xlane.xlu0 %1908 }
0x146b   :  { %v1926_v56 = vmul.f32 0.03125, %v1909_v63 }
0x146d   :  { %v1974_v0 = vmul.f32 %v1926_v56, %v1926_v56  ;;  %v1990_v61 = vsub.f32 %v7764_v47, %v1926_v56 }
0x146e   :  { %v1903_v49 = vpop.xlane.xlu0 %1902 }
0x146f   :  { %v1924_v37 = vmul.f32 0.03125, %v1903_v49 }
0x1471   :  { %v1972_v3 = vmul.f32 %v1924_v37, %v1924_v37  ;;  %v1988_v41 = vsub.f32 %v7767_v52, %v1924_v37  ;;  %v7836_v52 = vld [vmem:[%s8940_s5] ss:$0 sm:$0xff]  ;;  %s8945_s5 = smov 72  }
0x1472   :  { %v6536_v35 = vpop.permute.xlu0 %6535 }
0x1473   :  { %v6538_v39 = vunpack.i.h.bf16 %v6536_v35  ;;  %v6537_v55 = vunpack.i.l.bf16 %v6536_v35 }
0x1475   :  { %v1783_v19 = vsel %vm1001_vm3, %v1779_v18, %v6538_v39  ;;  %v1782_v21 = vsel %vm1001_vm3, %v1778_v17, %v6537_v55  ;;  %v6607_v39 = vld [vmem:[%s8941_s30 + $0x10] sm:$0xff]   ;;  %v6608_v55 = vld [vmem:[%s8941_s30 + $0x18] sm:$0xff]   ;;  %v6609_v17 = vld [vmem:[%s8941_s30 + $0x20] sm:$0xff]  }
0x1476   :  { %v1787_v22 = vpack.c.bf16 %v1783_v19, %v1782_v21  ;;  %6217 = vmatprep.subr.bf16.mxu0 %v6607_v39  ;;  %v6610_v18 = vld [vmem:[%s8941_s30 + $0x28] sm:$0xff]   ;;  %v6611_v19 = vld [vmem:[%s8941_s30 + $0x30] sm:$0xff]   ;;  %v6612_v21 = vld [vmem:[%s8941_s30 + $0x38] sm:$0xff]   ;;  %s8944_s30 = smov 48  }
0x1477   :  { %6218 = vmatpush3.bf16.msra.mxu0 %v6607_v39 }
0x1478   :  { %6198 = vmatmul.mubr.msk.bf16.gmra.mrb[32].mxu0 %vm143_vm0, %v1787_v22  ;;  %6219 = vmatprep.subr.bf16.mxu0 %v6608_v55 }
0x147b   :  { %6220 = vmatpush3.bf16.msra.mxu0 %v6608_v55 }
0x147c   :  { %6221 = vmatprep.subr.bf16.mxu0 %v6609_v17 }
0x147f   :  { %6222 = vmatpush3.bf16.msra.mxu0 %v6609_v17 }
0x1480   :  { %6223 = vmatprep.subr.bf16.mxu0 %v6610_v18 }
0x1483   :  { %6224 = vmatpush3.bf16.msra.mxu0 %v6610_v18 }
0x1484   :  { %v1906_v44 = vpop.xlane.xlu1 %1905  ;;  %6225 = vmatprep.subr.bf16.mxu0 %v6611_v19 }
0x1485   :  { %v1925_v46 = vmul.f32 0.03125, %v1906_v44 }
0x1487   :  { %v1973_v31 = vmul.f32 %v1925_v46, %v1925_v46  ;;  %v1989_v24 = vsub.f32 %v7775_v36, %v1925_v46  ;;  %6226 = vmatpush3.bf16.msra.mxu0 %v6611_v19 }
0x1488   :  { %v1900_v45 = vpop.xlane.xlu1 %1899  ;;  %6227 = vmatprep.subr.bf16.mxu0 %v6612_v21 }
0x1489   :  { %v1923_v53 = vmul.f32 0.03125, %v1900_v45 }
0x148b   :  { %v1971_v9 = vmul.f32 %v1923_v53, %v1923_v53  ;;  %v1987_v50 = vsub.f32 %v7779_v13, %v1923_v53  ;;  %6228 = vmatpush3.bf16.msra.mxu0 %v6612_v21 }
0x148c   :  { %v1947_v33 = vpop.xlane.xlu1 %1946 }
0x148d   :  { %v1965_v28 = vmul.f32 0.03125, %v1947_v33 }
0x148f   :  { %v1981_v38 = vsub.f32 %v1965_v28, %v1973_v31 }
0x1490   :  { %v1941_v30 = vpop.xlane.xlu1 %1940 }
0x1491   :  { %v1963_v40 = vmul.f32 0.03125, %v1941_v30  ;;  %v1997_v5 = vadd.f32 1e-06, %v1981_v38 }
0x1493   :  { %v1979_v12 = vsub.f32 %v1963_v40, %v1971_v9 }
0x1494   :  { %v1944_v6 = vpop.xlane.xlu1 %1943 }
0x1495   :  { %v1995_v7 = vadd.f32 1e-06, %v1979_v12  ;;  %v1964_v8 = vmul.f32 0.03125, %v1944_v6 }
0x1497   :  { %6879 = vrsqrt.f32 %v1995_v7  ;;  %v1980_v10 = vsub.f32 %v1964_v8, %v1972_v3 }
0x1498   :  { %v1950_v1 = vpop.xlane.xlu1 %1949  ;;  %6881 = vrsqrt.f32 %v1997_v5 }
0x1499   :  { %v1996_v2 = vadd.f32 1e-06, %v1980_v10  ;;  %v1966_v4 = vmul.f32 0.03125, %v1950_v1 }
0x149b   :  { %6883 = vrsqrt.f32 %v1996_v2  ;;  %v1982_v57 = vsub.f32 %v1966_v4, %v1974_v0 }
0x149d   :  { %v1998_v54 = vadd.f32 1e-06, %v1982_v57 }
0x149f   :  { %6885 = vrsqrt.f32 %v1998_v54 }
0x14a1   :  { %v6880_v48 = vpop.eup %6879 }
0x14a2   :  { %v2011_v11 = vmul.f32 %v6880_v48, %v1987_v50  ;;  %v6882_v14 = vpop.eup %6881 }
0x14a3   :  { %v2013_v62 = vmul.f32 %v6882_v14, %v1989_v24 }
0x14a4   :  { %v2025_v60 = vmul.f32 %v7828_v59, %v2011_v11 }
0x14a5   :  { %v6884_v25 = vpop.eup %6883  ;;  %v2027_v34 = vmul.f32 %v7828_v59, %v2013_v62 }
0x14a6   :  { %v2012_v58 = vmul.f32 %v6884_v25, %v1988_v41  ;;  %v7839_v63 = vadd.f32 %v7836_v52, %v2025_v60 }
0x14a7   :  { %v7850_v43 = vadd.f32 %v7836_v52, %v2027_v34 }
0x14a8   :  { %v2026_v13 = vmul.f32 %v7828_v59, %v2012_v58 }
0x14a9   :  { %v6886_v51 = vpop.eup %6885 }
0x14aa   :  { %v2014_v36 = vmul.f32 %v6886_v51, %v1990_v61  ;;  %v7842_v49 = vadd.f32 %v7836_v52, %v2026_v13 }
0x14ac   :  { %v2047_v47 = vpack.c.bf16 %v7842_v49, %v7839_v63  ;;  %v2028_v42 = vmul.f32 %v7828_v59, %v2014_v36 }
0x14ae   :  { %6205 = vmatprep.mubr.msk.bf16.mxu1 %vm143_vm0, %v2047_v47  ;;  %v7853_v32 = vadd.f32 %v7836_v52, %v2028_v42 }
0x14b0   :  { %v2048_v35 = vpack.c.bf16 %v7853_v32, %v7850_v43 }
0x14b2   :  { %6206 = vmatmul.mubr.msk.bf16.vlgmr.msra.gmra.mrb[44].mxu1 %vm143_vm0, %v2048_v35 }
0x154b   :  { %v6199_v22 = vpop.f32.mrb[32].mxu0 }
0x154c   :  { %v1882_v44 = vadd.f32 %v6199_v22, %v7759_v16  ;;  %v1873_v45 = vpop.f32.mrb[33].mxu0 }
0x154d   :  { %v1874_v46 = vadd.f32 %v7759_v16, %v1873_v45  ;;  %v6200_v33 = vpop.f32.mrb[34].mxu0 }
0x154e   :  { %v7885_v53 = vadd.f32 %v1882_v44, %v7361_v26  ;;  %v1885_v28 = vadd.f32 %v6200_v33, %v7759_v16  ;;  %v1876_v31 = vpop.f32.mrb[35].mxu0 }
0x154f   :  { %v7889_v30 = vadd.f32 %v1874_v46, %v7345_v20  ;;  %v1877_v26 = vadd.f32 %v7759_v16, %v1876_v31 }
0x1550   :  { %v1916_v37 = vsel %vm143_vm0, %v7885_v53, 0.0  ;;  %v7894_v9 = vadd.f32 %v1885_v28, %v7363_v27  ;;  %v1937_v20 = vmul.f32 %v7885_v53, %v7885_v53 }
0x1551   :  { %1917 = vadd.xlane.f32.xlu0 %v1916_v37  ;;  %v1910_v38 = vsel %vm143_vm0, %v7889_v30, 0.0  ;;  %v1893_v12 = vadd.f32 %v1877_v26, %v7353_v23  ;;  %v1935_v6 = vmul.f32 %v7889_v30, %v7889_v30 }
0x1552   :  { %1911 = vadd.xlane.f32.xlu1 %v1910_v38  ;;  %v1919_v40 = vsel %vm143_vm0, %v7894_v9, 0.0  ;;  %v1957_v56 = vsel %vm143_vm0, %v1937_v20, 0.0  ;;  %v1938_v7 = vmul.f32 %v7894_v9, %v7894_v9 }
0x1553   :  { %v1913_v27 = vsel %vm143_vm0, %v1893_v12, 0.0  ;;  %v1951_v16 = vsel %vm143_vm0, %v1935_v6, 0.0  ;;  %v1936_v3 = vmul.f32 %v1893_v12, %v1893_v12 }
0x1554   :  { %v1960_v23 = vsel %vm143_vm0, %v1938_v7, 0.0 }
0x1555   :  { %v1954_v5 = vsel %vm143_vm0, %v1936_v3, 0.0 }
0x1556   :  { %1920 = vadd.xlane.f32.xlu1 %v1919_v40 }
0x155a   :  { %1958 = vadd.xlane.f32.xlu1 %v1957_v56 }
0x155e   :  { %1914 = vadd.xlane.f32.xlu1 %v1913_v27 }
0x1562   :  { %1952 = vadd.xlane.f32.xlu1 %v1951_v16 }
0x1566   :  { %1955 = vadd.xlane.f32.xlu1 %v1954_v5 }
0x156a   :  { %1961 = vadd.xlane.f32.xlu1 %v1960_v23 }
0x1585   :  { %v6207_v8 = vpop.f32.mrb[44].mxu1 }
0x1586   :  { %v2113_v10 = vpop.f32.mrb[45].mxu1 }
0x1587   :  { %v6208_v1 = vpop.f32.mrb[46].mxu1 }
0x1588   :  { %v2145_v0 = vpack.c.bf16 %v6208_v1, %v6207_v8  ;;  %v2116_v2 = vpop.f32.mrb[47].mxu1 }
0x1589   :  { %v2144_v4 = vpack.c.bf16 %v2116_v2, %v2113_v10 }
0x158b   :  { %6229 = vmatprep.mubr.bf16.mxu0 %v2144_v4 }
0x158c   :  { %6230 = vmatmul.mubr.bf16.vlgmr.msra.gmra.mrb[36].mxu0 %v2145_v0 }
0x15de   :  { %v1918_v50 = vpop.xlane.xlu0 %1917 }
0x15df   :  { %v1912_v57 = vpop.xlane.xlu1 %1911  ;;  %v1929_v11 = vmul.f32 0.03125, %v1918_v50 }
0x15e0   :  { %v1927_v41 = vmul.f32 0.03125, %v1912_v57 }
0x15e1   :  { %v1977_v25 = vmul.f32 %v1929_v11, %v1929_v11  ;;  %v1993_v33 = vsub.f32 %v7885_v53, %v1929_v11 }
0x15e2   :  { %v1975_v58 = vmul.f32 %v1927_v41, %v1927_v41  ;;  %v1991_v22 = vsub.f32 %v7889_v30, %v1927_v41  ;;  %v6613_v41 = vld [vmem:[%s8886_s11] sm:$0xff]  }
0x15e3   :  { %v1921_v54 = vpop.xlane.xlu1 %1920  ;;  %6237 = vmatprep.subr.bf16.mxu1 %v6613_v41 }
0x15e4   :  { %v1930_v36 = vmul.f32 0.03125, %v1921_v54  ;;  %6238 = vmatpush3.bf16.msra.mxu1 %v6613_v41 }
0x15e6   :  { %v1978_v55 = vmul.f32 %v1930_v36, %v1930_v36  ;;  %v1994_v40 = vsub.f32 %v7894_v9, %v1930_v36 }
0x15e7   :  { %v1959_v48 = vpop.xlane.xlu1 %1958 }
0x15e8   :  { %v1969_v24 = vmul.f32 0.03125, %v1959_v48 }
0x15ea   :  { %v1985_v60 = vsub.f32 %v1969_v24, %v1977_v25  ;;  %v6614_v24 = vld [vmem:[%s8886_s11 + $0x8] sm:$0xff]  }
0x15eb   :  { %v1915_v14 = vpop.xlane.xlu1 %1914  ;;  %6239 = vmatprep.subr.bf16.mxu1 %v6614_v24 }
0x15ec   :  { %v1928_v61 = vmul.f32 0.03125, %v1915_v14  ;;  %v2001_v47 = vadd.f32 1e-06, %v1985_v60  ;;  %6240 = vmatpush3.bf16.msra.mxu1 %v6614_v24 }
0x15ee   :  { %v1976_v42 = vmul.f32 %v1928_v61, %v1928_v61  ;;  %v1992_v28 = vsub.f32 %v1893_v12, %v1928_v61 }
0x15ef   :  { %v1953_v62 = vpop.xlane.xlu1 %1952 }
0x15f0   :  { %v1967_v13 = vmul.f32 0.03125, %v1953_v62 }
0x15f2   :  { %v1983_v51 = vsub.f32 %v1967_v13, %v1975_v58 }
0x15f3   :  { %v1956_v34 = vpop.xlane.xlu1 %1955 }
0x15f4   :  { %v1999_v35 = vadd.f32 1e-06, %v1983_v51  ;;  %v1968_v15 = vmul.f32 0.03125, %v1956_v34 }
0x15f6   :  { %6887 = vrsqrt.f32 %v1999_v35  ;;  %v1984_v29 = vsub.f32 %v1968_v15, %v1976_v42 }
0x15f7   :  { %v1962_v39 = vpop.xlane.xlu1 %1961  ;;  %6889 = vrsqrt.f32 %v2001_v47 }
0x15f8   :  { %v2000_v17 = vadd.f32 1e-06, %v1984_v29  ;;  %v1970_v18 = vmul.f32 0.03125, %v1962_v39 }
0x15fa   :  { %6891 = vrsqrt.f32 %v2000_v17  ;;  %v1986_v19 = vsub.f32 %v1970_v18, %v1978_v55 }
0x15fc   :  { %v2002_v21 = vadd.f32 1e-06, %v1986_v19 }
0x15fe   :  { %6893 = vrsqrt.f32 %v2002_v21 }
0x1600   :  { %v6888_v44 = vpop.eup %6887 }
0x1601   :  { %v2015_v45 = vmul.f32 %v6888_v44, %v1991_v22  ;;  %v6890_v46 = vpop.eup %6889 }
0x1602   :  { %v2017_v26 = vmul.f32 %v6890_v46, %v1993_v33 }
0x1603   :  { %v2029_v38 = vmul.f32 %v7828_v59, %v2015_v45 }
0x1604   :  { %v6892_v31 = vpop.eup %6891  ;;  %v2031_v53 = vmul.f32 %v7828_v59, %v2017_v26 }
0x1605   :  { %v2016_v37 = vmul.f32 %v6892_v31, %v1992_v28  ;;  %v7919_v27 = vadd.f32 %v7836_v52, %v2029_v38 }
0x1606   :  { %v7930_v9 = vadd.f32 %v7836_v52, %v2031_v53 }
0x1607   :  { %v2030_v20 = vmul.f32 %v7828_v59, %v2016_v37 }
0x1608   :  { %v6894_v56 = vpop.eup %6893 }
0x1609   :  { %v7922_v30 = vadd.f32 %v7836_v52, %v2030_v20  ;;  %v2018_v6 = vmul.f32 %v6894_v56, %v1994_v40 }
0x160b   :  { %v2049_v12 = vpack.c.bf16 %v7922_v30, %v7919_v27  ;;  %v2032_v16 = vmul.f32 %v7828_v59, %v2018_v6 }
0x160d   :  { %6209 = vmatprep.mubr.msk.bf16.mxu1 %vm143_vm0, %v2049_v12  ;;  %v7933_v3 = vadd.f32 %v7836_v52, %v2032_v16 }
0x160f   :  { %v2050_v5 = vpack.c.bf16 %v7933_v3, %v7930_v9 }
0x1611   :  { %6210 = vmatmul.mubr.msk.bf16.gmra.mrb[48].mxu1 %vm143_vm0, %v2050_v5 }
0x165f   :  { %v6231_v7 = vpop.f32.mrb[36].mxu0 }
0x1660   :  { %v7939_v23 = vadd.f32 %v6231_v7, %v7850_v43  ;;  %v2246_v8 = vpop.f32.mrb[37].mxu0  ;;  %v7980_v7 = vld [vmem:[%s8942_s4] ss:$0 sm:$0xff] }
0x1661   :  { %v7942_v59 = vadd.f32 %v2246_v8, %v7839_v63  ;;  %v6232_v10 = vpop.f32.mrb[38].mxu0 }
0x1662   :  { %v2249_v1 = vpop.f32.mrb[39].mxu0  ;;  %v2293_v0 = vsel %vm143_vm0, %v7939_v23, 0.0  ;;  %v7947_v52 = vadd.f32 %v6232_v10, %v7853_v32  ;;  %v2321_v63 = vmul.f32 %v7939_v23, %v7939_v23 }
0x1663   :  { %2294 = vadd.xlane.f32.xlu0 %v2293_v0  ;;  %v2287_v2 = vsel %vm143_vm0, %v7942_v59, 0.0  ;;  %v2319_v43 = vmul.f32 %v7942_v59, %v7942_v59  ;;  %v7957_v57 = vadd.f32 %v2249_v1, %v7842_v49 }
0x1664   :  { %2288 = vadd.xlane.f32.xlu1 %v2287_v2  ;;  %v2296_v32 = vsel %vm143_vm0, %v7947_v52, 0.0  ;;  %v2333_v54 = vsel %vm143_vm0, %v2321_v63, 0.0  ;;  %v2322_v49 = vmul.f32 %v7947_v52, %v7947_v52 }
0x1665   :  { %v2327_v4 = vsel %vm143_vm0, %v2319_v43, 0.0  ;;  %v2290_v50 = vsel %vm143_vm0, %v7957_v57, 0.0  ;;  %v2320_v48 = vmul.f32 %v7957_v57, %v7957_v57 }
0x1666   :  { %v2336_v14 = vsel %vm143_vm0, %v2322_v49, 0.0 }
0x1667   :  { %2328 = vadd.xlane.f32.xlu0 %v2327_v4  ;;  %v2330_v11 = vsel %vm143_vm0, %v2320_v48, 0.0 }
0x1668   :  { %2297 = vadd.xlane.f32.xlu1 %v2296_v32 }
0x166b   :  { %2334 = vadd.xlane.f32.xlu0 %v2333_v54 }
0x166c   :  { %2291 = vadd.xlane.f32.xlu1 %v2290_v50 }
0x1670   :  { %2331 = vadd.xlane.f32.xlu1 %v2330_v11 }
0x1674   :  { %2337 = vadd.xlane.f32.xlu1 %v2336_v14 }
0x16e4   :  { %v6211_v25 = vpop.f32.mrb[48].mxu1 }
0x16e5   :  { %v2129_v62 = vpop.f32.mrb[49].mxu1 }
0x16e6   :  { %v6212_v58 = vpop.f32.mrb[50].mxu1 }
0x16e7   :  { %v2147_v60 = vpack.c.bf16 %v6212_v58, %v6211_v25  ;;  %v2132_v61 = vpop.f32.mrb[51].mxu1 }
0x16e8   :  { %v2146_v13 = vpack.c.bf16 %v2132_v61, %v2129_v62 }
0x16ea   :  { %6233 = vmatprep.mubr.bf16.mxu0 %v2146_v13 }
0x16eb   :  { %6234 = vmatmul.mubr.bf16.gmra.mrb[40].mxu0 %v2147_v60 }
0x16f0   :  { %v2295_v51 = vpop.xlane.xlu0 %2294 }
0x16f1   :  { %v2289_v36 = vpop.xlane.xlu1 %2288  ;;  %v2313_v35 = vmul.f32 0.03125, %v2295_v51 }
0x16f2   :  { %v2311_v34 = vmul.f32 0.03125, %v2289_v36 }
0x16f3   :  { %v2361_v17 = vmul.f32 %v2313_v35, %v2313_v35  ;;  %v2377_v8 = vsub.f32 %v7939_v23, %v2313_v35 }
0x16f4   :  { %v2359_v47 = vmul.f32 %v2311_v34, %v2311_v34  ;;  %v2329_v42 = vpop.xlane.xlu0 %2328  ;;  %v2375_v12 = vsub.f32 %v7942_v59, %v2311_v34  ;;  %v7988_v59 = vld [vmem:[%s8943_s8] ss:$0 sm:$0xff] }
0x16f5   :  { %v2351_v15 = vmul.f32 0.03125, %v2329_v42  ;;  %v2298_v29 = vpop.xlane.xlu1 %2297 }
0x16f6   :  { %v2314_v45 = vmul.f32 0.03125, %v2298_v29 }
0x16f7   :  { %v2367_v39 = vsub.f32 %v2351_v15, %v2359_v47 }
0x16f8   :  { %v2335_v55 = vpop.xlane.xlu0 %2334  ;;  %v2362_v26 = vmul.f32 %v2314_v45, %v2314_v45  ;;  %v2378_v4 = vsub.f32 %v7947_v52, %v2314_v45 }
0x16f9   :  { %v2353_v18 = vmul.f32 0.03125, %v2335_v55  ;;  %v2292_v19 = vpop.xlane.xlu1 %2291  ;;  %v2383_v21 = vadd.f32 1e-06, %v2367_v39 }
0x16fa   :  { %v2312_v22 = vmul.f32 0.03125, %v2292_v19 }
0x16fb   :  { %v2369_v44 = vsub.f32 %v2353_v18, %v2361_v17  ;;  %6895 = vrsqrt.f32 %v2383_v21 }
0x16fc   :  { %v2360_v28 = vmul.f32 %v2312_v22, %v2312_v22  ;;  %v2376_v10 = vsub.f32 %v7957_v57, %v2312_v22 }
0x16fd   :  { %v2332_v46 = vpop.xlane.xlu1 %2331  ;;  %v2385_v33 = vadd.f32 1e-06, %v2369_v44 }
0x16fe   :  { %v2352_v31 = vmul.f32 0.03125, %v2332_v46 }
0x16ff   :  { %6897 = vrsqrt.f32 %v2385_v33 }
0x1700   :  { %v2368_v37 = vsub.f32 %v2352_v31, %v2360_v28 }
0x1701   :  { %v2338_v38 = vpop.xlane.xlu1 %2337 }
0x1702   :  { %v2384_v40 = vadd.f32 1e-06, %v2368_v37  ;;  %v2354_v20 = vmul.f32 0.03125, %v2338_v38 }
0x1704   :  { %6899 = vrsqrt.f32 %v2384_v40  ;;  %v2370_v56 = vsub.f32 %v2354_v20, %v2362_v26 }
0x1705   :  { %v6896_v53 = vpop.eup %6895 }
0x1706   :  { %v2386_v6 = vadd.f32 1e-06, %v2370_v56  ;;  %v2399_v16 = vmul.f32 %v6896_v53, %v2375_v12 }
0x1708   :  { %6901 = vrsqrt.f32 %v2386_v6  ;;  %v2413_v43 = vmul.f32 %v7980_v7, %v2399_v16 }
0x1709   :  { %v6898_v5 = vpop.eup %6897 }
0x170a   :  { %v2401_v0 = vmul.f32 %v6898_v5, %v2377_v8  ;;  %v7994_v57 = vadd.f32 %v7988_v59, %v2413_v43 }
0x170c   :  { %v2415_v54 = vmul.f32 %v7980_v7, %v2401_v0 }
0x170e   :  { %v6900_v1 = vpop.eup %6899  ;;  %v8004_v52 = vadd.f32 %v7988_v59, %v2415_v54 }
0x170f   :  { %v2400_v2 = vmul.f32 %v6900_v1, %v2376_v10 }
0x1711   :  { %v2414_v63 = vmul.f32 %v7980_v7, %v2400_v2 }
0x1712   :  { %v6902_v32 = vpop.eup %6901 }
0x1713   :  { %v2402_v23 = vmul.f32 %v6902_v32, %v2378_v4  ;;  %v7997_v50 = vadd.f32 %v7988_v59, %v2414_v63 }
0x1715   :  { %v2416_v48 = vmul.f32 %v7980_v7, %v2402_v23  ;;  %v2435_v11 = vpack.c.bf16 %v7997_v50, %v7994_v57 }
0x1717   :  { %6241 = vmatprep.mubr.msk.bf16.mxu1 %vm143_vm0, %v2435_v11  ;;  %v8007_v49 = vadd.f32 %v7988_v59, %v2416_v48 }
0x1719   :  { %v2436_v14 = vpack.c.bf16 %v8007_v49, %v8004_v52 }
0x171b   :  { %6242 = vmatmul.mubr.msk.bf16.vlgmr.msra.gmra.mrb[52].mxu1 %vm143_vm0, %v2436_v14 }
0x17be   :  { %v6235_v41 = vpop.f32.mrb[40].mxu0 }
0x17bf   :  { %v8013_v24 = vadd.f32 %v6235_v41, %v7930_v9  ;;  %v2262_v25 = vpop.f32.mrb[41].mxu0 }
0x17c0   :  { %v6236_v62 = vpop.f32.mrb[42].mxu0  ;;  %v8016_v58 = vadd.f32 %v2262_v25, %v7919_v27 }
0x17c1   :  { %v8019_v60 = vadd.f32 %v6236_v62, %v7933_v3  ;;  %v2265_v61 = vpop.f32.mrb[43].mxu0  ;;  %v2305_v13 = vsel %vm143_vm0, %v8013_v24, 0.0  ;;  %v2325_v47 = vmul.f32 %v8013_v24, %v8013_v24 }
0x17c2   :  { %2306 = vadd.xlane.f32.xlu0 %v2305_v13  ;;  %v8024_v51 = vadd.f32 %v2265_v61, %v7922_v30  ;;  %v2299_v36 = vsel %vm143_vm0, %v8016_v58, 0.0  ;;  %v2323_v27 = vmul.f32 %v8016_v58, %v8016_v58 }
0x17c3   :  { %v2308_v9 = vsel %vm143_vm0, %v8019_v60, 0.0  ;;  %v2326_v34 = vmul.f32 %v8019_v60, %v8019_v60  ;;  %v2345_v15 = vsel %vm143_vm0, %v2325_v47, 0.0 }
0x17c4   :  { %2309 = vadd.xlane.f32.xlu1 %v2308_v9  ;;  %v2302_v3 = vsel %vm143_vm0, %v8024_v51, 0.0  ;;  %v2339_v30 = vsel %vm143_vm0, %v2323_v27, 0.0  ;;  %v2324_v35 = vmul.f32 %v8024_v51, %v8024_v51 }
0x17c5   :  { %v2348_v42 = vsel %vm143_vm0, %v2326_v34, 0.0 }
0x17c6   :  { %2300 = vadd.xlane.f32.xlu0 %v2299_v36  ;;  %v2342_v29 = vsel %vm143_vm0, %v2324_v35, 0.0 }
0x17c8   :  { %2303 = vadd.xlane.f32.xlu1 %v2302_v3 }
0x17ca   :  { %2340 = vadd.xlane.f32.xlu0 %v2339_v30 }
0x17cc   :  { %2349 = vadd.xlane.f32.xlu1 %v2348_v42 }
0x17ce   :  { %2346 = vadd.xlane.f32.xlu0 %v2345_v15 }
0x17d0   :  { %2343 = vadd.xlane.f32.xlu1 %v2342_v29 }
0x17ee   :  { %v6243_v39 = vpop.f32.mrb[52].mxu1 }
0x17ef   :  { %v2501_v55 = vpop.f32.mrb[53].mxu1 }
0x17f0   :  { %v6244_v17 = vpop.f32.mrb[54].mxu1 }
0x17f1   :  { %v8044_v18 = vpack.c.bf16 %v6244_v17, %v6243_v39  ;;  %v2504_v19 = vpop.f32.mrb[55].mxu1 }
0x17f2   :  { %v8046_v21 = vpack.c.bf16 %v2504_v19, %v2501_v55 }
0x17f4   :  { %2718 = vrot.lane.b32.xlu1 %v8046_v21, %s7128_s10  ;;  %2538 = vrot.lane.b32.xlu0 %v8046_v21, %s7126_s0 }
0x17f8   :  { %2540 = vrot.lane.b32.xlu1 %v8044_v18, %s7126_s0  ;;  %2714 = vrot.lane.b32.xlu0 %v8046_v21, %s7129_s6 }
0x17fc   :  { %2720 = vrot.lane.b32.xlu1 %v8044_v18, %s7128_s10  ;;  %2716 = vrot.lane.b32.xlu0 %v8044_v18, %s7129_s6 }
0x1800   :  { %2898 = vrot.lane.b32.xlu1 %v8046_v21, %s7131_s27  ;;  %2894 = vrot.lane.b32.xlu0 %v8046_v21, %s7132_s7 }
0x1804   :  { %2900 = vrot.lane.b32.xlu1 %v8044_v18, %s7131_s27  ;;  %2653 = vrot.lane.b32.xlu0 %v8046_v21, %s7127_s2 }
0x1808   :  { %2896 = vrot.lane.b32.xlu1 %v8044_v18, %s7132_s7 }
0x184f   :  { %v2307_v22 = vpop.xlane.xlu0 %2306 }
0x1850   :  { %v2317_v37 = vmul.f32 0.03125, %v2307_v22 }
0x1851   :  { %v2310_v44 = vpop.xlane.xlu1 %2309 }
0x1852   :  { %v2318_v28 = vmul.f32 0.03125, %v2310_v44  ;;  %v2365_v16 = vmul.f32 %v2317_v37, %v2317_v37  ;;  %v2381_v36 = vsub.f32 %v8013_v24, %v2317_v37 }
0x1853   :  { %v2301_v45 = vpop.xlane.xlu0 %2300 }
0x1854   :  { %v2315_v46 = vmul.f32 0.03125, %v2301_v45  ;;  %v2366_v56 = vmul.f32 %v2318_v28, %v2318_v28  ;;  %v2382_v61 = vsub.f32 %v8019_v60, %v2318_v28 }
0x1855   :  { %v2304_v33 = vpop.xlane.xlu1 %2303 }
0x1856   :  { %v2363_v38 = vmul.f32 %v2315_v46, %v2315_v46  ;;  %v2316_v40 = vmul.f32 0.03125, %v2304_v33  ;;  %v2379_v25 = vsub.f32 %v8016_v58, %v2315_v46 }
0x1857   :  { %v2341_v31 = vpop.xlane.xlu0 %2340 }
0x1858   :  { %v2355_v26 = vmul.f32 0.03125, %v2341_v31  ;;  %v2364_v1 = vmul.f32 %v2316_v40, %v2316_v40  ;;  %v2380_v30 = vsub.f32 %v8024_v51, %v2316_v40 }
0x1859   :  { %v2350_v20 = vpop.xlane.xlu1 %2349 }
0x185a   :  { %v2371_v6 = vsub.f32 %v2355_v26, %v2363_v38  ;;  %v2358_v53 = vmul.f32 0.03125, %v2350_v20 }
0x185b   :  { %v2347_v12 = vpop.xlane.xlu0 %2346 }
0x185c   :  { %v2387_v5 = vadd.f32 1e-06, %v2371_v6  ;;  %v2374_v8 = vsub.f32 %v2358_v53, %v2366_v56  ;;  %v2357_v10 = vmul.f32 0.03125, %v2347_v12 }
0x185d   :  { %v2344_v0 = vpop.xlane.xlu1 %2343 }
0x185e   :  { %6903 = vrsqrt.f32 %v2387_v5  ;;  %v2390_v2 = vadd.f32 1e-06, %v2374_v8  ;;  %v2373_v43 = vsub.f32 %v2357_v10, %v2365_v16  ;;  %v2356_v4 = vmul.f32 0.03125, %v2344_v0 }
0x1860   :  { %6905 = vrsqrt.f32 %v2390_v2  ;;  %v2389_v63 = vadd.f32 1e-06, %v2373_v43  ;;  %v2372_v32 = vsub.f32 %v2356_v4, %v2364_v1 }
0x1862   :  { %6907 = vrsqrt.f32 %v2389_v63  ;;  %v2388_v54 = vadd.f32 1e-06, %v2372_v32 }
0x1864   :  { %6909 = vrsqrt.f32 %v2388_v54 }
0x1866   :  { %v2539_v23 = vpop.permute.xlu0 %2538  ;;  %v2719_v48 = vpop.permute.xlu1 %2718 }
0x1867   :  { %6445 = vmatprep.subr.msk.bf16.mxu1 %vm231_vm1, %v2539_v23  ;;  %6447 = vmatprep.subr.msk.bf16.mxu0 %vm231_vm1, %v2719_v48  ;;  %v2549_v11 = vsel %vm231_vm1, %v2539_v23, 0  ;;  %v2729_v14 = vsel %vm231_vm1, %v2719_v48, 0 }
0x1868   :  { %v6904_v41 = vpop.eup %6903  ;;  %6250 = vmatpush3.bf16.xpose.msra.mxu1 %v2549_v11  ;;  %6266 = vmatpush3.bf16.xpose.msra.mxu0 %v2729_v14 }
0x1869   :  { %v2403_v27 = vmul.f32 %v6904_v41, %v2379_v25 }
0x186a   :  { %v6906_v62 = vpop.eup %6905  ;;  %v2715_v13 = vpop.permute.xlu0 %2714 }
0x186b   :  { %v2541_v9 = vpop.permute.xlu1 %2540  ;;  %6269 = vmatprep.mubr.msk.bf16.mxu0 %vm231_vm1, %v2715_v13  ;;  %v2406_v34 = vmul.f32 %v6906_v62, %v2382_v61  ;;  %v2417_v29 = vmul.f32 %v7980_v7, %v2403_v27 }
0x186c   :  { %6446 = vmatprep.subr.msk.bf16.mxu1 %vm231_vm1, %v2541_v9  ;;  %v6908_v3 = vpop.eup %6907  ;;  %v2552_v15 = vsel %vm231_vm1, %v2541_v9, 0 }
0x186d   :  { %v2405_v47 = vmul.f32 %v6908_v3, %v2381_v36  ;;  %v2420_v55 = vmul.f32 %v7980_v7, %v2406_v34  ;;  %v8092_v44 = vadd.f32 %v7988_v59, %v2417_v29 }
0x186e   :  { %v6910_v42 = vpop.eup %6909  ;;  %v2717_v35 = vpop.permute.xlu0 %2716 }
0x186f   :  { %v2721_v58 = vpop.permute.xlu1 %2720  ;;  %v2404_v24 = vmul.f32 %v6910_v42, %v2380_v30  ;;  %v2419_v39 = vmul.f32 %v7980_v7, %v2405_v47  ;;  %v8098_v46 = vadd.f32 %v7988_v59, %v2420_v55 }
0x1870   :  { %6448 = vmatprep.subr.msk.bf16.mxu0 %vm231_vm1, %v2721_v58  ;;  %v2732_v60 = vsel %vm231_vm1, %v2721_v58, 0  ;;  %6252 = vmatpush3.bf16.xpose.msra.mxu1 %v2552_v15 }
0x1871   :  { %6268 = vmatpush3.bf16.xpose.msra.mxu0 %v2732_v60  ;;  %v2418_v51 = vmul.f32 %v7980_v7, %v2404_v24  ;;  %v8088_v22 = vadd.f32 %v7988_v59, %v2419_v39 }
0x1872   :  { %v2895_v17 = vpop.permute.xlu0 %2894 }
0x1873   :  { %v2899_v19 = vpop.permute.xlu1 %2898  ;;  %v8095_v45 = vadd.f32 %v7988_v59, %v2418_v51  ;;  %v2438_v28 = vpack.c.bf16 %v8098_v46, %v8088_v22 }
0x1874   :  { %6449 = vmatprep.subr.msk.bf16.mxu0 %vm231_vm1, %v2899_v19  ;;  %v2909_v31 = vsel %vm231_vm1, %v2899_v19, 0 }
0x1875   :  { %v2437_v33 = vpack.c.bf16 %v8095_v45, %v8092_v44 }
0x1876   :  { %v2654_v7 = vpop.permute.xlu0 %2653 }
0x1877   :  { %6245 = vmatprep.mubr.msk.bf16.mxu1 %vm143_vm0, %v2437_v33  ;;  %6257 = vmatprep.subr.bf16.mxu1 %v2654_v7  ;;  %v2901_v37 = vpop.permute.xlu1 %2900 }
0x1878   :  { %6270 = vmatmul.mubr.msk.bf16.vlgmr.msra.gmra.mrb[44].mxu0 %vm231_vm1, %v2717_v35  ;;  %6246 = vmatmul.mubr.msk.bf16.gmra.mrb[56].mxu1 %vm143_vm0, %v2438_v28  ;;  %v2912_v59 = vsel %vm231_vm1, %v2901_v37, 0 }
0x1879   :  { %6282 = vmatpush3.bf16.xpose.msra.mxu0 %v2909_v31  ;;  %6285 = vmatprep.mubr.msk.bf16.mxu0 %vm231_vm1, %v2895_v17 }
0x187a   :  { %6253 = vmatprep.mubr.msk.bf16.mxu1 %vm231_vm1, %v8046_v21  ;;  %6450 = vmatprep.subr.msk.bf16.mxu0 %vm231_vm1, %v2901_v37 }
0x187b   :  { %v2897_v38 = vpop.permute.xlu1 %2896 }
0x1880   :  { %6254 = vmatmul.mubr.msk.bf16.vlgmr.msra.gmra.mrb[60].mxu1 %vm231_vm1, %v8044_v18 }
0x1881   :  { %6258 = vmatpush3.bf16.msra.mxu1 %v2654_v7  ;;  %6284 = vmatpush3.bf16.xpose.msra.mxu0 %v2912_v59 }
0x1888   :  { %6286 = vmatmul.mubr.msk.bf16.vlgmr.msra.gmra.mrb[48].mxu0 %vm231_vm1, %v2897_v38 }
0x194b   :  { %v6271_v26 = vpop.f32.mrb[44].mxu0  ;;  %v6247_v40 = vpop.f32.mrb[56].mxu1 }
0x194c   :  { %v2768_v20 = vpop.f32.mrb[45].mxu0  ;;  %v2517_v56 = vpop.f32.mrb[57].mxu1  ;;  %v2785_v63 = vmul.f32 0.35355338, %v6271_v26 }
0x194d   :  { %v6272_v6 = vpop.f32.mrb[46].mxu0  ;;  %v6248_v53 = vpop.f32.mrb[58].mxu1  ;;  %v8134_v9 = vmul.f32 0.35355338, %v2768_v20 }
0x194e   :  { %v8116_v12 = vmul.f32 0.35355338, %v6272_v6  ;;  %v8118_v16 = vpack.c.bf16 %v6248_v53, %v6247_v40  ;;  %v2771_v5 = vpop.f32.mrb[47].mxu0  ;;  %v2520_v8 = vpop.f32.mrb[59].mxu1  ;;  %v2793_v41 = vsel %vm143_vm0, %v2785_v63, -inf }
0x194f   :  { %v8120_v10 = vpack.c.bf16 %v2520_v8, %v2517_v56  ;;  %v8127_v48 = vmul.f32 0.35355338, %v2771_v5  ;;  %v2787_v42 = vsel %vm143_vm0, %v8134_v9, -inf }
0x1950   :  { %v2796_v1 = vsel %vm143_vm0, %v8116_v12, -inf }
0x1951   :  { %2797 = vmax.xlane.f32.xlu1 %v2796_v1  ;;  %v2790_v13 = vsel %vm143_vm0, %v8127_v48, -inf }
0x1953   :  { %v6255_v0 = vpop.f32.mrb[60].mxu1 }
0x1954   :  { %v2605_v2 = vmul.f32 0.35355338, %v6255_v0  ;;  %v2588_v43 = vpop.f32.mrb[61].mxu1 }
0x1955   :  { %v6256_v4 = vpop.f32.mrb[62].mxu1  ;;  %v2603_v14 = vmul.f32 0.35355338, %v2588_v43 }
0x1956   :  { %v2591_v32 = vpop.f32.mrb[63].mxu1  ;;  %v2613_v54 = vsel %vm143_vm0, %v2605_v2, -inf  ;;  %v2606_v47 = vmul.f32 0.35355338, %v6256_v4 }
0x1957   :  { %v8125_v23 = vmul.f32 0.35355338, %v2591_v32  ;;  %2614 = vmax.xlane.f32.xlu0 %v2613_v54  ;;  %v2607_v3 = vsel %vm143_vm0, %v2603_v14, -inf }
0x1958   :  { %v2616_v15 = vsel %vm143_vm0, %v2606_v47, -inf }
0x1959   :  { %v2610_v11 = vsel %vm143_vm0, %v8125_v23, -inf }
0x195a   :  { %2611 = vmax.xlane.f32.xlu1 %v2610_v11 }
0x195b   :  { %v6287_v25 = vpop.f32.mrb[48].mxu0  ;;  %2794 = vmax.xlane.f32.xlu0 %v2793_v41 }
0x195c   :  { %v2948_v62 = vpop.f32.mrb[49].mxu0  ;;  %v2965_v58 = vmul.f32 0.35355338, %v6287_v25 }
0x195d   :  { %v6288_v61 = vpop.f32.mrb[50].mxu0  ;;  %v8148_v60 = vmul.f32 0.35355338, %v2948_v62 }
0x195e   :  { %v8136_v36 = vmul.f32 0.35355338, %v6288_v61  ;;  %v2951_v27 = vpop.f32.mrb[51].mxu0  ;;  %2791 = vmax.xlane.f32.xlu1 %v2790_v13  ;;  %v2973_v24 = vsel %vm143_vm0, %v2965_v58, -inf }
0x195f   :  { %2608 = vmax.xlane.f32.xlu0 %v2607_v3  ;;  %v8139_v34 = vmul.f32 0.35355338, %v2951_v27  ;;  %v2967_v29 = vsel %vm143_vm0, %v8148_v60, -inf }
0x1960   :  { %v2976_v30 = vsel %vm143_vm0, %v8136_v36, -inf }
0x1961   :  { %v2970_v35 = vsel %vm143_vm0, %v8139_v34, -inf }
0x1962   :  { %2977 = vmax.xlane.f32.xlu1 %v2976_v30 }
0x1963   :  { %2788 = vmax.xlane.f32.xlu0 %v2787_v42 }
0x1966   :  { %2971 = vmax.xlane.f32.xlu1 %v2970_v35 }
0x1967   :  { %2617 = vmax.xlane.f32.xlu0 %v2616_v15 }
0x196b   :  { %2974 = vmax.xlane.f32.xlu0 %v2973_v24 }
0x196f   :  { %2968 = vmax.xlane.f32.xlu0 %v2967_v29 }
0x1977   :  { %2655 = vrot.lane.b32.xlu1 %v8044_v18, %s7127_s2 }
0x1985   :  { %2833 = vrot.lane.b32.xlu0 %v8046_v21, %s7130_s1 }
0x19de   :  { %v2798_v39 = vpop.xlane.xlu1 %2797 }
0x19df   :  { %v2802_v56 = vsub.f32 %v8116_v12, %v2798_v39 }
0x19e1   :  { %v2809_v0 = vmul.f32 1.442695, %v2802_v56 }
0x19e4   :  { %v2615_v55 = vpop.xlane.xlu0 %2614 }
0x19e5   :  { %v2621_v51 = vsub.f32 %v2605_v2, %v2615_v55 }
0x19e7   :  { %v2627_v17 = vmul.f32 1.442695, %v2621_v51  ;;  %v2612_v19 = vpop.xlane.xlu1 %2611 }
0x19e8   :  { %v2795_v33 = vpop.xlane.xlu0 %2794  ;;  %v2620_v2 = vsub.f32 %v8125_v23, %v2612_v19 }
0x19e9   :  { %6911 = vpow2.f32 %v2627_v17  ;;  %v2801_v7 = vsub.f32 %v2785_v63, %v2795_v33 }
0x19ea   :  { %v2625_v54 = vmul.f32 1.442695, %v2620_v2 }
0x19eb   :  { %v2807_v28 = vmul.f32 1.442695, %v2801_v7  ;;  %v2792_v31 = vpop.xlane.xlu1 %2791 }
0x19ec   :  { %v2609_v37 = vpop.xlane.xlu0 %2608  ;;  %v2800_v11 = vsub.f32 %v8127_v48, %v2792_v31 }
0x19ed   :  { %6913 = vpow2.f32 %v2807_v28  ;;  %v2619_v59 = vsub.f32 %v2603_v14, %v2609_v37 }
0x19ee   :  { %v2805_v41 = vmul.f32 1.442695, %v2800_v11 }
0x19ef   :  { %v2623_v38 = vmul.f32 1.442695, %v2619_v59  ;;  %v2978_v26 = vpop.xlane.xlu1 %2977 }
0x19f0   :  { %v8157_v40 = vpop.xlane.xlu0 %2788  ;;  %v2982_v30 = vsub.f32 %v8136_v36, %v2978_v26 }
0x19f1   :  { %6915 = vpow2.f32 %v2623_v38  ;;  %v2799_v19 = vsub.f32 %v8134_v9, %v8157_v40 }
0x19f3   :  { %v8159_v20 = vpop.eup %6911  ;;  %v2972_v6 = vpop.xlane.xlu1 %2971  ;;  %v2803_v28 = vmul.f32 1.442695, %v2799_v19 }
0x19f4   :  { %v2618_v53 = vpop.xlane.xlu0 %2617  ;;  %v2637_v5 = vsel %vm143_vm0, %v8159_v20, 0.0  ;;  %v2980_v15 = vsub.f32 %v8139_v34, %v2972_v6 }
0x19f5   :  { %v2622_v8 = vsub.f32 %v2606_v47, %v2618_v53  ;;  %2638 = vadd.xlane.f32.xlu0 %v2637_v5 }
0x19f6   :  { %v2985_v29 = vmul.f32 1.442695, %v2980_v15 }
0x19f7   :  { %v8164_v1 = vpop.eup %6913  ;;  %v2629_v43 = vmul.f32 1.442695, %v2622_v8  ;;  %v2656_v4 = vpop.permute.xlu1 %2655 }
0x19f8   :  { %v2975_v63 = vpop.xlane.xlu0 %2974  ;;  %6259 = vmatprep.subr.bf16.mxu1 %v2656_v4  ;;  %v2817_v32 = vsel %vm143_vm0, %v8164_v1, 0.0 }
0x19f9   :  { %6917 = vpow2.f32 %v2629_v43  ;;  %2818 = vadd.xlane.f32.xlu0 %v2817_v32  ;;  %6260 = vmatpush3.bf16.msra.mxu1 %v2656_v4  ;;  %v2981_v25 = vsub.f32 %v2965_v58, %v2975_v63  ;;  %v2989_v58 = vmul.f32 1.442695, %v2982_v30 }
0x19fa   :  { %6919 = vpow2.f32 %v2809_v0 }
0x19fb   :  { %v8169_v12 = vpop.eup %6915  ;;  %6921 = vpow2.f32 %v2625_v54  ;;  %v2987_v13 = vmul.f32 1.442695, %v2981_v25 }
0x19fc   :  { %v2969_v14 = vpop.xlane.xlu0 %2968  ;;  %v2631_v23 = vsel %vm143_vm0, %v8169_v12, 0.0  ;;  %6923 = vpow2.f32 %v2805_v41 }
0x19fd   :  { %2632 = vadd.xlane.f32.xlu0 %v2631_v23  ;;  %v2979_v27 = vsub.f32 %v8148_v60, %v2969_v14  ;;  %6925 = vpow2.f32 %v2987_v13 }
0x19ff   :  { %v2983_v47 = vmul.f32 1.442695, %v2979_v27 }
0x1a00   :  { %v8174_v62 = vpop.permute.xlu0 %2833 }
0x1a01   :  { %6273 = vmatprep.subr.bf16.mxu1 %v8174_v62  ;;  %6927 = vpow2.f32 %v2983_v47 }
0x1a02   :  { %6929 = vpow2.f32 %v2989_v58 }
0x1a03   :  { %v8177_v61 = vpop.eup %6917  ;;  %6931 = vpow2.f32 %v2985_v29 }
0x1a04   :  { %v2640_v48 = vsel %vm143_vm0, %v8177_v61, 0.0  ;;  %v8182_v3 = vpop.eup %6919  ;;  %6933 = vpow2.f32 %v2803_v28 }
0x1a05   :  { %2641 = vadd.xlane.f32.xlu1 %v2640_v48  ;;  %v2820_v42 = vsel %vm143_vm0, %v8182_v3, 0.0  ;;  %v6922_v35 = vpop.eup %6921 }
0x1a06   :  { %v2634_v60 = vsel %vm143_vm0, %v6922_v35, 0.0  ;;  %v8189_v24 = vpop.eup %6923 }
0x1a07   :  { %v2814_v36 = vsel %vm143_vm0, %v8189_v24, 0.0  ;;  %v8193_v39 = vpop.eup %6925 }
0x1a08   :  { %v2997_v34 = vsel %vm143_vm0, %v8193_v39, 0.0 }
0x1a09   :  { %2821 = vadd.xlane.f32.xlu1 %v2820_v42 }
0x1a0b   :  { %v8199_v55 = vpop.eup %6927 }
0x1a0c   :  { %v2991_v51 = vsel %vm143_vm0, %v8199_v55, 0.0  ;;  %v8203_v17 = vpop.eup %6929 }
0x1a0d   :  { %2635 = vadd.xlane.f32.xlu1 %v2634_v60  ;;  %v3000_v33 = vsel %vm143_vm0, %v8203_v17, 0.0  ;;  %v8209_v7 = vpop.eup %6931 }
0x1a0e   :  { %v2994_v31 = vsel %vm143_vm0, %v8209_v7, 0.0  ;;  %v6934_v37 = vpop.eup %6933 }
0x1a0f   :  { %v2811_v59 = vsel %vm143_vm0, %v6934_v37, 0.0 }
0x1a11   :  { %2815 = vadd.xlane.f32.xlu1 %v2814_v36 }
0x1a13   :  { %2835 = vrot.lane.b32.xlu0 %v8044_v18, %s7130_s1 }
0x1a15   :  { %2998 = vadd.xlane.f32.xlu1 %v2997_v34 }
0x1a19   :  { %2992 = vadd.xlane.f32.xlu1 %v2991_v51 }
0x1a1d   :  { %3001 = vadd.xlane.f32.xlu1 %v3000_v33 }
0x1a21   :  { %2995 = vadd.xlane.f32.xlu1 %v2994_v31 }
0x1a32   :  { %2812 = vadd.xlane.f32.xlu0 %v2811_v59  ;;  %3015 = vrot.lane.b32.xlu1 %v8044_v18, %s8944_s30 }
0x1a36   :  { %3080 = vrot.lane.b32.xlu1 %v8044_v18, %s8945_s5 }
0x1a3a   :  { %3076 = vrot.lane.b32.xlu1 %v8044_v18, %s8946_s9 }
0x1a48   :  { %3013 = vrot.lane.b32.xlu0 %v8046_v21, %s8944_s30 }
0x1a4c   :  { %3078 = vrot.lane.b32.xlu0 %v8046_v21, %s8945_s5 }
0x1a50   :  { %3074 = vrot.lane.b32.xlu0 %v8046_v21, %s8946_s9 }
0x1a82   :  { %v2639_v9 = vpop.xlane.xlu0 %2638 }
0x1a86   :  { %v2819_v38 = vpop.xlane.xlu0 %2818 }
0x1a8a   :  { %v2633_v40 = vpop.xlane.xlu0 %2632 }
0x1a8e   :  { %v2836_v23 = vpop.permute.xlu0 %2835 }
0x1a92   :  { %v2642_v26 = vpop.xlane.xlu1 %2641 }
0x1a93   :  { %6935 = vrcp.f32 %v2642_v26 }
0x1a94   :  { %6937 = vrcp.f32 %v2633_v40 }
0x1a95   :  { %6939 = vrcp.f32 %v2639_v9 }
0x1a96   :  { %v2822_v56 = vpop.xlane.xlu1 %2821 }
0x1a9a   :  { %v2636_v6 = vpop.xlane.xlu1 %2635 }
0x1a9b   :  { %6941 = vrcp.f32 %v2636_v6 }
0x1a9c   :  { %6943 = vrcp.f32 %v2819_v38 }
0x1a9d   :  { %v6936_v53 = vpop.eup %6935  ;;  %6945 = vrcp.f32 %v2822_v56 }
0x1a9e   :  { %v6938_v5 = vpop.eup %6937  ;;  %v2816_v8 = vpop.xlane.xlu1 %2815  ;;  %v2650_v43 = vmul.f32 %v6936_v53, %v8177_v61 }
0x1a9f   :  { %v6940_v0 = vpop.eup %6939  ;;  %v2647_v4 = vmul.f32 %v6938_v5, %v8169_v12  ;;  %6947 = vrcp.f32 %v2816_v8 }
0x1aa0   :  { %v2649_v32 = vmul.f32 %v6940_v0, %v8159_v20 }
0x1aa2   :  { %v2999_v11 = vpop.xlane.xlu1 %2998  ;;  %v2652_v14 = vpack.c.bf16 %v2650_v43, %v2649_v32 }
0x1aa5   :  { %v6942_v2 = vpop.eup %6941 }
0x1aa6   :  { %v2648_v63 = vmul.f32 %v6942_v2, %v6922_v35  ;;  %v2993_v41 = vpop.xlane.xlu1 %2992  ;;  %v6944_v13 = vpop.eup %6943 }
0x1aa7   :  { %v6946_v27 = vpop.eup %6945  ;;  %v2829_v60 = vmul.f32 %v6944_v13, %v8164_v1 }
0x1aa8   :  { %v2651_v54 = vpack.c.bf16 %v2648_v63, %v2647_v4  ;;  %v2830_v42 = vmul.f32 %v6946_v27, %v8182_v3 }
0x1aa9   :  { %v6948_v48 = vpop.eup %6947 }
0x1aaa   :  { %6261 = vmatprep.mubr.msk.bf16.mxu1 %vm143_vm0, %v2651_v54  ;;  %v3002_v25 = vpop.xlane.xlu1 %3001  ;;  %v2828_v58 = vmul.f32 %v6948_v48, %v8189_v24  ;;  %v2832_v34 = vpack.c.bf16 %v2830_v42, %v2829_v60 }
0x1aab   :  { %6262 = vmatmul.mubr.msk.bf16.vlgmr.msra.gmra.mrb[64].mxu1 %vm143_vm0, %v2652_v14 }
0x1aac   :  { %6274 = vmatpush3.bf16.msra.mxu1 %v8174_v62 }
0x1aad   :  { %6275 = vmatprep.subr.bf16.mxu1 %v2836_v23 }
0x1aae   :  { %v2996_v61 = vpop.xlane.xlu1 %2995 }
0x1aaf   :  { %6949 = vrcp.f32 %v2996_v61 }
0x1ab0   :  { %6276 = vmatpush3.bf16.msra.mxu1 %v2836_v23  ;;  %6951 = vrcp.f32 %v2993_v41 }
0x1ab2   :  { %v3016_v28 = vpop.permute.xlu1 %3015 }
0x1ab9   :  { %v6950_v62 = vpop.eup %6949 }
0x1aba   :  { %v6952_v30 = vpop.eup %6951  ;;  %v3008_v15 = vmul.f32 %v6950_v62, %v8209_v7 }
0x1abb   :  { %v3007_v36 = vmul.f32 %v6952_v30, %v8199_v55 }
0x1abd   :  { %v3011_v19 = vpack.c.bf16 %v3008_v15, %v3007_v36 }
0x1abf   :  { %v2813_v20 = vpop.xlane.xlu0 %2812 }
0x1ac0   :  { %6953 = vrcp.f32 %v2813_v20 }
0x1ac1   :  { %6955 = vrcp.f32 %v3002_v25 }
0x1ac2   :  { %6957 = vrcp.f32 %v2999_v11 }
0x1ac3   :  { %v3014_v12 = vpop.permute.xlu0 %3013 }
0x1ac4   :  { %6289 = vmatprep.subr.bf16.mxu1 %v3014_v12 }
0x1ac7   :  { %v3079_v24 = vpop.permute.xlu0 %3078 }
0x1ac8   :  { %v3089_v31 = vsel %vm231_vm1, %v3079_v24, 0 }
0x1aca   :  { %v6954_v47 = vpop.eup %6953 }
0x1acb   :  { %v2827_v35 = vmul.f32 %v6954_v47, %v6934_v37  ;;  %v6956_v51 = vpop.eup %6955  ;;  %v3075_v7 = vpop.permute.xlu0 %3074 }
0x1acc   :  { %v6958_v33 = vpop.eup %6957  ;;  %v3010_v3 = vmul.f32 %v6956_v51, %v8203_v17  ;;  %v3081_v37 = vpop.permute.xlu1 %3080 }
0x1acd   :  { %v2831_v29 = vpack.c.bf16 %v2828_v58, %v2827_v35  ;;  %v3009_v1 = vmul.f32 %v6958_v33, %v8193_v39  ;;  %v3092_v17 = vsel %vm231_vm1, %v3081_v37, 0 }
0x1acf   :  { %6277 = vmatprep.mubr.msk.bf16.mxu1 %vm143_vm0, %v2831_v29  ;;  %v3012_v55 = vpack.c.bf16 %v3010_v3, %v3009_v1 }
0x1ad0   :  { %6278 = vmatmul.mubr.msk.bf16.vlgmr.msra.gmra.mrb[68].mxu1 %vm143_vm0, %v2832_v34  ;;  %v3077_v59 = vpop.permute.xlu1 %3076 }
0x1ad1   :  { %6290 = vmatpush3.bf16.msra.mxu1 %v3014_v12  ;;  %6293 = vmatprep.mubr.msk.bf16.mxu1 %vm143_vm0, %v3011_v19 }
0x1ad2   :  { %6291 = vmatprep.subr.bf16.mxu1 %v3016_v28 }
0x1ad5   :  { %6292 = vmatpush3.bf16.msra.mxu1 %v3016_v28 }
0x1ad6   :  { %6451 = vmatprep.subr.msk.bf16.mxu1 %vm231_vm1, %v3079_v24 }
0x1ad8   :  { %6294 = vmatmul.mubr.msk.bf16.vlgmr.msra.gmra.mrb[72].mxu1 %vm143_vm0, %v3012_v55 }
0x1ad9   :  { %6301 = vmatprep.mubr.msk.bf16.mxu1 %vm231_vm1, %v3075_v7 }
0x1ade   :  { %6298 = vmatpush3.bf16.xpose.msra.mxu1 %v3089_v31 }
0x1adf   :  { %6452 = vmatprep.subr.msk.bf16.mxu1 %vm231_vm1, %v3081_v37 }
0x1ae6   :  { %6300 = vmatpush3.bf16.xpose.msra.mxu1 %v3092_v17 }
0x1aed   :  { %6302 = vmatmul.mubr.msk.bf16.vlgmr.msra.gmra.mrb[76].mxu1 %vm231_vm1, %v3077_v59 }
0x1b7e   :  { %v8249_v39 = vpop.f32.mrb[64].mxu1 }
0x1b7f   :  { %v8251_v9 = vpop.f32.mrb[65].mxu1 }
0x1b80   :  { %v8253_v38 = vpop.f32.mrb[66].mxu1 }
0x1b81   :  { %v8255_v26 = vpop.f32.mrb[67].mxu1 }
0x1ba3   :  { %v8257_v40 = vpop.f32.mrb[68].mxu1 }
0x1ba4   :  { %v8259_v56 = vpop.f32.mrb[69].mxu1 }
0x1ba5   :  { %v8261_v6 = vpop.f32.mrb[70].mxu1 }
0x1ba6   :  { %v6544_v53 = vpack.i.bf16 %v8261_v6, %v8257_v40  ;;  %v8265_v5 = vpop.f32.mrb[71].mxu1 }
0x1ba7   :  { %v6539_v8 = vpack.i.bf16 %v8265_v5, %v8259_v56 }
0x1bab   :  { %v8269_v0 = vpop.f32.mrb[72].mxu1 }
0x1bac   :  { %v8271_v2 = vpop.f32.mrb[73].mxu1 }
0x1bad   :  { %v8273_v43 = vpop.f32.mrb[74].mxu1 }
0x1bae   :  { %v6554_v4 = vpack.i.bf16 %v8273_v43, %v8269_v0  ;;  %v8277_v63 = vpop.f32.mrb[75].mxu1 }
0x1baf   :  { %v6549_v32 = vpack.i.bf16 %v8277_v63, %v8271_v2 }
0x1bc0   :  { %v6303_v54 = vpop.f32.mrb[76].mxu1 }
0x1bc1   :  { %v3128_v11 = vpop.f32.mrb[77].mxu1  ;;  %v3145_v25 = vmul.f32 0.35355338, %v6303_v54 }
0x1bc2   :  { %v3143_v14 = vmul.f32 0.35355338, %v3128_v11  ;;  %v6304_v23 = vpop.f32.mrb[78].mxu1 }
0x1bc3   :  { %v3131_v41 = vpop.f32.mrb[79].mxu1  ;;  %v3146_v13 = vmul.f32 0.35355338, %v6304_v23  ;;  %v3153_v27 = vsel %vm143_vm0, %v3145_v25, -inf }
0x1bc4   :  { %v3144_v61 = vmul.f32 0.35355338, %v3131_v41  ;;  %v3147_v20 = vsel %vm143_vm0, %v3143_v14, -inf }
0x1bc5   :  { %3148 = vmax.xlane.f32.xlu0 %v3147_v20  ;;  %v3156_v48 = vsel %vm143_vm0, %v3146_v13, -inf }
0x1bc6   :  { %v3150_v12 = vsel %vm143_vm0, %v3144_v61, -inf }
0x1bc7   :  { %3151 = vmax.xlane.f32.xlu1 %v3150_v12 }
0x1bc9   :  { %3154 = vmax.xlane.f32.xlu0 %v3153_v27 }
0x1bcd   :  { %3157 = vmax.xlane.f32.xlu0 %v3156_v48 }
0x1bd8   :  { %3195 = vrot.lane.b32.xlu1 %v8044_v18, %s8947_s29 }
0x1c52   :  { %v3149_v62 = vpop.xlane.xlu0 %3148 }
0x1c53   :  { %v3159_v30 = vsub.f32 %v3143_v14, %v3149_v62 }
0x1c54   :  { %v3152_v47 = vpop.xlane.xlu1 %3151 }
0x1c55   :  { %v3163_v58 = vmul.f32 1.442695, %v3159_v30  ;;  %v3160_v15 = vsub.f32 %v3144_v61, %v3152_v47 }
0x1c56   :  { %v3155_v42 = vpop.xlane.xlu0 %3154 }
0x1c57   :  { %v3161_v35 = vsub.f32 %v3145_v25, %v3155_v42  ;;  %v3165_v34 = vmul.f32 1.442695, %v3160_v15 }
0x1c58   :  { %v3196_v7 = vpop.permute.xlu1 %3195 }
0x1c59   :  { %v3167_v60 = vmul.f32 1.442695, %v3161_v35 }
0x1c5a   :  { %v3158_v29 = vpop.xlane.xlu0 %3157 }
0x1c5b   :  { %6959 = vpow2.f32 %v3167_v60  ;;  %v3162_v36 = vsub.f32 %v3146_v13, %v3158_v29 }
0x1c5c   :  { %6961 = vpow2.f32 %v3163_v58 }
0x1c5d   :  { %v3169_v51 = vmul.f32 1.442695, %v3162_v36 }
0x1c5f   :  { %6963 = vpow2.f32 %v3169_v51 }
0x1c60   :  { %6965 = vpow2.f32 %v3165_v34 }
0x1c65   :  { %v6960_v19 = vpop.eup %6959 }
0x1c66   :  { %v3177_v33 = vsel %vm143_vm0, %v6960_v19, 0.0  ;;  %v6962_v18 = vpop.eup %6961 }
0x1c67   :  { %3178 = vadd.xlane.f32.xlu0 %v3177_v33  ;;  %v3171_v3 = vsel %vm143_vm0, %v6962_v18, 0.0 }
0x1c69   :  { %v6964_v28 = vpop.eup %6963 }
0x1c6a   :  { %v3180_v24 = vsel %vm143_vm0, %v6964_v28, 0.0  ;;  %v6966_v1 = vpop.eup %6965 }
0x1c6b   :  { %3172 = vadd.xlane.f32.xlu0 %v3171_v3  ;;  %3181 = vadd.xlane.f32.xlu1 %v3180_v24  ;;  %v3174_v55 = vsel %vm143_vm0, %v6966_v1, 0.0 }
0x1c6f   :  { %3175 = vadd.xlane.f32.xlu1 %v3174_v55 }
0x1c80   :  { %3316 = vrot.lane.b32.xlu1 %v8120_v10, %s7126_s0 }
0x1c81   :  { %3193 = vrot.lane.b32.xlu0 %v8046_v21, %s8947_s29 }
0x1c84   :  { %3318 = vrot.lane.b32.xlu1 %v8118_v16, %s7126_s0  ;;  %s8948_s0 = smov 8  }
0x1cf4   :  { %v3179_v31 = vpop.xlane.xlu0 %3178 }
0x1cf8   :  { %v3173_v37 = vpop.xlane.xlu0 %3172  ;;  %v3182_v17 = vpop.xlane.xlu1 %3181 }
0x1cf9   :  { %6967 = vrcp.f32 %v3182_v17 }
0x1cfa   :  { %6969 = vrcp.f32 %v3173_v37 }
0x1cfb   :  { %6971 = vrcp.f32 %v3179_v31 }
0x1cfc   :  { %v3194_v59 = vpop.permute.xlu0 %3193  ;;  %v3176_v54 = vpop.xlane.xlu1 %3175 }
0x1cfd   :  { %6973 = vrcp.f32 %v3176_v54  ;;  %6305 = vmatprep.subr.bf16.mxu0 %v3194_v59 }
0x1cfe   :  { %6306 = vmatpush3.bf16.msra.mxu0 %v3194_v59 }
0x1cff   :  { %6307 = vmatprep.subr.bf16.mxu0 %v3196_v7 }
0x1d00   :  { %v3317_v11 = vpop.permute.xlu1 %3316 }
0x1d01   :  { %v3327_v48 = vsel %vm231_vm1, %v3317_v11, 0 }
0x1d02   :  { %6308 = vmatpush3.bf16.msra.mxu0 %v3196_v7 }
0x1d03   :  { %6453 = vmatprep.subr.msk.bf16.mxu0 %vm231_vm1, %v3317_v11  ;;  %v6968_v21 = vpop.eup %6967 }
0x1d04   :  { %v6970_v14 = vpop.eup %6969  ;;  %v3190_v25 = vmul.f32 %v6968_v21, %v6964_v28  ;;  %v3319_v62 = vpop.permute.xlu1 %3318 }
0x1d05   :  { %v6972_v23 = vpop.eup %6971  ;;  %v3187_v61 = vmul.f32 %v6970_v14, %v6962_v18  ;;  %v3330_v30 = vsel %vm231_vm1, %v3319_v62, 0 }
0x1d06   :  { %v3189_v12 = vmul.f32 %v6972_v23, %v6960_v19 }
0x1d07   :  { %v6974_v41 = vpop.eup %6973 }
0x1d08   :  { %v3188_v20 = vmul.f32 %v6974_v41, %v6966_v1  ;;  %v3192_v27 = vpack.c.bf16 %v3190_v25, %v3189_v12 }
0x1d0a   :  { %v3191_v13 = vpack.c.bf16 %v3188_v20, %v3187_v61 }
0x1d0c   :  { %6309 = vmatprep.mubr.msk.bf16.mxu0 %vm143_vm0, %v3191_v13 }
0x1d0d   :  { %6310 = vmatmul.mubr.msk.bf16.vlgmr.msra.gmra.mrb[52].mxu0 %vm143_vm0, %v3192_v27 }
0x1d0e   :  { %6314 = vmatpush3.bf16.xpose.msra.mxu0 %v3327_v48  ;;  %6317 = vmatprep.mubr.msk.bf16.mxu0 %vm231_vm1, %v8120_v10 }
0x1d0f   :  { %6454 = vmatprep.subr.msk.bf16.mxu0 %vm231_vm1, %v3319_v62 }
0x1d16   :  { %6316 = vmatpush3.bf16.xpose.msra.mxu0 %v3330_v30 }
0x1d1d   :  { %6318 = vmatmul.mubr.msk.bf16.vlgmr.msra.gmra.mrb[56].mxu0 %vm231_vm1, %v8118_v16 }
0x1de0   :  { %v8307_v47 = vpop.f32.mrb[52].mxu0 }
0x1de1   :  { %v8309_v42 = vpop.f32.mrb[53].mxu0 }
0x1de2   :  { %v8311_v35 = vpop.f32.mrb[54].mxu0 }
0x1de3   :  { %v6564_v58 = vpack.i.bf16 %v8311_v35, %v8307_v47  ;;  %v8315_v15 = vpop.f32.mrb[55].mxu0 }
0x1de4   :  { %v6559_v60 = vpack.i.bf16 %v8315_v15, %v8309_v42 }
0x1df0   :  { %v6319_v29 = vpop.f32.mrb[56].mxu0 }
0x1df1   :  { %v3366_v36 = vpop.f32.mrb[57].mxu0  ;;  %v3383_v33 = vmul.f32 0.35355338, %v6319_v29 }
0x1df2   :  { %v3381_v34 = vmul.f32 0.35355338, %v3366_v36  ;;  %v6320_v51 = vpop.f32.mrb[58].mxu0 }
0x1df3   :  { %v3369_v19 = vpop.f32.mrb[59].mxu0  ;;  %v3384_v24 = vmul.f32 0.35355338, %v6320_v51  ;;  %v3391_v1 = vsel %vm143_vm0, %v3383_v33, -inf }
0x1df4   :  { %v3382_v18 = vmul.f32 0.35355338, %v3369_v19  ;;  %v3385_v28 = vsel %vm143_vm0, %v3381_v34, -inf }
0x1df5   :  { %3386 = vmax.xlane.f32.xlu0 %v3385_v28  ;;  %v3394_v55 = vsel %vm143_vm0, %v3384_v24, -inf }
0x1df6   :  { %v3388_v3 = vsel %vm143_vm0, %v3382_v18, -inf }
0x1df7   :  { %3389 = vmax.xlane.f32.xlu1 %v3388_v3 }
0x1df9   :  { %3392 = vmax.xlane.f32.xlu0 %v3391_v1 }
0x1dfd   :  { %3395 = vmax.xlane.f32.xlu0 %v3394_v55 }
0x1e08   :  { %3433 = vrot.lane.b32.xlu1 %v8118_v16, %s7127_s2 }
0x1e82   :  { %v3387_v7 = vpop.xlane.xlu0 %3386 }
0x1e83   :  { %v3397_v31 = vsub.f32 %v3381_v34, %v3387_v7 }
0x1e84   :  { %v3390_v37 = vpop.xlane.xlu1 %3389 }
0x1e85   :  { %v3401_v54 = vmul.f32 1.442695, %v3397_v31  ;;  %v3398_v11 = vsub.f32 %v3382_v18, %v3390_v37 }
0x1e86   :  { %v3393_v17 = vpop.xlane.xlu0 %3392 }
0x1e87   :  { %v3399_v59 = vsub.f32 %v3383_v33, %v3393_v17  ;;  %v3403_v41 = vmul.f32 1.442695, %v3398_v11 }
0x1e88   :  { %v3434_v29 = vpop.permute.xlu1 %3433 }
0x1e89   :  { %v3405_v21 = vmul.f32 1.442695, %v3399_v59 }
0x1e8a   :  { %v3396_v14 = vpop.xlane.xlu0 %3395 }
0x1e8b   :  { %6975 = vpow2.f32 %v3405_v21  ;;  %v3400_v23 = vsub.f32 %v3384_v24, %v3396_v14 }
0x1e8c   :  { %6977 = vpow2.f32 %v3401_v54 }
0x1e8d   :  { %v3407_v25 = vmul.f32 1.442695, %v3400_v23 }
0x1e8f   :  { %6979 = vpow2.f32 %v3407_v25 }
0x1e90   :  { %6981 = vpow2.f32 %v3403_v41 }
0x1e95   :  { %v6976_v61 = vpop.eup %6975 }
0x1e96   :  { %v3415_v20 = vsel %vm143_vm0, %v6976_v61, 0.0  ;;  %v6978_v12 = vpop.eup %6977 }
0x1e97   :  { %3416 = vadd.xlane.f32.xlu0 %v3415_v20  ;;  %v3409_v27 = vsel %vm143_vm0, %v6978_v12, 0.0 }
0x1e99   :  { %v6980_v13 = vpop.eup %6979 }
0x1e9a   :  { %v3418_v48 = vsel %vm143_vm0, %v6980_v13, 0.0  ;;  %v6982_v62 = vpop.eup %6981 }
0x1e9b   :  { %3410 = vadd.xlane.f32.xlu0 %v3409_v27  ;;  %3419 = vadd.xlane.f32.xlu1 %v3418_v48  ;;  %v3412_v30 = vsel %vm143_vm0, %v6982_v62, 0.0 }
0x1e9f   :  { %3413 = vadd.xlane.f32.xlu1 %v3412_v30 }
0x1eb0   :  { %3496 = vrot.lane.b32.xlu1 %v8120_v10, %s7128_s10 }
0x1eb1   :  { %3431 = vrot.lane.b32.xlu0 %v8120_v10, %s7127_s2  ;;  %s8949_s2 = smov 16  }
0x1eb4   :  { %3498 = vrot.lane.b32.xlu1 %v8118_v16, %s7128_s10  ;;  %s8950_s10 = smov 24  }
0x1eb5   :  { %3492 = vrot.lane.b32.xlu0 %v8120_v10, %s7129_s6 }
0x1eb8   :  { %3494 = vrot.lane.b32.xlu1 %v8118_v16, %s7129_s6 }
0x1f24   :  { %v3417_v36 = vpop.xlane.xlu0 %3416 }
0x1f28   :  { %v3411_v34 = vpop.xlane.xlu0 %3410  ;;  %v3420_v51 = vpop.xlane.xlu1 %3419 }
0x1f29   :  { %6983 = vrcp.f32 %v3420_v51 }
0x1f2a   :  { %6985 = vrcp.f32 %v3411_v34 }
0x1f2b   :  { %6987 = vrcp.f32 %v3417_v36 }
0x1f2c   :  { %v3432_v19 = vpop.permute.xlu0 %3431  ;;  %v3414_v33 = vpop.xlane.xlu1 %3413 }
0x1f2d   :  { %6989 = vrcp.f32 %v3414_v33  ;;  %6321 = vmatprep.subr.bf16.mxu1 %v3432_v19 }
0x1f2e   :  { %6322 = vmatpush3.bf16.msra.mxu1 %v3432_v19 }
0x1f2f   :  { %6323 = vmatprep.subr.bf16.mxu1 %v3434_v29 }
0x1f30   :  { %v3497_v18 = vpop.permute.xlu1 %3496  ;;  %v3493_v54 = vpop.permute.xlu0 %3492 }
0x1f31   :  { %v3507_v11 = vsel %vm231_vm1, %v3497_v18, 0 }
0x1f32   :  { %6324 = vmatpush3.bf16.msra.mxu1 %v3434_v29 }
0x1f33   :  { %6455 = vmatprep.subr.msk.bf16.mxu1 %vm231_vm1, %v3497_v18  ;;  %v6984_v28 = vpop.eup %6983 }
0x1f34   :  { %v6986_v3 = vpop.eup %6985  ;;  %v3428_v55 = vmul.f32 %v6984_v28, %v6980_v13  ;;  %v3499_v21 = vpop.permute.xlu1 %3498 }
0x1f35   :  { %v6988_v24 = vpop.eup %6987  ;;  %v3425_v7 = vmul.f32 %v6986_v3, %v6978_v12  ;;  %v3510_v14 = vsel %vm231_vm1, %v3499_v21, 0 }
0x1f36   :  { %v3427_v37 = vmul.f32 %v6988_v24, %v6976_v61 }
0x1f37   :  { %v6990_v1 = vpop.eup %6989 }
0x1f38   :  { %v3426_v31 = vmul.f32 %v6990_v1, %v6982_v62  ;;  %v3430_v59 = vpack.c.bf16 %v3428_v55, %v3427_v37  ;;  %v3495_v23 = vpop.permute.xlu1 %3494 }
0x1f3a   :  { %v3429_v17 = vpack.c.bf16 %v3426_v31, %v3425_v7 }
0x1f3c   :  { %6325 = vmatprep.mubr.msk.bf16.mxu1 %vm143_vm0, %v3429_v17 }
0x1f3d   :  { %6326 = vmatmul.mubr.msk.bf16.vlgmr.msra.gmra.mrb[80].mxu1 %vm143_vm0, %v3430_v59 }
0x1f3e   :  { %6330 = vmatpush3.bf16.xpose.msra.mxu1 %v3507_v11  ;;  %6333 = vmatprep.mubr.msk.bf16.mxu1 %vm231_vm1, %v3493_v54 }
0x1f3f   :  { %6456 = vmatprep.subr.msk.bf16.mxu1 %vm231_vm1, %v3499_v21 }
0x1f46   :  { %6332 = vmatpush3.bf16.xpose.msra.mxu1 %v3510_v14 }
0x1f4d   :  { %6334 = vmatmul.mubr.msk.bf16.vlgmr.msra.gmra.mrb[84].mxu1 %vm231_vm1, %v3495_v23 }
0x2010   :  { %v8347_v41 = vpop.f32.mrb[80].mxu1 }
0x2011   :  { %v8349_v25 = vpop.f32.mrb[81].mxu1 }
0x2012   :  { %v8351_v61 = vpop.f32.mrb[82].mxu1 }
0x2013   :  { %v8353_v20 = vpop.f32.mrb[83].mxu1 }
0x2020   :  { %v6335_v12 = vpop.f32.mrb[84].mxu1 }
0x2021   :  { %v3546_v13 = vpop.f32.mrb[85].mxu1  ;;  %v3563_v30 = vmul.f32 0.35355338, %v6335_v12 }
0x2022   :  { %v3561_v27 = vmul.f32 0.35355338, %v3546_v13  ;;  %v6336_v48 = vpop.f32.mrb[86].mxu1 }
0x2023   :  { %v3549_v62 = vpop.f32.mrb[87].mxu1  ;;  %v3564_v51 = vmul.f32 0.35355338, %v6336_v48  ;;  %v3571_v19 = vsel %vm143_vm0, %v3563_v30, -inf }
0x2024   :  { %v3562_v29 = vmul.f32 0.35355338, %v3549_v62  ;;  %v3565_v36 = vsel %vm143_vm0, %v3561_v27, -inf }
0x2025   :  { %3566 = vmax.xlane.f32.xlu0 %v3565_v36  ;;  %v3574_v33 = vsel %vm143_vm0, %v3564_v51, -inf }
0x2026   :  { %v3568_v34 = vsel %vm143_vm0, %v3562_v29, -inf }
0x2027   :  { %3569 = vmax.xlane.f32.xlu1 %v3568_v34 }
0x2029   :  { %3572 = vmax.xlane.f32.xlu0 %v3571_v19 }
0x202d   :  { %3575 = vmax.xlane.f32.xlu0 %v3574_v33 }
0x2038   :  { %3613 = vrot.lane.b32.xlu1 %v8118_v16, %s7130_s1 }
0x20b2   :  { %v3567_v18 = vpop.xlane.xlu0 %3566 }
0x20b3   :  { %v3577_v28 = vsub.f32 %v3561_v27, %v3567_v18 }
0x20b4   :  { %v3570_v3 = vpop.xlane.xlu1 %3569 }
0x20b5   :  { %v3581_v55 = vmul.f32 1.442695, %v3577_v28  ;;  %v3578_v7 = vsub.f32 %v3562_v29, %v3570_v3 }
0x20b6   :  { %v3573_v24 = vpop.xlane.xlu0 %3572 }
0x20b7   :  { %v3579_v1 = vsub.f32 %v3563_v30, %v3573_v24  ;;  %v3583_v59 = vmul.f32 1.442695, %v3578_v7 }
0x20b8   :  { %v3614_v62 = vpop.permute.xlu1 %3613 }
0x20b9   :  { %v3585_v31 = vmul.f32 1.442695, %v3579_v1 }
0x20ba   :  { %v3576_v37 = vpop.xlane.xlu0 %3575 }
0x20bb   :  { %6991 = vpow2.f32 %v3585_v31  ;;  %v3580_v17 = vsub.f32 %v3564_v51, %v3576_v37 }
0x20bc   :  { %6993 = vpow2.f32 %v3581_v55 }
0x20bd   :  { %v3587_v54 = vmul.f32 1.442695, %v3580_v17 }
0x20bf   :  { %6995 = vpow2.f32 %v3587_v54 }
0x20c0   :  { %6997 = vpow2.f32 %v3583_v59 }
0x20c5   :  { %v6992_v11 = vpop.eup %6991 }
0x20c6   :  { %v3595_v21 = vsel %vm143_vm0, %v6992_v11, 0.0  ;;  %v6994_v14 = vpop.eup %6993 }
0x20c7   :  { %3596 = vadd.xlane.f32.xlu0 %v3595_v21  ;;  %v3589_v12 = vsel %vm143_vm0, %v6994_v14, 0.0 }
0x20c9   :  { %v6996_v23 = vpop.eup %6995 }
0x20ca   :  { %v3598_v13 = vsel %vm143_vm0, %v6996_v23, 0.0  ;;  %v6998_v27 = vpop.eup %6997 }
0x20cb   :  { %3590 = vadd.xlane.f32.xlu0 %v3589_v12  ;;  %3599 = vadd.xlane.f32.xlu1 %v3598_v13  ;;  %v3592_v48 = vsel %vm143_vm0, %v6998_v27, 0.0 }
0x20cf   :  { %3593 = vadd.xlane.f32.xlu1 %v3592_v48 }
0x20e0   :  { %3676 = vrot.lane.b32.xlu1 %v8120_v10, %s7131_s27 }
0x20e1   :  { %3611 = vrot.lane.b32.xlu0 %v8120_v10, %s7130_s1 }
0x20e4   :  { %3678 = vrot.lane.b32.xlu1 %v8118_v16, %s7131_s27 }
0x20e5   :  { %3672 = vrot.lane.b32.xlu0 %v8120_v10, %s7132_s7 }
0x20e8   :  { %3674 = vrot.lane.b32.xlu1 %v8118_v16, %s7132_s7 }
0x2154   :  { %v3597_v30 = vpop.xlane.xlu0 %3596 }
0x2158   :  { %v3591_v29 = vpop.xlane.xlu0 %3590  ;;  %v3600_v36 = vpop.xlane.xlu1 %3599 }
0x2159   :  { %6999 = vrcp.f32 %v3600_v36 }
0x215a   :  { %7001 = vrcp.f32 %v3591_v29 }
0x215b   :  { %7003 = vrcp.f32 %v3597_v30 }
0x215c   :  { %v3612_v34 = vpop.permute.xlu0 %3611  ;;  %v3594_v51 = vpop.xlane.xlu1 %3593 }
0x215d   :  { %7005 = vrcp.f32 %v3594_v51  ;;  %6337 = vmatprep.subr.bf16.mxu0 %v3612_v34 }
0x215e   :  { %6338 = vmatpush3.bf16.msra.mxu0 %v3612_v34 }
0x215f   :  { %6339 = vmatprep.subr.bf16.mxu0 %v3614_v62 }
0x2160   :  { %v3677_v19 = vpop.permute.xlu1 %3676  ;;  %v3673_v17 = vpop.permute.xlu0 %3672 }
0x2161   :  { %v3687_v59 = vsel %vm231_vm1, %v3677_v19, 0 }
0x2162   :  { %6340 = vmatpush3.bf16.msra.mxu0 %v3614_v62 }
0x2163   :  { %6457 = vmatprep.subr.msk.bf16.mxu0 %vm231_vm1, %v3677_v19  ;;  %v7000_v33 = vpop.eup %6999 }
0x2164   :  { %v7002_v18 = vpop.eup %7001  ;;  %v3608_v24 = vmul.f32 %v7000_v33, %v6996_v23  ;;  %v3679_v54 = vpop.permute.xlu1 %3678 }
0x2165   :  { %v7004_v28 = vpop.eup %7003  ;;  %v3605_v1 = vmul.f32 %v7002_v18, %v6994_v14  ;;  %v3690_v21 = vsel %vm231_vm1, %v3679_v54, 0 }
0x2166   :  { %v3607_v7 = vmul.f32 %v7004_v28, %v6992_v11 }
0x2167   :  { %v7006_v3 = vpop.eup %7005 }
0x2168   :  { %v3606_v55 = vmul.f32 %v7006_v3, %v6998_v27  ;;  %v3610_v37 = vpack.c.bf16 %v3608_v24, %v3607_v7  ;;  %v3675_v14 = vpop.permute.xlu1 %3674 }
0x216a   :  { %v3609_v31 = vpack.c.bf16 %v3606_v55, %v3605_v1 }
0x216c   :  { %6341 = vmatprep.mubr.msk.bf16.mxu0 %vm143_vm0, %v3609_v31 }
0x216d   :  { %6342 = vmatmul.mubr.msk.bf16.vlgmr.msra.gmra.mrb[60].mxu0 %vm143_vm0, %v3610_v37 }
0x216e   :  { %6346 = vmatpush3.bf16.xpose.msra.mxu0 %v3687_v59  ;;  %6349 = vmatprep.mubr.msk.bf16.mxu0 %vm231_vm1, %v3673_v17 }
0x216f   :  { %6458 = vmatprep.subr.msk.bf16.mxu0 %vm231_vm1, %v3679_v54 }
0x2176   :  { %6348 = vmatpush3.bf16.xpose.msra.mxu0 %v3690_v21 }
0x217d   :  { %6350 = vmatmul.mubr.msk.bf16.vlgmr.msra.gmra.mrb[64].mxu0 %vm231_vm1, %v3675_v14 }
0x2240   :  { %v8383_v11 = vpop.f32.mrb[60].mxu0 }
0x2241   :  { %v8385_v23 = vpop.f32.mrb[61].mxu0 }
0x2242   :  { %v8387_v12 = vpop.f32.mrb[62].mxu0 }
0x2243   :  { %v6574_v13 = vpack.i.bf16 %v8387_v12, %v8383_v11  ;;  %v8391_v27 = vpop.f32.mrb[63].mxu0 }
0x2244   :  { %v6569_v48 = vpack.i.bf16 %v8391_v27, %v8385_v23 }
0x2250   :  { %v6351_v62 = vpop.f32.mrb[64].mxu0 }
0x2251   :  { %v3726_v30 = vpop.f32.mrb[65].mxu0  ;;  %v3743_v51 = vmul.f32 0.35355338, %v6351_v62 }
0x2252   :  { %v3741_v29 = vmul.f32 0.35355338, %v3726_v30  ;;  %v6352_v36 = vpop.f32.mrb[66].mxu0 }
0x2253   :  { %v3729_v34 = vpop.f32.mrb[67].mxu0  ;;  %v3744_v28 = vmul.f32 0.35355338, %v6352_v36  ;;  %v3751_v3 = vsel %vm143_vm0, %v3743_v51, -inf }
0x2254   :  { %v3742_v19 = vmul.f32 0.35355338, %v3729_v34  ;;  %v3745_v33 = vsel %vm143_vm0, %v3741_v29, -inf }
0x2255   :  { %3746 = vmax.xlane.f32.xlu0 %v3745_v33  ;;  %v3754_v24 = vsel %vm143_vm0, %v3744_v28, -inf }
0x2256   :  { %v3748_v18 = vsel %vm143_vm0, %v3742_v19, -inf }
0x2257   :  { %3749 = vmax.xlane.f32.xlu1 %v3748_v18 }
0x2259   :  { %3752 = vmax.xlane.f32.xlu0 %v3751_v3 }
0x225d   :  { %3755 = vmax.xlane.f32.xlu0 %v3754_v24 }
0x2268   :  { %3793 = vrot.lane.b32.xlu1 %v8118_v16, %s8944_s30 }
0x22e2   :  { %v3747_v1 = vpop.xlane.xlu0 %3746 }
0x22e3   :  { %v3757_v55 = vsub.f32 %v3741_v29, %v3747_v1 }
0x22e4   :  { %v3750_v7 = vpop.xlane.xlu1 %3749 }
0x22e5   :  { %v3761_v17 = vmul.f32 1.442695, %v3757_v55  ;;  %v3758_v59 = vsub.f32 %v3742_v19, %v3750_v7 }
0x22e6   :  { %v3753_v31 = vpop.xlane.xlu0 %3752 }
0x22e7   :  { %v3759_v37 = vsub.f32 %v3743_v51, %v3753_v31  ;;  %v3763_v62 = vmul.f32 1.442695, %v3758_v59 }
0x22e8   :  { %v3794_v3 = vpop.permute.xlu1 %3793 }
0x22e9   :  { %v3765_v54 = vmul.f32 1.442695, %v3759_v37 }
0x22ea   :  { %v3756_v21 = vpop.xlane.xlu0 %3755 }
0x22eb   :  { %7007 = vpow2.f32 %v3765_v54  ;;  %v3760_v14 = vsub.f32 %v3744_v28, %v3756_v21 }
0x22ec   :  { %7009 = vpow2.f32 %v3761_v17 }
0x22ed   :  { %v3767_v30 = vmul.f32 1.442695, %v3760_v14 }
0x22ef   :  { %7011 = vpow2.f32 %v3767_v30 }
0x22f0   :  { %7013 = vpow2.f32 %v3763_v62 }
0x22f5   :  { %v7008_v36 = vpop.eup %7007 }
0x22f6   :  { %v3775_v34 = vsel %vm143_vm0, %v7008_v36, 0.0  ;;  %v7010_v33 = vpop.eup %7009 }
0x22f7   :  { %3776 = vadd.xlane.f32.xlu0 %v3775_v34  ;;  %v3769_v18 = vsel %vm143_vm0, %v7010_v33, 0.0 }
0x22f9   :  { %v7012_v29 = vpop.eup %7011 }
0x22fa   :  { %v3778_v51 = vsel %vm143_vm0, %v7012_v29, 0.0  ;;  %v7014_v19 = vpop.eup %7013 }
0x22fb   :  { %3770 = vadd.xlane.f32.xlu0 %v3769_v18  ;;  %3779 = vadd.xlane.f32.xlu1 %v3778_v51  ;;  %v3772_v28 = vsel %vm143_vm0, %v7014_v19, 0.0 }
0x22ff   :  { %3773 = vadd.xlane.f32.xlu1 %v3772_v28 }
0x2310   :  { %3856 = vrot.lane.b32.xlu1 %v8120_v10, %s8945_s5 }
0x2311   :  { %3791 = vrot.lane.b32.xlu0 %v8120_v10, %s8944_s30 }
0x2314   :  { %3858 = vrot.lane.b32.xlu1 %v8118_v16, %s8945_s5 }
0x2315   :  { %3852 = vrot.lane.b32.xlu0 %v8120_v10, %s8946_s9 }
0x2318   :  { %3854 = vrot.lane.b32.xlu1 %v8118_v16, %s8946_s9 }
0x2384   :  { %v3777_v24 = vpop.xlane.xlu0 %3776 }
0x2388   :  { %v3771_v1 = vpop.xlane.xlu0 %3770  ;;  %v3780_v55 = vpop.xlane.xlu1 %3779 }
0x2389   :  { %7015 = vrcp.f32 %v3780_v55 }
0x238a   :  { %7017 = vrcp.f32 %v3771_v1 }
0x238b   :  { %7019 = vrcp.f32 %v3777_v24 }
0x238c   :  { %v3792_v7 = vpop.permute.xlu0 %3791  ;;  %v3774_v31 = vpop.xlane.xlu1 %3773 }
0x238d   :  { %7021 = vrcp.f32 %v3774_v31  ;;  %6353 = vmatprep.subr.bf16.mxu1 %v3792_v7 }
0x238e   :  { %6354 = vmatpush3.bf16.msra.mxu1 %v3792_v7 }
0x238f   :  { %6355 = vmatprep.subr.bf16.mxu1 %v3794_v3 }
0x2390   :  { %v3857_v37 = vpop.permute.xlu1 %3856  ;;  %v3853_v28 = vpop.permute.xlu0 %3852 }
0x2391   :  { %v3867_v24 = vsel %vm231_vm1, %v3857_v37, 0 }
0x2392   :  { %6356 = vmatpush3.bf16.msra.mxu1 %v3794_v3 }
0x2393   :  { %6459 = vmatprep.subr.msk.bf16.mxu1 %vm231_vm1, %v3857_v37  ;;  %v7016_v17 = vpop.eup %7015 }
0x2394   :  { %v7018_v59 = vpop.eup %7017  ;;  %v3788_v14 = vmul.f32 %v7016_v17, %v7012_v29  ;;  %v3859_v3 = vpop.permute.xlu1 %3858 }
0x2395   :  { %v7020_v54 = vpop.eup %7019  ;;  %v3785_v62 = vmul.f32 %v7018_v59, %v7010_v33  ;;  %v3870_v29 = vsel %vm231_vm1, %v3859_v3, 0 }
0x2396   :  { %v3787_v34 = vmul.f32 %v7020_v54, %v7008_v36 }
0x2397   :  { %v7022_v21 = vpop.eup %7021 }
0x2398   :  { %v3786_v30 = vmul.f32 %v7022_v21, %v7014_v19  ;;  %v3790_v51 = vpack.c.bf16 %v3788_v14, %v3787_v34  ;;  %v3855_v33 = vpop.permute.xlu1 %3854 }
0x239a   :  { %v3789_v18 = vpack.c.bf16 %v3786_v30, %v3785_v62 }
0x239c   :  { %6357 = vmatprep.mubr.msk.bf16.mxu1 %vm143_vm0, %v3789_v18 }
0x239d   :  { %6358 = vmatmul.mubr.msk.bf16.vlgmr.msra.gmra.mrb[88].mxu1 %vm143_vm0, %v3790_v51 }
0x239e   :  { %6362 = vmatpush3.bf16.xpose.msra.mxu1 %v3867_v24  ;;  %6365 = vmatprep.mubr.msk.bf16.mxu1 %vm231_vm1, %v3853_v28 }
0x239f   :  { %6460 = vmatprep.subr.msk.bf16.mxu1 %vm231_vm1, %v3859_v3 }
0x23a6   :  { %6364 = vmatpush3.bf16.xpose.msra.mxu1 %v3870_v29 }
0x23ad   :  { %6366 = vmatmul.mubr.msk.bf16.vlgmr.msra.gmra.mrb[92].mxu1 %vm231_vm1, %v3855_v33 }
0x2470   :  { %v6359_v36 = vpop.f32.mrb[88].mxu1 }
0x2471   :  { %v3837_v19 = vpop.f32.mrb[89].mxu1 }
0x2472   :  { %v6360_v1 = vpop.f32.mrb[90].mxu1 }
0x2473   :  { %v6584_v55 = vpack.i.bf16 %v6360_v1, %v6359_v36  ;;  %v3840_v7 = vpop.f32.mrb[91].mxu1 }
0x2474   :  { %v6579_v31 = vpack.i.bf16 %v3840_v7, %v3837_v19 }
0x2480   :  { %v6367_v37 = vpop.f32.mrb[92].mxu1 }
0x2481   :  { %v3906_v17 = vpop.f32.mrb[93].mxu1  ;;  %v3923_v14 = vmul.f32 0.35355338, %v6367_v37 }
0x2482   :  { %v3921_v59 = vmul.f32 0.35355338, %v3906_v17  ;;  %v6368_v54 = vpop.f32.mrb[94].mxu1 }
0x2483   :  { %v3909_v21 = vpop.f32.mrb[95].mxu1  ;;  %v3924_v18 = vmul.f32 0.35355338, %v6368_v54  ;;  %v3931_v51 = vsel %vm143_vm0, %v3923_v14, -inf }
0x2484   :  { %v3922_v62 = vmul.f32 0.35355338, %v3909_v21  ;;  %v3925_v30 = vsel %vm143_vm0, %v3921_v59, -inf }
0x2485   :  { %3926 = vmax.xlane.f32.xlu0 %v3925_v30  ;;  %v3934_v28 = vsel %vm143_vm0, %v3924_v18, -inf }
0x2486   :  { %v3928_v34 = vsel %vm143_vm0, %v3922_v62, -inf }
0x2487   :  { %3929 = vmax.xlane.f32.xlu1 %v3928_v34 }
0x2489   :  { %3932 = vmax.xlane.f32.xlu0 %v3931_v51 }
0x248d   :  { %3935 = vmax.xlane.f32.xlu0 %v3934_v28 }
0x2512   :  { %v3927_v24 = vpop.xlane.xlu0 %3926 }
0x2513   :  { %v3937_v3 = vsub.f32 %v3921_v59, %v3927_v24 }
0x2514   :  { %v3930_v29 = vpop.xlane.xlu1 %3929 }
0x2515   :  { %v3941_v19 = vmul.f32 1.442695, %v3937_v3  ;;  %v3938_v1 = vsub.f32 %v3922_v62, %v3930_v29 }
0x2516   :  { %v3933_v33 = vpop.xlane.xlu0 %3932 }
0x2517   :  { %v3939_v36 = vsub.f32 %v3923_v14, %v3933_v33  ;;  %v3943_v21 = vmul.f32 1.442695, %v3938_v1 }
0x2519   :  { %v3945_v7 = vmul.f32 1.442695, %v3939_v36 }
0x251a   :  { %v3936_v37 = vpop.xlane.xlu0 %3935 }
0x251b   :  { %7023 = vpow2.f32 %v3945_v7  ;;  %v3940_v17 = vsub.f32 %v3924_v18, %v3936_v37 }
0x251c   :  { %7025 = vpow2.f32 %v3941_v19 }
0x251d   :  { %v3947_v54 = vmul.f32 1.442695, %v3940_v17 }
0x251f   :  { %7027 = vpow2.f32 %v3947_v54 }
0x2520   :  { %7029 = vpow2.f32 %v3943_v21 }
0x2525   :  { %v7024_v30 = vpop.eup %7023 }
0x2526   :  { %v3955_v34 = vsel %vm143_vm0, %v7024_v30, 0.0  ;;  %v7026_v51 = vpop.eup %7025 }
0x2527   :  { %3956 = vadd.xlane.f32.xlu0 %v3955_v34  ;;  %v3949_v28 = vsel %vm143_vm0, %v7026_v51, 0.0 }
0x2529   :  { %v7028_v59 = vpop.eup %7027 }
0x252a   :  { %v3958_v14 = vsel %vm143_vm0, %v7028_v59, 0.0  ;;  %v7030_v62 = vpop.eup %7029 }
0x252b   :  { %3950 = vadd.xlane.f32.xlu0 %v3949_v28  ;;  %3959 = vadd.xlane.f32.xlu1 %v3958_v14  ;;  %v3952_v18 = vsel %vm143_vm0, %v7030_v62, 0.0 }
0x252f   :  { %3953 = vadd.xlane.f32.xlu1 %v3952_v18 }
0x2540   :  { %3973 = vrot.lane.b32.xlu1 %v8118_v16, %s8947_s29 }
0x2541   :  { %3971 = vrot.lane.b32.xlu0 %v8120_v10, %s8947_s29 }
0x2544   :  { %6540 = vrot.lane.b32.xlu1 %v6539_v8, %s8948_s0 }
0x2545   :  { %6550 = vrot.lane.b32.xlu0 %v6549_v32, %s8949_s2 }
0x2548   :  { %6545 = vrot.lane.b32.xlu1 %v6544_v53, %s8948_s0  ;;  %v6615_v53 = vld [vmem:[%s8887_s12] sm:$0xff]  }
0x2549   :  { %6560 = vrot.lane.b32.xlu0 %v6559_v60, %s8950_s10 }
0x254c   :  { %6555 = vrot.lane.b32.xlu1 %v6554_v4, %s8949_s2 }
0x254d   :  { %6570 = vrot.lane.b32.xlu0 %v6569_v48, %s8948_s0 }
0x2550   :  { %6565 = vrot.lane.b32.xlu1 %v6564_v58, %s8950_s10 }
0x2551   :  { %6580 = vrot.lane.b32.xlu0 %v6579_v31, %s8949_s2 }
0x2554   :  { %6575 = vrot.lane.b32.xlu1 %v6574_v13, %s8948_s0 }
0x2558   :  { %6585 = vrot.lane.b32.xlu1 %v6584_v55, %s8949_s2 }
0x25b4   :  { %v3957_v16 = vpop.xlane.xlu0 %3956 }
0x25b8   :  { %v3951_v10 = vpop.xlane.xlu0 %3950  ;;  %v3960_v40 = vpop.xlane.xlu1 %3959 }
0x25b9   :  { %7031 = vrcp.f32 %v3951_v10 }
0x25ba   :  { %7033 = vrcp.f32 %v3960_v40 }
0x25bb   :  { %7035 = vrcp.f32 %v3957_v16 }
0x25bc   :  { %v3972_v56 = vpop.permute.xlu0 %3971  ;;  %v3954_v6 = vpop.xlane.xlu1 %3953 }
0x25bd   :  { %7037 = vrcp.f32 %v3954_v6  ;;  %6369 = vmatprep.subr.bf16.mxu0 %v3972_v56 }
0x25be   :  { %6370 = vmatpush3.bf16.msra.mxu0 %v3972_v56 }
0x25c0   :  { %v6551_v5 = vpop.permute.xlu0 %6550  ;;  %v3974_v8 = vpop.permute.xlu1 %3973 }
0x25c1   :  { %6371 = vmatprep.subr.bf16.mxu0 %v3974_v8  ;;  %v6553_v47 = vunpack.i.h.bf16 %v6551_v5  ;;  %v6552_v42 = vunpack.i.l.bf16 %v6551_v5 }
0x25c2   :  { %6372 = vmatpush3.bf16.msra.mxu0 %v3974_v8 }
0x25c3   :  { %v7032_v0 = vpop.eup %7031  ;;  %6377 = vmatprep.subr.bf16.mxu0 %v6615_v53 }
0x25c4   :  { %v7034_v2 = vpop.eup %7033  ;;  %v6561_v43 = vpop.permute.xlu0 %6560  ;;  %v3965_v23 = vmul.f32 %v7032_v0, %v7026_v51  ;;  %v8500_v0 = vld [vmem:[%s8888_s13] ss:$0 sm:$0xff] }
0x25c5   :  { %v6541_v4 = vpop.permute.xlu1 %6540  ;;  %v7036_v32 = vpop.eup %7035  ;;  %v3968_v15 = vmul.f32 %v7034_v2, %v7028_v59  ;;  %v6563_v60 = vunpack.i.h.bf16 %v6561_v43  ;;  %v6562_v12 = vunpack.i.l.bf16 %v6561_v43 }
0x25c6   :  { %v6543_v63 = vunpack.i.h.bf16 %v6541_v4  ;;  %v6542_v35 = vunpack.i.l.bf16 %v6541_v4  ;;  %v3967_v31 = vmul.f32 %v7036_v32, %v7024_v30 }
0x25c7   :  { %v7038_v58 = vpop.eup %7037 }
0x25c8   :  { %v3303_v11 = vsel %vm231_vm1, %v8255_v26, %v6543_v63  ;;  %v3302_v27 = vsel %vm231_vm1, %v8251_v9, %v6542_v35  ;;  %v3966_v55 = vmul.f32 %v7038_v58, %v7030_v62  ;;  %v3970_v36 = vpack.c.bf16 %v3968_v15, %v3967_v31  ;;  %v6616_v26 = vld [vmem:[%s8887_s12 + $0x8] sm:$0xff]  }
0x25c9   :  { %v3307_v13 = vsel %vm996_vm2, %v3303_v11, %v6553_v47  ;;  %v6546_v48 = vpop.permute.xlu1 %6545  ;;  %v3306_v24 = vsel %vm996_vm2, %v3302_v27, %v6552_v42 }
0x25ca   :  { %v3969_v3 = vpack.c.bf16 %v3966_v55, %v3965_v23  ;;  %v3310_v29 = vsel %vm1001_vm3, %v3306_v24, %v6562_v12  ;;  %v3311_v33 = vsel %vm1001_vm3, %v3307_v13, %v6563_v60  ;;  %v6548_v9 = vunpack.i.h.bf16 %v6546_v48  ;;  %v6618_v55 = vld [vmem:[%s8891_s16 + $0x8] sm:$0xff]   ;;  %v6571_v24 = vpop.permute.xlu0 %6570 }
0x25cb   :  { %v4092_v19 = vpack.c.bf16 %v3311_v33, %v3310_v29  ;;  %v6547_v7 = vunpack.i.l.bf16 %v6546_v48  ;;  %v6617_v48 = vld [vmem:[%s8891_s16] sm:$0xff]   ;;  %v6573_v29 = vunpack.i.h.bf16 %v6571_v24  ;;  %v6572_v33 = vunpack.i.l.bf16 %v6571_v24  ;;  %s5612_s16 = sshll.u32 %s7140_s3, 4  ;;  %s5613_s16 = int_to_ptr.vmem [resolvable:$true] %s5612_s16 }
0x25cc   :  { %6373 = vmatprep.mubr.msk.bf16.mxu0 %vm143_vm0, %v3969_v3  ;;  %v3305_v54 = vsel %vm231_vm1, %v8253_v38, %v6548_v9  ;;  %6389 = vmatprep.subr.bf16.mxu1 %v6617_v48  ;;  %s7097_s28 = scalar_lea.vmem %s5613_s16, 32  ;;  %p7102_p9 = scmp.lt.s32.totalorder %s5613_s16, %s5613_s16 }
0x25cd   :  { %v6556_v1 = vpop.permute.xlu1 %6555  ;;  %6374 = vmatmul.mubr.msk.bf16.vlgmr.msra.gmra.mrb[68].mxu0 %vm143_vm0, %v3970_v36  ;;  %v3304_v30 = vsel %vm231_vm1, %v8249_v39, %v6547_v7  ;;  %6390 = vmatpush3.bf16.msra.mxu1 %v6617_v48  ;;  %p7098_p8 = scmp.ne.s32.totalorder %s5613_s16, %s7097_s28  ;;  %p7103_p10 = scmp.lt.s32.totalorder %s7097_s28, %s7097_s28 }
0x25ce   :  { %v6558_v37 = vunpack.i.h.bf16 %v6556_v1  ;;  %v6557_v17 = vunpack.i.l.bf16 %v6556_v1  ;;  %6381 = vmatprep.mubr.msk.bf16.mxu0 %vm143_vm0, %v4092_v19  ;;  %6378 = vmatpush3.bf16.msra.mxu0 %v6615_v53  ;;  %v6581_v36 = vpop.permute.xlu0 %6580 }
0x25cf   :  { %6379 = vmatprep.subr.bf16.mxu0 %v6616_v26  ;;  %6391 = vmatprep.subr.bf16.mxu1 %v6618_v55  ;;  %v6583_v7 = vunpack.i.h.bf16 %v6581_v36  ;;  %p7104_p11 = por %p7103_p10, %p7102_p9 }
0x25d0   :  { %v3308_v59 = vsel %vm996_vm2, %v3304_v30, %v6557_v17  ;;  %v3309_v28 = vsel %vm996_vm2, %v3305_v54, %v6558_v37  ;;  %v6582_v37 = vunpack.i.l.bf16 %v6581_v36  ;;  %v4081_v17 = vsel %vm231_vm1, %v8353_v20, %v6573_v29 }
0x25d1   :  { %v6566_v21 = vpop.permute.xlu1 %6565  ;;  %6392 = vmatpush3.bf16.msra.mxu1 %v6618_v55  ;;  %p7105_p12 = pnand %p7104_p11, %p7098_p8 }
0x25d2   :  { %v6568_v34 = vunpack.i.h.bf16 %v6566_v21  ;;  %v6567_v51 = vunpack.i.l.bf16 %v6566_v21  ;;  %6380 = vmatpush3.bf16.msra.mxu0 %v6616_v26  ;;  %v4080_v21 = vsel %vm231_vm1, %v8349_v25, %v6572_v33  ;;  %v4085_v25 = vsel %vm996_vm2, %v4081_v17, %v6583_v7 }
0x25d3   :  { %v4084_v20 = vsel %vm996_vm2, %v4080_v21, %v6582_v37 }
0x25d4   :  { %v3312_v14 = vsel %vm1001_vm3, %v3308_v59, %v6567_v51  ;;  %v3313_v62 = vsel %vm1001_vm3, %v3309_v28, %v6568_v34 }
0x25d5   :  { %v4093_v18 = vpack.c.bf16 %v3313_v62, %v3312_v14  ;;  %v6576_v31 = vpop.permute.xlu1 %6575 }
0x25d6   :  { %v6578_v19 = vunpack.i.h.bf16 %v6576_v31  ;;  %v6577_v26 = vunpack.i.l.bf16 %v6576_v31 }
0x25d7   :  { %6382 = vmatmul.mubr.msk.bf16.vlgmr.msra.gmra.mrb[72].mxu0 %vm143_vm0, %v4093_v18 }
0x25d8   :  { %v4083_v30 = vsel %vm231_vm1, %v8351_v61, %v6578_v19  ;;  %v4082_v34 = vsel %vm231_vm1, %v8347_v41, %v6577_v26 }
0x25d9   :  { %v6586_v3 = vpop.permute.xlu1 %6585 }
0x25da   :  { %v6588_v1 = vunpack.i.h.bf16 %v6586_v3  ;;  %v6587_v9 = vunpack.i.l.bf16 %v6586_v3 }
0x25dc   :  { %v4086_v14 = vsel %vm996_vm2, %v4082_v34, %v6587_v9  ;;  %v4087_v62 = vsel %vm996_vm2, %v4083_v30, %v6588_v1  ;;  %v8569_v30 = vld [vmem:[%s8889_s14] ss:$0 sm:$0xff] }
0x26a0   :  { %v6375_v16 = vpop.f32.mrb[68].mxu0 }
0x26a1   :  { %v4017_v10 = vpop.f32.mrb[69].mxu0 }
0x26a2   :  { %v6376_v38 = vpop.f32.mrb[70].mxu0 }
0x26a3   :  { %v6594_v40 = vpack.i.bf16 %v6376_v38, %v6375_v16  ;;  %v4020_v56 = vpop.f32.mrb[71].mxu0 }
0x26a4   :  { %v6589_v39 = vpack.i.bf16 %v4020_v56, %v4017_v10 }
0x26a5   :  { %6595 = vrot.lane.b32.xlu1 %v6594_v40, %s8950_s10 }
0x26a6   :  { %6590 = vrot.lane.b32.xlu0 %v6589_v39, %s8950_s10 }
0x26aa   :  { %v6383_v6 = vpop.f32.mrb[72].mxu0 }
0x26ab   :  { %v4165_v53 = vpop.f32.mrb[73].mxu0  ;;  %v4174_v2 = vadd.f32 %v6383_v6, %v8500_v0 }
0x26ac   :  { %v6384_v5 = vpop.f32.mrb[74].mxu0  ;;  %v4166_v4 = vadd.f32 %v8500_v0, %v4165_v53 }
0x26ad   :  { %v4168_v8 = vpop.f32.mrb[75].mxu0  ;;  %v8504_v43 = vadd.f32 %v4174_v2, %v8004_v52  ;;  %v4177_v63 = vadd.f32 %v6384_v5, %v8500_v0 }
0x26ae   :  { %v4169_v32 = vadd.f32 %v8500_v0, %v4168_v8  ;;  %v8510_v47 = vadd.f32 %v4166_v4, %v7994_v57 }
0x26af   :  { %v8513_v42 = vadd.f32 %v4177_v63, %v8007_v49  ;;  %v4212_v58 = vsel %vm143_vm0, %v8504_v43, 0.0  ;;  %v4240_v11 = vmul.f32 %v8504_v43, %v8504_v43 }
0x26b0   :  { %v8516_v35 = vadd.f32 %v4169_v32, %v7997_v50  ;;  %v4206_v15 = vsel %vm143_vm0, %v8510_v47, 0.0  ;;  %v4238_v13 = vmul.f32 %v8510_v47, %v8510_v47 }
0x26b1   :  { %v4241_v57 = vmul.f32 %v8513_v42, %v8513_v42  ;;  %v4215_v50 = vsel %vm143_vm0, %v8513_v42, 0.0  ;;  %v4252_v12 = vsel %vm143_vm0, %v4240_v11, 0.0 }
0x26b2   :  { %v4209_v52 = vsel %vm143_vm0, %v8516_v35, 0.0  ;;  %v4239_v60 = vmul.f32 %v8516_v35, %v8516_v35  ;;  %v4246_v27 = vsel %vm143_vm0, %v4238_v13, 0.0 }
0x26b3   :  { %v4255_v49 = vsel %vm143_vm0, %v4241_v57, 0.0 }
0x26b4   :  { %v4249_v23 = vsel %vm143_vm0, %v4239_v60, 0.0 }
0x26c5   :  { %4213 = vadd.xlane.f32.xlu0 %v4212_v58 }
0x26c9   :  { %4210 = vadd.xlane.f32.xlu1 %v4209_v52  ;;  %4207 = vadd.xlane.f32.xlu0 %v4206_v15 }
0x26cd   :  { %4256 = vadd.xlane.f32.xlu1 %v4255_v49  ;;  %4216 = vadd.xlane.f32.xlu0 %v4215_v50 }
0x26d1   :  { %4250 = vadd.xlane.f32.xlu1 %v4249_v23  ;;  %4253 = vadd.xlane.f32.xlu0 %v4252_v12 }
0x26d5   :  { %4247 = vadd.xlane.f32.xlu0 %v4246_v27 }
0x2717   :  { %v6596_v54 = vpop.permute.xlu1 %6595 }
0x2718   :  { %v6598_v51 = vunpack.i.h.bf16 %v6596_v54  ;;  %v6597_v59 = vunpack.i.l.bf16 %v6596_v54  ;;  %v6591_v28 = vpop.permute.xlu0 %6590 }
0x2719   :  { %v6593_v18 = vunpack.i.h.bf16 %v6591_v28  ;;  %v6592_v16 = vunpack.i.l.bf16 %v6591_v28 }
0x271a   :  { %v4090_v10 = vsel %vm1001_vm3, %v4086_v14, %v6597_v59  ;;  %v4091_v61 = vsel %vm1001_vm3, %v4087_v62, %v6598_v51 }
0x271b   :  { %v4095_v38 = vpack.c.bf16 %v4091_v61, %v4090_v10  ;;  %v4089_v41 = vsel %vm1001_vm3, %v4085_v25, %v6593_v18  ;;  %v4088_v40 = vsel %vm1001_vm3, %v4084_v20, %v6592_v16  ;;  %v6619_v25 = vld [vmem:[%s8892_s17] sm:$0xff]   ;;  %v6620_v10 = vld [vmem:[%s8892_s17 + $0x8] sm:$0xff]   ;;  %v6621_v61 = vld [vmem:[%s8892_s17 + $0x10] sm:$0xff]  }
0x271c   :  { %v4094_v56 = vpack.c.bf16 %v4089_v41, %v4088_v40  ;;  %6401 = vmatprep.subr.bf16.mxu0 %v6619_v25  ;;  %v6623_v41 = vld [vmem:[%s8892_s17 + $0x20] sm:$0xff]   ;;  %v6624_v40 = vld [vmem:[%s8892_s17 + $0x28] sm:$0xff]  }
0x271d   :  { %6402 = vmatpush3.bf16.msra.mxu0 %v6619_v25 }
0x271e   :  { %6385 = vmatprep.mubr.msk.bf16.mxu0 %vm143_vm0, %v4094_v56  ;;  %6403 = vmatprep.subr.bf16.mxu0 %v6620_v10  ;;  %v6625_v56 = vld [vmem:[%s8892_s17 + $0x30] sm:$0xff]  }
0x271f   :  { %6386 = vmatmul.mubr.msk.bf16.gmra.mrb[76].mxu0 %vm143_vm0, %v4095_v38  ;;  %v6622_v38 = vld [vmem:[%s8892_s17 + $0x18] sm:$0xff]  }
0x2721   :  { %6404 = vmatpush3.bf16.msra.mxu0 %v6620_v10 }
0x2722   :  { %6405 = vmatprep.subr.bf16.mxu0 %v6621_v61 }
0x2725   :  { %6406 = vmatpush3.bf16.msra.mxu0 %v6621_v61 }
0x2726   :  { %6407 = vmatprep.subr.bf16.mxu0 %v6622_v38 }
0x2729   :  { %6408 = vmatpush3.bf16.msra.mxu0 %v6622_v38 }
0x272a   :  { %6409 = vmatprep.subr.bf16.mxu0 %v6623_v41 }
0x272d   :  { %6410 = vmatpush3.bf16.msra.mxu0 %v6623_v41 }
0x272e   :  { %6411 = vmatprep.subr.bf16.mxu0 %v6624_v40 }
0x2731   :  { %6412 = vmatpush3.bf16.msra.mxu0 %v6624_v40 }
0x2732   :  { %6413 = vmatprep.subr.bf16.mxu0 %v6625_v56 }
0x2735   :  { %6414 = vmatpush3.bf16.msra.mxu0 %v6625_v56 }
0x2752   :  { %v4214_v39 = vpop.xlane.xlu0 %4213 }
0x2753   :  { %v4232_v5 = vmul.f32 0.03125, %v4214_v39  ;;  %v6626_v39 = vld [vmem:[%s8892_s17 + $0x38] sm:$0xff]  }
0x2754   :  { %6415 = vmatprep.subr.bf16.mxu0 %v6626_v39 }
0x2755   :  { %v4280_v52 = vmul.f32 %v4232_v5, %v4232_v5  ;;  %v4296_v1 = vsub.f32 %v8504_v43, %v4232_v5  ;;  %6416 = vmatpush3.bf16.msra.mxu0 %v6626_v39 }
0x2756   :  { %v4211_v6 = vpop.xlane.xlu1 %4210  ;;  %v4208_v53 = vpop.xlane.xlu0 %4207 }
0x2757   :  { %v4231_v4 = vmul.f32 0.03125, %v4211_v6  ;;  %v4230_v15 = vmul.f32 0.03125, %v4208_v53 }
0x2759   :  { %v4279_v50 = vmul.f32 %v4231_v4, %v4231_v4  ;;  %v4278_v55 = vmul.f32 %v4230_v15, %v4230_v15  ;;  %v4295_v19 = vsub.f32 %v8516_v35, %v4231_v4  ;;  %v4294_v54 = vsub.f32 %v8510_v47, %v4230_v15 }
0x275a   :  { %v4257_v8 = vpop.xlane.xlu1 %4256  ;;  %v4217_v2 = vpop.xlane.xlu0 %4216 }
0x275b   :  { %v4233_v63 = vmul.f32 0.03125, %v4217_v2  ;;  %v4273_v32 = vmul.f32 0.03125, %v4257_v8 }
0x275d   :  { %v4281_v58 = vmul.f32 %v4233_v63, %v4233_v63  ;;  %v4297_v9 = vsub.f32 %v8513_v42, %v4233_v63  ;;  %v8577_v42 = vld [vmem:[%s8890_s15] ss:$0 sm:$0xff] }
0x275e   :  { %v4251_v57 = vpop.xlane.xlu1 %4250  ;;  %v4254_v49 = vpop.xlane.xlu0 %4253 }
0x275f   :  { %v4289_v60 = vsub.f32 %v4273_v32, %v4281_v58  ;;  %v4271_v11 = vmul.f32 0.03125, %v4251_v57  ;;  %v4272_v23 = vmul.f32 0.03125, %v4254_v49 }
0x2761   :  { %v4305_v12 = vadd.f32 1e-06, %v4289_v60  ;;  %v4287_v13 = vsub.f32 %v4271_v11, %v4279_v50  ;;  %v4288_v27 = vsub.f32 %v4272_v23, %v4280_v52 }
0x2762   :  { %v4248_v48 = vpop.xlane.xlu0 %4247 }
0x2763   :  { %v4303_v31 = vadd.f32 1e-06, %v4287_v13  ;;  %v4304_v24 = vadd.f32 1e-06, %v4288_v27  ;;  %v4270_v3 = vmul.f32 0.03125, %v4248_v48  ;;  %7039 = vrsqrt.f32 %v4305_v12 }
0x2765   :  { %7041 = vrsqrt.f32 %v4303_v31  ;;  %v4286_v29 = vsub.f32 %v4270_v3, %v4278_v55 }
0x2766   :  { %7043 = vrsqrt.f32 %v4304_v24 }
0x2767   :  { %v4302_v33 = vadd.f32 1e-06, %v4286_v29 }
0x2769   :  { %7045 = vrsqrt.f32 %v4302_v33 }
0x276d   :  { %v7040_v36 = vpop.eup %7039 }
0x276e   :  { %v4321_v17 = vmul.f32 %v7040_v36, %v4297_v9 }
0x276f   :  { %v7042_v26 = vpop.eup %7041 }
0x2770   :  { %v7044_v7 = vpop.eup %7043  ;;  %v4319_v37 = vmul.f32 %v7042_v26, %v4295_v19  ;;  %v4335_v43 = vmul.f32 %v8569_v30, %v4321_v17 }
0x2771   :  { %v4320_v21 = vmul.f32 %v7044_v7, %v4296_v1 }
0x2772   :  { %v4333_v59 = vmul.f32 %v8569_v30, %v4319_v37  ;;  %v8590_v18 = vadd.f32 %v8577_v42, %v4335_v43 }
0x2773   :  { %v7046_v34 = vpop.eup %7045  ;;  %v4334_v51 = vmul.f32 %v8569_v30, %v4320_v21 }
0x2774   :  { %v4318_v35 = vmul.f32 %v7046_v34, %v4294_v54  ;;  %v8587_v62 = vadd.f32 %v8577_v42, %v4333_v59 }
0x2775   :  { %v8581_v28 = vadd.f32 %v8577_v42, %v4334_v51 }
0x2776   :  { %v4332_v47 = vmul.f32 %v8569_v30, %v4318_v35 }
0x2777   :  { %v4355_v20 = vpack.c.bf16 %v8590_v18, %v8581_v28 }
0x2778   :  { %v8584_v14 = vadd.f32 %v8577_v42, %v4332_v47 }
0x277a   :  { %v4354_v16 = vpack.c.bf16 %v8587_v62, %v8584_v14 }
0x277c   :  { %6393 = vmatprep.mubr.msk.bf16.mxu1 %vm143_vm0, %v4354_v16 }
0x277d   :  { %6394 = vmatmul.mubr.msk.bf16.vlgmr.msra.gmra.mrb[96].mxu1 %vm143_vm0, %v4355_v20 }
0x27f2   :  { %v6387_v6 = vpop.f32.mrb[76].mxu0 }
0x27f3   :  { %v4190_v53 = vadd.f32 %v6387_v6, %v8500_v0  ;;  %v4181_v5 = vpop.f32.mrb[77].mxu0 }
0x27f4   :  { %v4182_v8 = vadd.f32 %v8500_v0, %v4181_v5  ;;  %v6388_v2 = vpop.f32.mrb[78].mxu0 }
0x27f5   :  { %v8625_v4 = vadd.f32 %v4190_v53, %v8088_v22  ;;  %v4193_v63 = vadd.f32 %v6388_v2, %v8500_v0  ;;  %v4184_v32 = vpop.f32.mrb[79].mxu0 }
0x27f6   :  { %v4185_v58 = vadd.f32 %v8500_v0, %v4184_v32  ;;  %v8630_v52 = vadd.f32 %v4182_v8, %v8092_v44 }
0x27f7   :  { %v8633_v15 = vadd.f32 %v4193_v63, %v8098_v46  ;;  %v4224_v57 = vsel %vm143_vm0, %v8625_v4, 0.0  ;;  %v4244_v60 = vmul.f32 %v8625_v4, %v8625_v4 }
0x27f8   :  { %4225 = vadd.xlane.f32.xlu0 %v4224_v57  ;;  %v8638_v49 = vadd.f32 %v4185_v58, %v8095_v45  ;;  %v4218_v0 = vsel %vm143_vm0, %v8630_v52, 0.0  ;;  %v4242_v44 = vmul.f32 %v8630_v52, %v8630_v52 }
0x27f9   :  { %v4227_v22 = vsel %vm143_vm0, %v8633_v15, 0.0  ;;  %v4245_v23 = vmul.f32 %v8633_v15, %v8633_v15  ;;  %v4264_v12 = vsel %vm143_vm0, %v4244_v60, 0.0 }
0x27fa   :  { %4228 = vadd.xlane.f32.xlu1 %v4227_v22  ;;  %v4221_v46 = vsel %vm143_vm0, %v8638_v49, 0.0  ;;  %v4243_v50 = vmul.f32 %v8638_v49, %v8638_v49  ;;  %v4258_v45 = vsel %vm143_vm0, %v4242_v44, 0.0 }
0x27fb   :  { %v4267_v13 = vsel %vm143_vm0, %v4245_v23, 0.0 }
0x27fc   :  { %4219 = vadd.xlane.f32.xlu0 %v4218_v0  ;;  %v4261_v11 = vsel %vm143_vm0, %v4243_v50, 0.0 }
0x27fe   :  { %4222 = vadd.xlane.f32.xlu1 %v4221_v46 }
0x2800   :  { %4259 = vadd.xlane.f32.xlu0 %v4258_v45 }
0x2802   :  { %4262 = vadd.xlane.f32.xlu1 %v4261_v11 }
0x2804   :  { %4265 = vadd.xlane.f32.xlu0 %v4264_v12 }
0x2806   :  { %4268 = vadd.xlane.f32.xlu1 %v4267_v13 }
0x2850   :  { %v6395_v27 = vpop.f32.mrb[96].mxu1 }
0x2851   :  { %v4420_v48 = vpop.f32.mrb[97].mxu1 }
0x2852   :  { %v6396_v55 = vpop.f32.mrb[98].mxu1 }
0x2853   :  { %v4452_v31 = vpack.c.bf16 %v6396_v55, %v6395_v27  ;;  %v4423_v24 = vpop.f32.mrb[99].mxu1 }
0x2854   :  { %v4451_v3 = vpack.c.bf16 %v4423_v24, %v4420_v48 }
0x2856   :  { %6417 = vmatprep.mubr.bf16.mxu0 %v4451_v3 }
0x2857   :  { %6418 = vmatmul.mubr.bf16.vlgmr.msra.gmra.mrb[80].mxu0 %v4452_v31 }
0x2885   :  { %v4226_v29 = vpop.xlane.xlu0 %4225 }
0x2886   :  { %v4236_v7 = vmul.f32 0.03125, %v4226_v29 }
0x2887   :  { %v4229_v33 = vpop.xlane.xlu1 %4228 }
0x2888   :  { %v4237_v21 = vmul.f32 0.03125, %v4229_v33  ;;  %v4284_v43 = vmul.f32 %v4236_v7, %v4236_v7  ;;  %v4300_v63 = vsub.f32 %v8625_v4, %v4236_v7 }
0x2889   :  { %v4220_v36 = vpop.xlane.xlu0 %4219 }
0x288a   :  { %v4234_v19 = vmul.f32 0.03125, %v4220_v36  ;;  %v4285_v25 = vmul.f32 %v4237_v21, %v4237_v21  ;;  %v4301_v22 = vsub.f32 %v8633_v15, %v4237_v21 }
0x288b   :  { %v4223_v26 = vpop.xlane.xlu1 %4222 }
0x288c   :  { %v4235_v1 = vmul.f32 0.03125, %v4223_v26  ;;  %v4282_v37 = vmul.f32 %v4234_v19, %v4234_v19  ;;  %v4298_v6 = vsub.f32 %v8630_v52, %v4234_v19 }
0x288d   :  { %v4260_v9 = vpop.xlane.xlu0 %4259 }
0x288e   :  { %v4274_v17 = vmul.f32 0.03125, %v4260_v9  ;;  %v4283_v34 = vmul.f32 %v4235_v1, %v4235_v1  ;;  %v4299_v5 = vsub.f32 %v8638_v49, %v4235_v1 }
0x288f   :  { %v4263_v54 = vpop.xlane.xlu1 %4262 }
0x2890   :  { %v4290_v51 = vsub.f32 %v4274_v17, %v4282_v37  ;;  %v4275_v35 = vmul.f32 0.03125, %v4263_v54 }
0x2891   :  { %v4266_v59 = vpop.xlane.xlu0 %4265 }
0x2892   :  { %v4306_v47 = vadd.f32 1e-06, %v4290_v51  ;;  %v4291_v16 = vsub.f32 %v4275_v35, %v4283_v34  ;;  %v4276_v20 = vmul.f32 0.03125, %v4266_v59 }
0x2893   :  { %v4269_v10 = vpop.xlane.xlu1 %4268 }
0x2894   :  { %7047 = vrsqrt.f32 %v4306_v47  ;;  %v4307_v61 = vadd.f32 1e-06, %v4291_v16  ;;  %v4292_v38 = vsub.f32 %v4276_v20, %v4284_v43  ;;  %v4277_v41 = vmul.f32 0.03125, %v4269_v10 }
0x2896   :  { %7049 = vrsqrt.f32 %v4307_v61  ;;  %v4308_v40 = vadd.f32 1e-06, %v4292_v38  ;;  %v4293_v56 = vsub.f32 %v4277_v41, %v4285_v25 }
0x2898   :  { %7051 = vrsqrt.f32 %v4308_v40  ;;  %v4309_v39 = vadd.f32 1e-06, %v4293_v56 }
0x289a   :  { %7053 = vrsqrt.f32 %v4309_v39 }
0x289e   :  { %v7048_v53 = vpop.eup %7047 }
0x289f   :  { %v4322_v8 = vmul.f32 %v7048_v53, %v4298_v6 }
0x28a0   :  { %v7050_v2 = vpop.eup %7049 }
0x28a1   :  { %v4323_v32 = vmul.f32 %v7050_v2, %v4299_v5  ;;  %v4336_v58 = vmul.f32 %v8569_v30, %v4322_v8  ;;  %v6627_v2 = vld [vmem:[%s8895_s20] ss:$16 sps:$4 sm:$0xff]  }
0x28a2   :  { %v7052_v57 = vpop.eup %7051 }
0x28a3   :  { %v4337_v0 = vmul.f32 %v8569_v30, %v4323_v32  ;;  %v4324_v44 = vmul.f32 %v7052_v57, %v4300_v63  ;;  %v4350_v50 = vadd.f32 %v8577_v42, %v4336_v58  ;;  %v6629_v63 = vld [vmem:[%s8895_s20 + $0x4] ss:$16 sps:$4 sm:$0xff]   ;;  %v7139_v58 = vmov 0   ;;  %v6630_v57 = vld [vmem:[%s8895_s20 + $0x20] ss:$16 sps:$4 sm:$0xff]  }
0x28a4   :  { %v7054_v46 = vpop.eup %7053  ;;  %v6632_v32 = vld [vmem:[%s8895_s20 + $0x24] ss:$16 sps:$4 sm:$0xff]   ;;  %4846 = vmatprep.subr.bf16.mxu1 %v6629_v63 }
0x28a5   :  { %v4351_v52 = vadd.f32 %v8577_v42, %v4337_v0  ;;  %v4325_v45 = vmul.f32 %v7054_v46, %v4301_v22  ;;  %v4338_v49 = vmul.f32 %v8569_v30, %v4324_v44  ;;  %4847 = vmatpush1.bf16.msra.mxu1 %v6627_v2  ;;  %v6635_v22 = vld [vmem:[%s8895_s20 + $0xc] ss:$16 sps:$4 sm:$0xff]   ;;  %v6639_v0 = vld [vmem:[#allocation2] ss:$8 sps:$4 sm:$0xff]  }
0x28a6   :  { %4848 = vmatprep.subr.bf16.mxu1 %v6632_v32  ;;  %v6641_v44 = vld [vmem:[#allocation2 + $0x4] ss:$8 sps:$4 sm:$0xff]   ;;  %v6644_v46 = vld [vmem:[#allocation2 + $0x14] ss:$8 sps:$4 sm:$0xff]  }
0x28a7   :  { %v4356_v60 = vpack.c.bf16 %v4351_v52, %v4350_v50  ;;  %v4339_v4 = vmul.f32 %v8569_v30, %v4325_v45  ;;  %v4352_v11 = vadd.f32 %v8577_v42, %v4338_v49  ;;  %5336 = vmatprep.subr.bf16.mxu0 %v6641_v44  ;;  %v6645_v45 = vld [vmem:[#allocation2 + $0x20] ss:$8 sps:$4 sm:$0xff]   ;;  %v6653_v49 = vld [vmem:[#allocation2 + $0x34] ss:$8 sps:$4 sm:$0xff]  }
0x28a8   :  { %5337 = vmatpush1.bf16.msra.mxu0 %v6639_v0 }
0x28a9   :  { %6397 = vmatprep.mubr.msk.bf16.mxu1 %vm143_vm0, %v4356_v60  ;;  %v4353_v15 = vadd.f32 %v8577_v42, %v4339_v4  ;;  %4849 = vmatpush1.bf16.msra.mxu1 %v6630_v57  ;;  %v6651_v60 = vld [vmem:[#allocation2 + $0x30] ss:$8 sps:$4 sm:$0xff]   ;;  %v6659_v4 = vld [vmem:[#allocation2 + $0x44] ss:$8 sps:$4 sm:$0xff]  }
0x28aa   :  { %4887 = vmatprep.subr.bf16.mxu1 %v6635_v22  ;;  %5338 = vmatprep.subr.bf16.mxu0 %v6644_v46 }
0x28ab   :  { %v4357_v23 = vpack.c.bf16 %v4353_v15, %v4352_v11 }
0x28ad   :  { %6398 = vmatmul.mubr.msk.bf16.gmra.mrb[100].mxu1 %vm143_vm0, %v4357_v23  ;;  %v6665_v23 = vld [vmem:[#allocation2 + $0x54] ss:$8 sps:$4 sm:$0xff]  }
0x28ae   :  { %4878 = vmatprep.mubr.bf16.mxu1 %v7139_v58 }
0x292a   :  { %v6419_v12 = vpop.f32.mrb[80].mxu0 }
0x292b   :  { %v8673_v13 = vadd.f32 %v6419_v12, %v8581_v28  ;;  %v4553_v27 = vpop.f32.mrb[81].mxu0  ;;  %v6663_v12 = vld [vmem:[#allocation2 + $0x50] ss:$8 sps:$4 sm:$0xff]  }
0x292c   :  { %v6420_v48 = vpop.f32.mrb[82].mxu0  ;;  %v8676_v55 = vadd.f32 %v4553_v27, %v8584_v14  ;;  %v6671_v27 = vld [vmem:[#allocation2 + $0x64] ss:$8 sps:$4 sm:$0xff]  }
0x292d   :  { %v4556_v31 = vpop.f32.mrb[83].mxu0  ;;  %v4600_v30 = vsel %vm143_vm0, %v8673_v13, 0.0  ;;  %v8688_v3 = vadd.f32 %v6420_v48, %v8590_v18  ;;  %v4628_v33 = vmul.f32 %v8673_v13, %v8673_v13 }
0x292e   :  { %v8681_v24 = vadd.f32 %v4556_v31, %v8587_v62  ;;  %4601 = vadd.xlane.f32.xlu0 %v4600_v30  ;;  %v4594_v14 = vsel %vm143_vm0, %v8676_v55, 0.0  ;;  %v4626_v18 = vmul.f32 %v8676_v55, %v8676_v55  ;;  %v6669_v31 = vld [vmem:[#allocation2 + $0x60] ss:$8 sps:$4 sm:$0xff]   ;;  %v6677_v30 = vld [vmem:[#allocation2 + $0x74] ss:$8 sps:$4 sm:$0xff]  }
0x292f   :  { %v4603_v62 = vsel %vm143_vm0, %v8688_v3, 0.0  ;;  %v4640_v36 = vsel %vm143_vm0, %v4628_v33, 0.0  ;;  %v4629_v38 = vmul.f32 %v8688_v3, %v8688_v3 }
0x2930   :  { %v4597_v42 = vsel %vm143_vm0, %v8681_v24, 0.0  ;;  %v4627_v28 = vmul.f32 %v8681_v24, %v8681_v24  ;;  %v4634_v19 = vsel %vm143_vm0, %v4626_v18, 0.0  ;;  %v6695_v18 = vld [vmem:[#allocation2 + $0xa4] ss:$8 sps:$4 sm:$0xff]  }
0x2931   :  { %4598 = vadd.xlane.f32.xlu1 %v4597_v42  ;;  %v4643_v56 = vsel %vm143_vm0, %v4629_v38, 0.0  ;;  %v6675_v42 = vld [vmem:[#allocation2 + $0x70] ss:$8 sps:$4 sm:$0xff]  }
0x2932   :  { %4595 = vadd.xlane.f32.xlu0 %v4594_v14  ;;  %v4637_v29 = vsel %vm143_vm0, %v4627_v28, 0.0  ;;  %v6683_v14 = vld [vmem:[#allocation2 + $0x84] ss:$8 sps:$4 sm:$0xff]  }
0x2935   :  { %4638 = vadd.xlane.f32.xlu1 %v4637_v29  ;;  %v6681_v29 = vld [vmem:[#allocation2 + $0x80] ss:$8 sps:$4 sm:$0xff]  }
0x2936   :  { %4604 = vadd.xlane.f32.xlu0 %v4603_v62  ;;  %v6689_v62 = vld [vmem:[#allocation2 + $0x94] ss:$8 sps:$4 sm:$0xff]  }
0x293a   :  { %4641 = vadd.xlane.f32.xlu0 %v4640_v36  ;;  %v6687_v36 = vld [vmem:[#allocation2 + $0x90] ss:$8 sps:$4 sm:$0xff]  }
0x293e   :  { %4635 = vadd.xlane.f32.xlu0 %v4634_v19 }
0x2980   :  { %v6399_v26 = vpop.f32.mrb[100].mxu1 }
0x2981   :  { %v4436_v1 = vpop.f32.mrb[101].mxu1 }
0x2982   :  { %v6400_v9 = vpop.f32.mrb[102].mxu1 }
0x2983   :  { %v4454_v7 = vpack.c.bf16 %v6400_v9, %v6399_v26  ;;  %v4439_v37 = vpop.f32.mrb[103].mxu1  ;;  %v6693_v26 = vld [vmem:[#allocation2 + $0xa0] ss:$8 sps:$4 sm:$0xff]   ;;  %v6701_v9 = vld [vmem:[#allocation2 + $0xb4] ss:$8 sps:$4 sm:$0xff]  }
0x2984   :  { %v4453_v17 = vpack.c.bf16 %v4439_v37, %v4436_v1 }
0x2986   :  { %6421 = vmatprep.mubr.bf16.mxu0 %v4453_v17 }
0x2987   :  { %6422 = vmatmul.mubr.bf16.gmra.mrb[84].mxu0 %v4454_v7 }
0x29be   :  { %v4599_v19 = vpop.xlane.xlu1 %4598 }
0x29c2   :  { %v4639_v37 = vpop.xlane.xlu1 %4638 }
0x2a5a   :  { %v6423_v21 = vpop.f32.mrb[84].mxu0 }
0x2a5b   :  { %v8701_v54 = vadd.f32 %v6423_v21, %v4352_v11  ;;  %v4569_v34 = vpop.f32.mrb[85].mxu0  ;;  %v6657_v11 = vld [vmem:[#allocation2 + $0x40] ss:$8 sps:$4 sm:$0xff]   ;;  %v6699_v21 = vld [vmem:[#allocation2 + $0xb0] ss:$8 sps:$4 sm:$0xff]  }
0x2a5c   :  { %v8703_v51 = vadd.f32 %v4569_v34, %v4350_v50  ;;  %v6424_v35 = vpop.f32.mrb[86].mxu0  ;;  %v6642_v50 = vld [vmem:[#allocation2 + $0x10] ss:$8 sps:$4 sm:$0xff]   ;;  %v4619_v34 = vmul.f32 0.03125, %v4599_v19 }
0x2a5d   :  { %v8705_v59 = vadd.f32 %v6424_v35, %v4353_v15  ;;  %v4572_v43 = vpop.f32.mrb[87].mxu0  ;;  %v4612_v47 = vsel %vm143_vm0, %v8701_v54, 0.0  ;;  %v4632_v10 = vmul.f32 %v8701_v54, %v8701_v54  ;;  %5339 = vmatpush1.bf16.msra.mxu0 %v6642_v50  ;;  %v4602_v15 = vpop.xlane.xlu0 %4601  ;;  %v6707_v35 = vld [vmem:[#allocation2 + $0xc4] ss:$8 sps:$4 sm:$0xff]  }
0x2a5e   :  { %4613 = vadd.xlane.f32.xlu1 %v4612_v47  ;;  %v4606_v16 = vsel %vm143_vm0, %v8703_v51, 0.0  ;;  %v4630_v20 = vmul.f32 %v8703_v51, %v8703_v51  ;;  %v8720_v41 = vadd.f32 %v4572_v43, %v4351_v52  ;;  %v6647_v52 = vld [vmem:[#allocation2 + $0x24] ss:$8 sps:$4 sm:$0xff]   ;;  %v4659_v47 = vmul.f32 0.03125, %v4639_v37 }
0x2a5f   :  { %4607 = vadd.xlane.f32.xlu0 %v4606_v16  ;;  %v4615_v25 = vsel %vm143_vm0, %v8705_v59, 0.0  ;;  %v4652_v40 = vsel %vm143_vm0, %v4632_v10, 0.0  ;;  %v4633_v5 = vmul.f32 %v8705_v59, %v8705_v59  ;;  %5340 = vmatprep.subr.bf16.mxu0 %v6647_v52  ;;  %v4667_v10 = vmul.f32 %v4619_v34, %v4619_v34 }
0x2a60   :  { %v4646_v61 = vsel %vm143_vm0, %v4630_v20, 0.0  ;;  %v4609_v39 = vsel %vm143_vm0, %v8720_v41, 0.0  ;;  %v4631_v6 = vmul.f32 %v8720_v41, %v8720_v41  ;;  %v6705_v20 = vld [vmem:[#allocation2 + $0xc0] ss:$8 sps:$4 sm:$0xff]  }
0x2a61   :  { %v4655_v8 = vsel %vm143_vm0, %v4633_v5, 0.0  ;;  %5341 = vmatpush1.bf16.msra.mxu0 %v6645_v45  ;;  %v4596_v48 = vpop.xlane.xlu0 %4595  ;;  %v4675_v38 = vsub.f32 %v4659_v47, %v4667_v10 }
0x2a62   :  { %4616 = vadd.xlane.f32.xlu1 %v4615_v25  ;;  %v4649_v53 = vsel %vm143_vm0, %v4631_v6, 0.0  ;;  %5342 = vmatprep.subr.bf16.mxu0 %v6653_v49  ;;  %v4618_v7 = vmul.f32 0.03125, %v4596_v48  ;;  %v4620_v25 = vmul.f32 0.03125, %v4602_v15 }
0x2a63   :  { %4647 = vadd.xlane.f32.xlu0 %v4646_v61  ;;  %v6713_v61 = vld [vmem:[#allocation2 + $0xd4] ss:$8 sps:$4 sm:$0xff]  }
0x2a64   :  { %v4666_v43 = vmul.f32 %v4618_v7, %v4618_v7  ;;  %v4668_v6 = vmul.f32 %v4620_v25, %v4620_v25  ;;  %v4682_v15 = vsub.f32 %v8676_v55, %v4618_v7  ;;  %v4684_v19 = vsub.f32 %v8673_v13, %v4620_v25 }
0x2a65   :  { %5343 = vmatpush1.bf16.msra.mxu0 %v6651_v60  ;;  %v4605_v28 = vpop.xlane.xlu0 %4604 }
0x2a66   :  { %4653 = vadd.xlane.f32.xlu1 %v4652_v40  ;;  %5344 = vmatprep.subr.bf16.mxu0 %v6659_v4  ;;  %v4621_v44 = vmul.f32 0.03125, %v4605_v28 }
0x2a67   :  { %4644 = vadd.xlane.f32.xlu0 %v4643_v56 }
0x2a69   :  { %5345 = vmatpush1.bf16.msra.mxu0 %v6657_v11  ;;  %v4642_v33 = vpop.xlane.xlu0 %4641 }
0x2a6a   :  { %4610 = vadd.xlane.f32.xlu1 %v4609_v39  ;;  %5346 = vmatprep.subr.bf16.mxu0 %v6665_v23  ;;  %v4660_v40 = vmul.f32 0.03125, %v4642_v33  ;;  %v6711_v39 = vld [vmem:[#allocation2 + $0xd0] ss:$8 sps:$4 sm:$0xff]   ;;  %v4669_v23 = vmul.f32 %v4621_v44, %v4621_v44 }
0x2a6c   :  { %v4676_v5 = vsub.f32 %v4660_v40, %v4668_v6 }
0x2a6d   :  { %5347 = vmatpush1.bf16.msra.mxu0 %v6663_v12  ;;  %v4636_v1 = vpop.xlane.xlu0 %4635 }
0x2a6e   :  { %4650 = vadd.xlane.f32.xlu1 %v4649_v53  ;;  %5348 = vmatprep.subr.bf16.mxu0 %v6671_v27  ;;  %v4658_v17 = vmul.f32 0.03125, %v4636_v1  ;;  %v4691_v53 = vadd.f32 1e-06, %v4675_v38  ;;  %v4692_v63 = vadd.f32 1e-06, %v4676_v5  ;;  %v4685_v38 = vsub.f32 %v8688_v3, %v4621_v44 }
0x2a70   :  { %v4674_v16 = vsub.f32 %v4658_v17, %v4666_v43 }
0x2a71   :  { %5349 = vmatpush1.bf16.msra.mxu0 %v6669_v31 }
0x2a72   :  { %4656 = vadd.xlane.f32.xlu1 %v4655_v8  ;;  %5350 = vmatprep.subr.bf16.mxu0 %v6677_v30  ;;  %v4690_v56 = vadd.f32 1e-06, %v4674_v16 }
0x2a74   :  { %7055 = vrsqrt.f32 %v4690_v56 }
0x2a75   :  { %5351 = vmatpush1.bf16.msra.mxu0 %v6675_v42  ;;  %7057 = vrsqrt.f32 %v4691_v53 }
0x2a76   :  { %5352 = vmatprep.subr.bf16.mxu0 %v6683_v14  ;;  %7059 = vrsqrt.f32 %v4692_v63  ;;  %v4683_v14 = vsub.f32 %v8681_v24, %v4619_v34  ;;  %v5746_v34 = vld [vmem:[%s8894_s19] ss:$0 sm:$0xff] }
0x2a79   :  { %5353 = vmatpush1.bf16.msra.mxu0 %v6681_v29 }
0x2a7a   :  { %5354 = vmatprep.subr.bf16.mxu0 %v6689_v62 }
0x2a7d   :  { %5355 = vmatpush1.bf16.msra.mxu0 %v6687_v36  ;;  %v5745_v36 = vld [vmem:[%s8893_s18] ss:$0 sm:$0xff] }
0x2a7e   :  { %5356 = vmatprep.subr.bf16.mxu0 %v6695_v18  ;;  %v7056_v49 = vpop.eup %7055 }
0x2a7f   :  { %v7058_v31 = vpop.eup %7057  ;;  %v4706_v30 = vmul.f32 %v7056_v49, %v4682_v15 }
0x2a80   :  { %v4707_v18 = vmul.f32 %v7058_v31, %v4683_v14  ;;  %v7060_v55 = vpop.eup %7059 }
0x2a81   :  { %5357 = vmatpush1.bf16.msra.mxu0 %v6693_v26  ;;  %v4720_v26 = vmul.f32 %v5745_v36, %v4706_v30  ;;  %v4708_v17 = vmul.f32 %v7060_v55, %v4684_v19 }
0x2a82   :  { %5358 = vmatprep.subr.bf16.mxu0 %v6701_v9  ;;  %v4721_v24 = vmul.f32 %v5745_v36, %v4707_v18 }
0x2a83   :  { %v4734_v43 = vadd.f32 %v5746_v34, %v4720_v26  ;;  %v4722_v25 = vmul.f32 %v5745_v36, %v4708_v17 }
0x2a84   :  { %v4735_v13 = vadd.f32 %v5746_v34, %v4721_v24 }
0x2a85   :  { %5359 = vmatpush1.bf16.msra.mxu0 %v6699_v21  ;;  %v4742_v40 = vsel %vm143_vm0, %v4734_v43, 0.0 }
0x2a86   :  { %5360 = vmatprep.subr.bf16.mxu0 %v6707_v35  ;;  %v4743_v5 = vsel %vm143_vm0, %v4735_v13, 0.0  ;;  %v6650_v13 = vld [vmem:[#allocation2 + $0x104] ss:$8 sps:$4 sm:$0xff]  }
0x2a87   :  { %v4744_v63 = vadd.f32 %v4743_v5, %v4742_v40  ;;  %v6660_v40 = vld [vmem:[#allocation2 + $0x120] ss:$8 sps:$4 sm:$0xff]   ;;  %v6678_v5 = vld [vmem:[#allocation2 + $0x150] ss:$8 sps:$4 sm:$0xff]  }
0x2a89   :  { %5361 = vmatpush1.bf16.msra.mxu0 %v6705_v20 }
0x2a8a   :  { %5362 = vmatprep.subr.bf16.mxu0 %v6713_v61 }
0x2a8d   :  { %5363 = vmatpush1.bf16.msra.mxu0 %v6711_v39 }
0x2aeb   :  { %v4614_v8 = vpop.xlane.xlu1 %4613 }
0x2aec   :  { %v4608_v2 = vpop.xlane.xlu0 %4607  ;;  %v8750_v22 = vmul.f32 0.03125, %v4614_v8  ;;  %v4736_v8 = vadd.f32 %v5746_v34, %v4722_v25  ;;  %v6648_v25 = vld [vmem:[#allocation2 + $0x100] ss:$8 sps:$4 sm:$0xff]  }
0x2aed   :  { %v8748_v32 = vmul.f32 0.03125, %v4608_v2 }
0x2aee   :  { %v4672_v60 = vmul.f32 %v8750_v22, %v8750_v22  ;;  %v4745_v44 = vsel %vm143_vm0, %v4736_v8, 0.0  ;;  %v6686_v8 = vld [vmem:[#allocation2 + $0x164] ss:$8 sps:$4 sm:$0xff]  }
0x2aef   :  { %v4617_v57 = vpop.xlane.xlu1 %4616  ;;  %v4670_v46 = vmul.f32 %v8748_v32, %v8748_v32  ;;  %v4686_v6 = vsub.f32 %v8703_v51, %v8748_v32 }
0x2af0   :  { %v4648_v0 = vpop.xlane.xlu0 %4647  ;;  %v4625_v9 = vmul.f32 0.03125, %v4617_v57  ;;  %v4688_v57 = vsub.f32 %v8701_v54, %v8750_v22 }
0x2af1   :  { %v4662_v50 = vmul.f32 0.03125, %v4648_v0 }
0x2af2   :  { %v4673_v47 = vmul.f32 %v4625_v9, %v4625_v9  ;;  %v4689_v15 = vsub.f32 %v8705_v59, %v4625_v9 }
0x2af3   :  { %v4678_v52 = vsub.f32 %v4662_v50, %v4670_v46  ;;  %v4654_v45 = vpop.xlane.xlu1 %4653 }
0x2af4   :  { %v4664_v4 = vmul.f32 0.03125, %v4654_v45  ;;  %v4645_v11 = vpop.xlane.xlu0 %4644  ;;  %v4746_v45 = vadd.f32 %v4745_v44, %v4744_v63  ;;  %v6692_v63 = vld [vmem:[#allocation2 + $0x174] ss:$8 sps:$4 sm:$0xff]   ;;  %v6702_v44 = vld [vmem:[#allocation2 + $0x190] ss:$8 sps:$4 sm:$0xff]  }
0x2af5   :  { %v4661_v12 = vmul.f32 0.03125, %v4645_v11  ;;  %v4694_v27 = vadd.f32 1e-06, %v4678_v52 }
0x2af6   :  { %v4680_v48 = vsub.f32 %v4664_v4, %v4672_v60 }
0x2af7   :  { %v4677_v42 = vsub.f32 %v4661_v12, %v4669_v23  ;;  %v4611_v28 = vpop.xlane.xlu1 %4610  ;;  %7061 = vrsqrt.f32 %v4694_v27 }
0x2af8   :  { %v4696_v29 = vadd.f32 1e-06, %v4680_v48  ;;  %v4623_v62 = vmul.f32 0.03125, %v4611_v28 }
0x2af9   :  { %v4693_v33 = vadd.f32 1e-06, %v4677_v42 }
0x2afa   :  { %v4671_v7 = vmul.f32 %v4623_v62, %v4623_v62  ;;  %v4687_v51 = vsub.f32 %v8720_v41, %v4623_v62 }
0x2afb   :  { %7063 = vrsqrt.f32 %v4693_v33  ;;  %v4651_v1 = vpop.xlane.xlu1 %4650 }
0x2afc   :  { %7065 = vrsqrt.f32 %v4696_v29  ;;  %v4663_v37 = vmul.f32 0.03125, %v4651_v1 }
0x2afe   :  { %v4679_v21 = vsub.f32 %v4663_v37, %v4671_v7 }
0x2aff   :  { %v4657_v35 = vpop.xlane.xlu1 %4656 }
0x2b00   :  { %v4695_v16 = vadd.f32 1e-06, %v4679_v21  ;;  %v4665_v20 = vmul.f32 0.03125, %v4657_v35 }
0x2b01   :  { %v7062_v61 = vpop.eup %7061 }
0x2b02   :  { %7067 = vrsqrt.f32 %v4695_v16  ;;  %v4681_v10 = vsub.f32 %v4665_v20, %v4673_v47  ;;  %v4710_v0 = vmul.f32 %v7062_v61, %v4686_v6  ;;  %v6638_v16 = vld [vmem:[%s8895_s20 + $0x2c] ss:$16 sps:$4 sm:$0xff]   ;;  %v6636_v20 = vld [vmem:[%s8895_s20 + $0x28] ss:$16 sps:$4 sm:$0xff]  }
0x2b03   :  { %v6654_v61 = vld [vmem:[#allocation2 + $0x110] ss:$8 sps:$4 sm:$0xff]   ;;  %v6672_v6 = vld [vmem:[#allocation2 + $0x140] ss:$8 sps:$4 sm:$0xff]  }
0x2b04   :  { %v4697_v56 = vadd.f32 1e-06, %v4681_v10  ;;  %v4724_v52 = vmul.f32 %v5745_v36, %v4710_v0  ;;  %v6656_v10 = vld [vmem:[#allocation2 + $0x114] ss:$8 sps:$4 sm:$0xff]   ;;  %v6698_v0 = vld [vmem:[#allocation2 + $0x184] ss:$8 sps:$4 sm:$0xff]  }
0x2b05   :  { %v7064_v39 = vpop.eup %7063 }
0x2b06   :  { %v7066_v53 = vpop.eup %7065  ;;  %v4709_v2 = vmul.f32 %v7064_v39, %v4685_v38  ;;  %7069 = vrsqrt.f32 %v4697_v56  ;;  %v4738_v23 = vadd.f32 %v5746_v34, %v4724_v52  ;;  %v6662_v38 = vld [vmem:[#allocation2 + $0x124] ss:$8 sps:$4 sm:$0xff]   ;;  %v6668_v56 = vld [vmem:[#allocation2 + $0x134] ss:$8 sps:$4 sm:$0xff]   ;;  %v6666_v39 = vld [vmem:[#allocation2 + $0x130] ss:$8 sps:$4 sm:$0xff]  }
0x2b07   :  { %v4712_v3 = vmul.f32 %v7066_v53, %v4688_v57  ;;  %v6680_v53 = vld [vmem:[#allocation2 + $0x154] ss:$8 sps:$4 sm:$0xff]   ;;  %v6690_v57 = vld [vmem:[#allocation2 + $0x170] ss:$8 sps:$4 sm:$0xff]   ;;  %v6708_v52 = vld [vmem:[#allocation2 + $0x1a0] ss:$8 sps:$4 sm:$0xff]  }
0x2b08   :  { %v4723_v46 = vmul.f32 %v5745_v36, %v4709_v2  ;;  %v4756_v42 = vsel %vm143_vm0, %v4738_v23, 0.0  ;;  %v6684_v2 = vld [vmem:[#allocation2 + $0x160] ss:$8 sps:$4 sm:$0xff]   ;;  %v6723_v23 = vld [vmem:[#allocation2 + $0xf0] ss:$8 sps:$4 sm:$0xff]  }
0x2b09   :  { %v4726_v60 = vmul.f32 %v5745_v36, %v4712_v3  ;;  %v6704_v3 = vld [vmem:[#allocation2 + $0x194] ss:$8 sps:$4 sm:$0xff]  }
0x2b0a   :  { %v4737_v50 = vadd.f32 %v5746_v34, %v4723_v46  ;;  %v6696_v46 = vld [vmem:[#allocation2 + $0x180] ss:$8 sps:$4 sm:$0xff]  }
0x2b0b   :  { %v4740_v27 = vadd.f32 %v5746_v34, %v4726_v60  ;;  %v6717_v60 = vld [vmem:[#allocation2 + $0xe0] ss:$8 sps:$4 sm:$0xff]  }
0x2b0c   :  { %v7068_v32 = vpop.eup %7067  ;;  %v4747_v49 = vsel %vm143_vm0, %v4737_v50, 0.0  ;;  %v6710_v50 = vld [vmem:[#allocation2 + $0x1a4] ss:$8 sps:$4 sm:$0xff]  }
0x2b0d   :  { %v4748_v4 = vadd.f32 %v4747_v49, %v4746_v45  ;;  %v4711_v11 = vmul.f32 %v7068_v32, %v4687_v51  ;;  %v4759_v29 = vsel %vm143_vm0, %v4740_v27, 0.0  ;;  %v6716_v45 = vld [vmem:[#allocation2 + $0x1b4] ss:$8 sps:$4 sm:$0xff]   ;;  %v6714_v51 = vld [vmem:[#allocation2 + $0x1b0] ss:$8 sps:$4 sm:$0xff]  }
0x2b0e   :  { %v6719_v32 = vld [vmem:[#allocation2 + $0xe4] ss:$8 sps:$4 sm:$0xff]   ;;  %v6734_v27 = vld [vmem:[#allocation2 + $0x1f4] ss:$8 sps:$4 sm:$0xff]  }
0x2b0f   :  { %v4749_v54 = vrot.slane %v4748_v4, 4  ;;  %v4725_v22 = vmul.f32 %v5745_v36, %v4711_v11  ;;  %v6722_v49 = vld [vmem:[#allocation2 + $0x1c4] ss:$8 sps:$4 sm:$0xff]   ;;  %5364 = vmatprep.subr.bf16.mxu0 %v6719_v32  ;;  %v6725_v11 = vld [vmem:[#allocation2 + $0xf4] ss:$8 sps:$4 sm:$0xff]  }
0x2b10   :  { %v7070_v12 = vpop.eup %7069  ;;  %5365 = vmatpush1.bf16.msra.mxu0 %v6717_v60 }
0x2b11   :  { %v4739_v48 = vadd.f32 %v5746_v34, %v4725_v22  ;;  %v4713_v31 = vmul.f32 %v7070_v12, %v4689_v15  ;;  %v4750_v30 = vadd.f32 %v4749_v54, %v4748_v4  ;;  %v6720_v4 = vld [vmem:[#allocation2 + $0x1c0] ss:$8 sps:$4 sm:$0xff]   ;;  %v6728_v15 = vld [vmem:[#allocation2 + $0x1d4] ss:$8 sps:$4 sm:$0xff]   ;;  %v6726_v54 = vld [vmem:[#allocation2 + $0x1d0] ss:$8 sps:$4 sm:$0xff]   ;;  %5366 = vmatprep.subr.bf16.mxu0 %v6725_v11 }
0x2b12   :  { %v6731_v22 = vld [vmem:[#allocation2 + $0x1e4] ss:$8 sps:$4 sm:$0xff]   ;;  %v6729_v12 = vld [vmem:[#allocation2 + $0x1e0] ss:$8 sps:$4 sm:$0xff]  }
0x2b13   :  { %v4757_v41 = vsel %vm143_vm0, %v4739_v48, 0.0  ;;  %v4727_v28 = vmul.f32 %v5745_v36, %v4713_v31  ;;  %v4751_v33 = vrot.slane %v4750_v30, 2  ;;  %v6732_v48 = vld [vmem:[#allocation2 + $0x1f0] ss:$8 sps:$4 sm:$0xff]   ;;  %v6735_v31 = vld [vmem:[%s8899_s24 + $0x40] sm:$0xff]  }
0x2b14   :  { %v4758_v14 = vadd.f32 %v4757_v41, %v4756_v42  ;;  %5367 = vmatpush1.bf16.msra.mxu0 %v6723_v23 }
0x2b15   :  { %v4741_v62 = vadd.f32 %v5746_v34, %v4727_v28  ;;  %v4752_v26 = vadd.f32 %v4751_v33, %v4750_v30  ;;  %v6633_v34 = vld [vmem:[%s8895_s20 + $0x8] ss:$16 sps:$4 sm:$0xff]   ;;  %6027 = vmatprep.subr.bf16.mxu0 %v6735_v31  ;;  %v4783_v30 = vlaneseq  ;;  %v4781_v28 = vld [vmem:[%s8896_s21] sm:$0xf] }
0x2b16   :  { %v4760_v18 = vadd.f32 %v4759_v29, %v4758_v14 }
0x2b17   :  { %v4761_v59 = vsel %vm143_vm0, %v4741_v62, 0.0  ;;  %v4753_v7 = vrot.slane %v4752_v26, 1  ;;  %v8795_v42 = vshrl.u32 %v4783_v30, 7 }
0x2b18   :  { %v4762_v55 = vadd.f32 %v4761_v59, %v4760_v18 }
0x2b19   :  { %v4754_v24 = vadd.f32 %v4753_v7, %v4752_v26  ;;  %v4785_v41 = vsub.s32 0, %v8795_v42  ;;  %v4789_v14 = vsub.s32 1, %v8795_v42 }
0x2b1a   :  { %v4763_v19 = vrot.slane %v4762_v55, 4 }
0x2b1b   :  { %v4755_v36 = vmul.f32 0.03125, %v4754_v24  ;;  %v4786_v29 = vrot.slane %v4781_v28, %v4785_v41  ;;  %v4790_v62 = vrot.slane %v4781_v28, %v4789_v14 }
0x2b1c   :  { %v4764_v1 = vadd.f32 %v4763_v19, %v4762_v55  ;;  %v4793_v55 = vsub.s32 2, %v8795_v42 }
0x2b1e   :  { %v4765_v9 = vrot.slane %v4764_v1, 2 }
0x2b20   :  { %v4766_v37 = vadd.f32 %v4765_v9, %v4764_v1  ;;  %v4797_v1 = vsub.s32 3, %v8795_v42  ;;  %v5821_v42 = vld [vmem:[%s8900_s25] ss:$0 sm:$0xff] }
0x2b22   :  { %v4767_v17 = vrot.slane %v4766_v37, 1 }
0x2b24   :  { %v4768_v21 = vadd.f32 %v4767_v17, %v4766_v37  ;;  %v4794_v17 = vrot.slane %v4781_v28, %v4793_v55 }
0x2b26   :  { %v4769_v35 = vmul.f32 0.03125, %v4768_v21 }
0x2b28   :  { %v4771_v43 = vsel %vm4770_vm4, %v4755_v36, %v4769_v35  ;;  %v4798_v36 = vrot.slane %v4781_v28, %v4797_v1 }
0x2b29   :  { %v4772_v47 = vpack.c.bf16 %v4771_v43, %v4771_v43 }
0x2b2b   :  { %5755 = vmatmul.mubr.msk.bf16.vlgmr.msra.gmra.mrb[104].mxu1 %vm143_vm0, %v4772_v47 }
0x2b2c   :  { %4888 = vmatpush1.bf16.msra.mxu1 %v6633_v34  ;;  %4919 = vmatprep.mubr.bf16.mxu1 %v7139_v58  ;;  %v6674_v58 = vld [vmem:[#allocation2 + $0x144] ss:$8 sps:$4 sm:$0xff]  }
0x2b2d   :  { %4889 = vmatprep.subr.bf16.mxu1 %v6638_v16  ;;  %v6736_v34 = vld [vmem:[%s8899_s24] sm:$0xff]  }
0x2b30   :  { %4890 = vmatpush1.bf16.msra.mxu1 %v6636_v20 }
0x2b31   :  { %5377 = vmatprep.subr.bf16.mxu1 %v6650_v13  ;;  %v6737_v13 = vld [vmem:[%s8899_s24 + $0x48] sm:$0xff]  }
0x2b33   :  { %5756 = vmatmul.mubr.msk.bf16.vlgmr.msra.gmra.mrb[108].mxu1 %vm143_vm0, %v4772_v47 }
0x2b34   :  { %5378 = vmatpush1.bf16.msra.mxu1 %v6648_v25 }
0x2b35   :  { %5379 = vmatprep.subr.bf16.mxu1 %v6656_v10 }
0x2b38   :  { %5380 = vmatpush1.bf16.msra.mxu1 %v6654_v61 }
0x2b39   :  { %5381 = vmatprep.subr.bf16.mxu1 %v6662_v38 }
0x2b3c   :  { %5382 = vmatpush1.bf16.msra.mxu1 %v6660_v40 }
0x2b3d   :  { %5383 = vmatprep.subr.bf16.mxu1 %v6668_v56  ;;  %v6738_v56 = vld [vmem:[%s8899_s24 + $0x8] sm:$0xff]  }
0x2b40   :  { %5384 = vmatpush1.bf16.msra.mxu1 %v6666_v39 }
0x2b41   :  { %5385 = vmatprep.subr.bf16.mxu1 %v6674_v58  ;;  %v6739_v58 = vld [vmem:[%s8899_s24 + $0x50] sm:$0xff]  }
0x2b44   :  { %5386 = vmatpush1.bf16.msra.mxu1 %v6672_v6 }
0x2b45   :  { %5387 = vmatprep.subr.bf16.mxu1 %v6680_v53 }
0x2b48   :  { %5388 = vmatpush1.bf16.msra.mxu1 %v6678_v5  ;;  %v6740_v5 = vld [vmem:[%s8899_s24 + $0x10] sm:$0xff]  }
0x2b49   :  { %5389 = vmatprep.subr.bf16.mxu1 %v6686_v8 }
0x2b4c   :  { %5390 = vmatpush1.bf16.msra.mxu1 %v6684_v2  ;;  %v6741_v2 = vld [vmem:[%s8899_s24 + $0x58] sm:$0xff]  }
0x2b4d   :  { %5391 = vmatprep.subr.bf16.mxu1 %v6692_v63  ;;  %v6742_v63 = vld [vmem:[%s8899_s24 + $0x18] sm:$0xff]  }
0x2b50   :  { %5392 = vmatpush1.bf16.msra.mxu1 %v6690_v57  ;;  %v6743_v57 = vld [vmem:[%s8899_s24 + $0x60] sm:$0xff]  }
0x2b51   :  { %5393 = vmatprep.subr.bf16.mxu1 %v6698_v0  ;;  %v6744_v0 = vld [vmem:[%s8899_s24 + $0x20] sm:$0xff]  }
0x2b54   :  { %5394 = vmatpush1.bf16.msra.mxu1 %v6696_v46  ;;  %v6745_v46 = vld [vmem:[%s8899_s24 + $0x68] sm:$0xff]  }
0x2b55   :  { %5395 = vmatprep.subr.bf16.mxu1 %v6704_v3  ;;  %v6746_v3 = vld [vmem:[%s8899_s24 + $0x28] sm:$0xff]  }
0x2b58   :  { %5396 = vmatpush1.bf16.msra.mxu1 %v6702_v44  ;;  %v6747_v44 = vld [vmem:[%s8899_s24 + $0x70] sm:$0xff]  }
0x2b59   :  { %5397 = vmatprep.subr.bf16.mxu1 %v6710_v50  ;;  %v6748_v50 = vld [vmem:[%s8899_s24 + $0x30] sm:$0xff]  }
0x2b5c   :  { %5398 = vmatpush1.bf16.msra.mxu1 %v6708_v52  ;;  %v6749_v52 = vld [vmem:[%s8899_s24 + $0x78] sm:$0xff]  }
0x2b5d   :  { %5399 = vmatprep.subr.bf16.mxu1 %v6716_v45  ;;  %v6750_v45 = vld [vmem:[%s8899_s24 + $0x38] sm:$0xff]  }
0x2b60   :  { %5400 = vmatpush1.bf16.msra.mxu1 %v6714_v51  ;;  %v5004_v51 = vld [vmem:[%s8898_s23] sm:$0x3] }
0x2b61   :  { %5401 = vmatprep.subr.bf16.mxu1 %v6722_v49 }
0x2b64   :  { %5402 = vmatpush1.bf16.msra.mxu1 %v6720_v4  ;;  %v5009_v4 = vrot.slane %v5004_v51, %v4785_v41 }
0x2b65   :  { %5403 = vmatprep.subr.bf16.mxu1 %v6728_v15  ;;  %v5013_v15 = vrot.slane %v5004_v51, %v4789_v14 }
0x2b68   :  { %5404 = vmatpush1.bf16.msra.mxu1 %v6726_v54 }
0x2b69   :  { %5405 = vmatprep.subr.bf16.mxu1 %v6731_v22 }
0x2b6c   :  { %5406 = vmatpush1.bf16.msra.mxu1 %v6729_v12 }
0x2b6d   :  { %5407 = vmatprep.subr.bf16.mxu1 %v6734_v27 }
0x2b70   :  { %5408 = vmatpush1.bf16.msra.mxu1 %v6732_v48 }
0x2bfe   :  { %v4880_v33 = vpop.f32.mrb[104].mxu1 }
0x2bff   :  { %v4881_v18 = vadd.f32 %v4880_v33, %v4786_v29  ;;  %v4882_v59 = vpop.f32.mrb[105].mxu1 }
0x2c00   :  { %v4883_v19 = vadd.f32 %v4882_v59, %v4790_v62  ;;  %v4884_v26 = vpop.f32.mrb[106].mxu1 }
0x2c01   :  { %v4928_v9 = vmax.f32 %v4881_v18, 0.0  ;;  %v4885_v7 = vpop.f32.mrb[107].mxu1 }
0x2c02   :  { %v4929_v37 = vmax.f32 %v4883_v19, 0.0 }
0x2c03   :  { %v4932_v24 = vmin.f32 %v4928_v9, 6.0 }
0x2c04   :  { %v4933_v21 = vmin.f32 %v4929_v37, 6.0 }
0x2c05   :  { %v4936_v47 = vpack.c.bf16 %v4932_v24, %v4932_v24 }
0x2c06   :  { %v4937_v35 = vpack.c.bf16 %v4933_v21, %v4933_v21  ;;  %v4921_v43 = vpop.f32.mrb[108].mxu1 }
0x2c07   :  { %v4922_v16 = vadd.f32 %v4921_v43, %v4794_v17  ;;  %v4923_v20 = vpop.f32.mrb[109].mxu1 }
0x2c08   :  { %v4924_v25 = vadd.f32 %v4923_v20, %v4798_v36  ;;  %v4925_v10 = vpop.f32.mrb[110].mxu1  ;;  %5368 = vmatprep.mubr.bf16.mxu0 %v4937_v35 }
0x2c09   :  { %v4930_v61 = vmax.f32 %v4922_v16, 0.0  ;;  %v4926_v38 = vpop.f32.mrb[111].mxu1  ;;  %5369 = vmatmul.mubr.bf16.vlgmr.msra.gmra.mrb[88].mxu0 %v4936_v47 }
0x2c0a   :  { %v4931_v40 = vmax.f32 %v4924_v25, 0.0  ;;  %6028 = vmatpush3.bf16.msra.mxu0 %v6736_v34 }
0x2c0b   :  { %v4934_v39 = vmin.f32 %v4930_v61, 6.0  ;;  %6029 = vmatprep.subr.bf16.mxu0 %v6737_v13 }
0x2c0c   :  { %v4935_v6 = vmin.f32 %v4931_v40, 6.0 }
0x2c0d   :  { %v4938_v8 = vpack.c.bf16 %v4934_v39, %v4934_v39 }
0x2c0e   :  { %v4939_v53 = vpack.c.bf16 %v4935_v6, %v4935_v6  ;;  %6030 = vmatpush3.bf16.msra.mxu0 %v6738_v56 }
0x2c0f   :  { %6031 = vmatprep.subr.bf16.mxu0 %v6739_v58 }
0x2c10   :  { %5409 = vmatprep.mubr.bf16.mxu1 %v4939_v53 }
0x2c11   :  { %5410 = vmatmul.mubr.bf16.vlgmr.msra.gmra.mrb[112].mxu1 %v4938_v8 }
0x2c12   :  { %6032 = vmatpush3.bf16.msra.mxu0 %v6740_v5 }
0x2c13   :  { %6033 = vmatprep.subr.bf16.mxu0 %v6741_v2 }
0x2c16   :  { %6034 = vmatpush3.bf16.msra.mxu0 %v6742_v63 }
0x2c17   :  { %6035 = vmatprep.subr.bf16.mxu0 %v6743_v57 }
0x2c1a   :  { %6036 = vmatpush3.bf16.msra.mxu0 %v6744_v0 }
0x2c1b   :  { %6037 = vmatprep.subr.bf16.mxu0 %v6745_v46 }
0x2c1e   :  { %6038 = vmatpush3.bf16.msra.mxu0 %v6746_v3 }
0x2c1f   :  { %6039 = vmatprep.subr.bf16.mxu0 %v6747_v44 }
0x2c22   :  { %6040 = vmatpush3.bf16.msra.mxu0 %v6748_v50 }
0x2c23   :  { %6041 = vmatprep.subr.bf16.mxu0 %v6749_v52 }
0x2c26   :  { %6042 = vmatpush3.bf16.msra.mxu0 %v6750_v45 }
0x2cdc   :  { %v5370_v32 = vpop.f32.mrb[88].mxu0 }
0x2cdd   :  { %v5372_v49 = vpop.f32.mrb[89].mxu0  ;;  %v5371_v23 = vadd.f32 %v5370_v32, %v5009_v4 }
0x2cde   :  { %v5374_v60 = vpop.f32.mrb[90].mxu0  ;;  %v5373_v54 = vadd.f32 %v5372_v49, %v5013_v15 }
0x2cdf   :  { %v5375_v11 = vpop.f32.mrb[91].mxu0 }
0x2ce4   :  { %v5411_v22 = vpop.f32.mrb[112].mxu1 }
0x2ce5   :  { %v5412_v12 = vadd.f32 %v5411_v22, %v5371_v23  ;;  %v5413_v27 = vpop.f32.mrb[113].mxu1 }
0x2ce6   :  { %v5414_v48 = vadd.f32 %v5413_v27, %v5373_v54  ;;  %v5415_v31 = vpop.f32.mrb[114].mxu1 }
0x2ce7   :  { %v5418_v30 = vmax.f32 %v5412_v12, 0.0  ;;  %v5416_v28 = vpop.f32.mrb[115].mxu1 }
0x2ce8   :  { %v5419_v29 = vmax.f32 %v5414_v48, 0.0 }
0x2ce9   :  { %v5420_v62 = vmin.f32 %v5418_v30, 6.0 }
0x2cea   :  { %v5421_v33 = vmin.f32 %v5419_v29, 6.0 }
0x2ceb   :  { %v5422_v59 = vpack.c.bf16 %v5420_v62, %v5420_v62 }
0x2cec   :  { %v5423_v18 = vpack.c.bf16 %v5421_v33, %v5421_v33 }
0x2cee   :  { %5591 = vmatprep.mubr.bf16.mxu0 %v5423_v18 }
0x2cef   :  { %5592 = vmatmul.mubr.bf16.vlgmr.msra.gmra.mrb[92].mxu0 %v5422_v59 }
0x2dc2   :  { %v6043_v41 = vpop.f32.mrb[92].mxu0 }
0x2dc3   :  { %v6044_v14 = vpop.f32.mrb[93].mxu0 }
0x2dc4   :  { %v6045_v55 = vadd.f32 %v6044_v14, %v6043_v41  ;;  %v6046_v19 = vpop.f32.mrb[94].mxu0 }
0x2dc5   :  { %v6047_v26 = vpop.f32.mrb[95].mxu0 }
0x2dc6   :  { %v5594_v1 = vadd.f32 %v6045_v55, %v5821_v42 }
0x2dc8   :  { %v5838_v9 = vmul.f32 -1.442695, %v5594_v1 }
0x2dca   :  { %7071 = vpow2.f32 %v5838_v9 }
0x2dd4   :  { %v7072_v7 = vpop.eup %7071 }
0x2dd5   :  { %v5602_v37 = vadd.f32 1.0, %v7072_v7 }
0x2dd7   :  { %7073 = vrcp.f32 %v5602_v37 }
0x2de1   :  { %v7074_v24 = vpop.eup %7073 }
0x2de2   :  { %5605 = vst [vmem:[#allocation5] sm:$0x3] %v7074_v24 }
0x2de3   :  { %7108 = shalt.err (!%p7105_p12)
}
0x2de4   :  { %s7109_s30 = scalar_lea.hbm %s8901_s26, 32 }
0x2de5   :  { %p7110_p13 = scmp.ne.s32.totalorder %s8901_s26, %s7109_s30  ;;  %p7113_p0 = scmp.lt.u32.totalorder %s7109_s30, %s8901_s26 }
0x2de7   :  { %p7115_p1 = pnand %p7113_p0, %p7110_p13 }
0x2de9   :  { %7118 = shalt.err (!%p7115_p1)
}
0x2dea   :  { %5615 = dma.vmem_to_hbm [thread:$0]  %s5613_s16, 32, %s8901_s26, [#allocation4]  }
0x2deb   :  { %7121 = dma.done.wait [#allocation4], 32  }
0x2dec   :  { %7122 = vsyncadd [#allocation4], 4294967264 }
0x2ded   :  { %5619 = vsyncpa [#allocation3], 1 }
0x2dee   :  { %5620 = vsyncpa [#allocation4], 1 }

</bundles_post_ra>
